<compile_context>
chip_gen: v7x
topology: tpu7x:2x2x1
jax: 0.10.0
libtpu: 0.0.40
codegen_flags: <defaults>
</compile_context>

<pallas_src>
import jax
import jax.numpy as jnp
from jax import lax
from jax.experimental import pallas as pl
from jax.experimental.pallas import tpu as pltpu


# ------------------------------ Fused kernel --------------------------------
def hybrid_fused_kernel(patches_ref, cw_ref, cb_ref, w_ih_ref, w_hh_ref, b_ref,
                        w_d_ref, b_d_ref, o_ref):
    # patches: (Lout*B, K*Cin)  im2col rows: row l*B + b, col k*Cin + c == x[b, c, l+k]
    # cw:      (K*Cin, Cout)    im2col conv weight: row k*Cin + c == conv_w[:, c, k]
    # cb:      (1, Cout)
    # w_ih:    (Cout, 4H)   w_hh: (H, 4H)   b: (1, 4H)   (g-gate columns pre-scaled x2)
    # w_d:     (H, O)       b_d:  (1, O)
    # o:       (B, O)
    B, _ = o_ref.shape
    LB = patches_ref.shape[0]
    Lout = LB // B
    H, H4 = w_hh_ref.shape

    # ---- Conv1d ('valid', stride 1) as ONE im2col MXU matmul + ReLU ------------
    feat = jnp.dot(patches_ref[...], cw_ref[...],
                   preferred_element_type=jnp.float32,
                   precision=lax.Precision.HIGHEST)
    feat = jnp.maximum(feat + cb_ref[...], 0.0)            # (Lout*B, Cout), NLC order

    # ---- Hoisted LSTM input projection for ALL timesteps (value-resident) ------
    gx = (jnp.dot(feat, w_ih_ref[...],
                  preferred_element_type=jnp.float32,
                  precision=lax.Precision.HIGHEST)
          + b_ref[...])                                    # (Lout*B, 4H)

    # Loop-invariant rows of w_hh, sliced once (each (1, 4H)).
    w_hh = w_hh_ref[...]
    w_rows = [lax.slice_in_dim(w_hh, j, j + 1, axis=0) for j in range(H)]

    # ---- Recurrence: only the VPU MAC on h sits on the serial chain ------------
    h = jnp.zeros((B, H), jnp.float32)
    c = jnp.zeros((B, H), jnp.float32)
    for t in range(Lout):                                  # fully unrolled, static
        # Static (off-chain) slice of the pre-computed input gates.
        g_x = lax.slice_in_dim(gx, t * B, (t + 1) * B, axis=0)          # (B, 4H)

        # h @ w_hh as H broadcast-mults + balanced tree of adds on the VPU
        # (no MXU result-FIFO latency per serial step; exact f32).
        terms = [h[:, j:j + 1] * w_rows[j] for j in range(H)]           # (B, 4H) each
        while len(terms) > 1:
            nxt = [terms[i] + terms[i + 1] for i in range(0, len(terms) - 1, 2)]
            if len(terms) % 2:
                nxt.append(terms[-1])
            terms = nxt
        gates = g_x + terms[0]                                          # (B, 4H)

        # g-gate columns were pre-scaled by 2  =>  tanh(z) = 2*sigmoid(2z) - 1,
        # so ONE sigmoid over the whole (B, 4H) row covers all four gates.
        s = jax.nn.sigmoid(gates)
        i_g = s[:, 0 * H:1 * H]
        f_g = s[:, 1 * H:2 * H]
        g_g = 2.0 * s[:, 2 * H:3 * H] - 1.0
        o_g = s[:, 3 * H:4 * H]
        c = f_g * c + i_g * g_g
        h = o_g * jnp.tanh(c)

    # ---- Dense head on the last hidden state (== out[:, -1, :]) ----------------
    o_ref[...] = (jnp.dot(h, w_d_ref[...],
                          preferred_element_type=jnp.float32,
                          precision=lax.Precision.HIGHEST)
                  + b_d_ref[...])


# -------------------------------- Wrappers ----------------------------------
def prepare_hybrid_params(params):
    """One-time layout prep from PyTorch-style weights:
    im2col conv weight, transposed LSTM/dense weights, combined LSTM bias, and
    the x2 pre-scaling of the g-gate columns used by the fused-sigmoid trick."""
    conv_w = params["conv_w"]                       # (Cout, Cin, K)   torch Conv1d
    Cout, Cin, K = conv_w.shape
    cw = jnp.transpose(conv_w, (2, 1, 0)).reshape(K * Cin, Cout)
    cb = params["conv_b"].reshape(1, Cout)

    w_ih = params["lstm_w_ih"].T                    # (4H, Cin') -> (Cin', 4H)
    w_hh = params["lstm_w_hh"].T                    # (4H, H)    -> (H, 4H)
    b = (params["lstm_b_ih"] + params["lstm_b_hh"]).reshape(1, -1)
    H4 = w_hh.shape[1]
    H = H4 // 4
    # tanh(z) = 2*sigmoid(2z) - 1  ->  scale g-gate (cell candidate) columns by 2.
    scale = jnp.ones((1, H4), jnp.float32).at[:, 2 * H:3 * H].set(2.0)
    w_ih = w_ih * scale
    w_hh = w_hh * scale
    b = b * scale

    w_d = params["dense_w"].T                       # (O, H) -> (H, O)
    b_d = params["dense_b"].reshape(1, -1)
    return dict(cw=cw, cb=cb, w_ih=w_ih, w_hh=w_hh, b=b, w_d=w_d, b_d=b_d)


def hybrid_forward(x, prep):
    """x: (B, Cin, L) float32 (PyTorch NCL layout)."""
    B, Cin, L = x.shape
    KC, Cout = prep["cw"].shape
    K = KC // Cin
    Lout = L - K + 1
    O = prep["w_d"].shape[1]

    # im2col in XLA (pure layout work on a tiny array). Row l*B + b, col k*Cin + c.
    xt = jnp.transpose(x, (2, 0, 1))                               # (L, B, Cin)
    patches = jnp.concatenate([xt[k:k + Lout] for k in range(K)], axis=-1)
    patches = patches.reshape(Lout * B, K * Cin)                   # (Lout*B, K*Cin)

    return pl.pallas_call(
        hybrid_fused_kernel,
        out_shape=jax.ShapeDtypeStruct((B, O), jnp.float32),
        in_specs=[pl.BlockSpec(memory_space=pltpu.MemorySpace.VMEM)] * 8,
        out_specs=pl.BlockSpec(memory_space=pltpu.MemorySpace.VMEM),
    )(patches, prep["cw"], prep["cb"], prep["w_ih"], prep["w_hh"], prep["b"],
      prep["w_d"], prep["b_d"])


# ---------------------------- Pure-JAX reference ----------------------------
def reference_forward(x, params):
    conv_w, conv_b = params["conv_w"], params["conv_b"]
    Cout, Cin, K = conv_w.shape
    B, _, L = x.shape
    Lout = L - K + 1
    y = jnp.zeros((B, Cout, Lout), jnp.float32)
    for k in range(K):
        y = y + jnp.einsum("oc,bcl->bol", conv_w[:, :, k], x[:, :, k:k + Lout],
                           precision="highest")
    y = jax.nn.relu(y + conv_b[None, :, None])
    y = jnp.transpose(y, (0, 2, 1))                            # (B, Lout, Cout)

    w_ih, w_hh = params["lstm_w_ih"], params["lstm_w_hh"]
    b = params["lstm_b_ih"] + params["lstm_b_hh"]
    H = w_hh.shape[1]
    h = jnp.zeros((B, H), jnp.float32)
    c = jnp.zeros((B, H), jnp.float32)
    for t in range(Lout):
        gates = (jnp.dot(y[:, t, :], w_ih.T, precision="highest")
                 + jnp.dot(h, w_hh.T, precision="highest") + b)
        i = jax.nn.sigmoid(gates[:, :H])
        f = jax.nn.sigmoid(gates[:, H:2 * H])
        g = jnp.tanh(gates[:, 2 * H:3 * H])
        o = jax.nn.sigmoid(gates[:, 3 * H:4 * H])
        c = f * c + i * g
        h = o * jnp.tanh(c)
    return jnp.dot(h, params["dense_w"].T, precision="highest") + params["dense_b"]


# ----------------------------------- Main ------------------------------------
if __name__ == "__main__":
    B, Cin, L = 2, 4, 16        # batch, input channels (one-hot DNA), input_len
    Cout, K = 8, 3              # conv channels / kernel size
    H = 16                      # LSTM hidden dim (recurrent_block.out_channels)
    OUT = 2                     # output_dim

    key = jax.random.PRNGKey(0)
    ks = jax.random.split(key, 10)

    x = jax.random.normal(ks[0], (B, Cin, L), dtype=jnp.float32)

    # PyTorch-layout parameters.
    params = {
        "conv_w":    0.1 * jax.random.normal(ks[1], (Cout, Cin, K), dtype=jnp.float32),
        "conv_b":    0.1 * jax.random.normal(ks[2], (Cout,), dtype=jnp.float32),
        "lstm_w_ih": 0.1 * jax.random.normal(ks[3], (4 * H, Cout), dtype=jnp.float32),
        "lstm_w_hh": 0.1 * jax.random.normal(ks[4], (4 * H, H), dtype=jnp.float32),
        "lstm_b_ih": 0.1 * jax.random.normal(ks[5], (4 * H,), dtype=jnp.float32),
        "lstm_b_hh": 0.1 * jax.random.normal(ks[6], (4 * H,), dtype=jnp.float32),
        "dense_w":   0.1 * jax.random.normal(ks[7], (OUT, H), dtype=jnp.float32),
        "dense_b":   0.1 * jax.random.normal(ks[8], (OUT,), dtype=jnp.float32),
    }

    prep = prepare_hybrid_params(params)
    fwd = jax.jit(hybrid_forward)

    out = fwd(x, prep)
    out = jax.block_until_ready(out)
    assert out.shape == (B, OUT) and out.dtype == jnp.float32

    ref = jax.block_until_ready(reference_forward(x, params))
    assert jnp.allclose(out, ref, atol=1e-4, rtol=1e-4), (out, ref)

    print("KERNEL_OK")
</pallas_src>

<mosaic_0001>
module attributes {stable_mosaic.version = 11 : i64} {
  func.func @hybrid_fused_kernel(%arg0: memref<28x12xf32, #tpu.memory_space<vmem>>, %arg1: memref<12x8xf32, #tpu.memory_space<vmem>>, %arg2: memref<1x8xf32, #tpu.memory_space<vmem>>, %arg3: memref<8x64xf32, #tpu.memory_space<vmem>>, %arg4: memref<16x64xf32, #tpu.memory_space<vmem>>, %arg5: memref<1x64xf32, #tpu.memory_space<vmem>>, %arg6: memref<16x2xf32, #tpu.memory_space<vmem>>, %arg7: memref<1x2xf32, #tpu.memory_space<vmem>>, %arg8: memref<2x2xf32, #tpu.memory_space<vmem>>) attributes {dimension_semantics = [], scalar_prefetch = 0 : i64, scratch_operands = 0 : i64, tpu.core_type = #tpu.core_type<tc>} {
    %c0 = arith.constant 0 : index
    %c0_0 = arith.constant 0 : index
    %0 = vector.load %arg0[%c0, %c0_0] : memref<28x12xf32, #tpu.memory_space<vmem>>, vector<28x12xf32>
    %c0_1 = arith.constant 0 : index
    %c0_2 = arith.constant 0 : index
    %1 = vector.load %arg1[%c0_1, %c0_2] : memref<12x8xf32, #tpu.memory_space<vmem>>, vector<12x8xf32>
    %cst = arith.constant dense<0.000000e+00> : vector<28x8xf32>
    %2 = tpu.matmul %0, %1, %cst {dimension_numbers = #tpu.dot_dimension_numbers<[1], [0], [0], [1], [0, 0, 1, 1], [], []>, precision = #tpu.contract_precision<fp32>} : vector<28x12xf32>, vector<12x8xf32>, vector<28x8xf32> -> vector<28x8xf32>
    %c0_3 = arith.constant 0 : index
    %c0_4 = arith.constant 0 : index
    %3 = vector.load %arg2[%c0_3, %c0_4] : memref<1x8xf32, #tpu.memory_space<vmem>>, vector<1x8xf32>
    %4 = vector.broadcast %3 : vector<1x8xf32> to vector<28x8xf32>
    %5 = arith.addf %2, %4 : vector<28x8xf32>
    %cst_5 = arith.constant 0.000000e+00 : f32
    %6 = vector.broadcast %cst_5 : f32 to vector<28x8xf32>
    %7 = arith.maximumf %5, %6 : vector<28x8xf32>
    %c0_6 = arith.constant 0 : index
    %c0_7 = arith.constant 0 : index
    %8 = vector.load %arg3[%c0_6, %c0_7] : memref<8x64xf32, #tpu.memory_space<vmem>>, vector<8x64xf32>
    %cst_8 = arith.constant dense<0.000000e+00> : vector<28x64xf32>
    %9 = tpu.matmul %7, %8, %cst_8 {dimension_numbers = #tpu.dot_dimension_numbers<[1], [0], [0], [1], [0, 0, 1, 1], [], []>, precision = #tpu.contract_precision<fp32>} : vector<28x8xf32>, vector<8x64xf32>, vector<28x64xf32> -> vector<28x64xf32>
    %c0_9 = arith.constant 0 : index
    %c0_10 = arith.constant 0 : index
    %10 = vector.load %arg5[%c0_9, %c0_10] : memref<1x64xf32, #tpu.memory_space<vmem>>, vector<1x64xf32>
    %11 = vector.broadcast %10 : vector<1x64xf32> to vector<28x64xf32>
    %12 = arith.addf %9, %11 : vector<28x64xf32>
    %c0_11 = arith.constant 0 : index
    %c0_12 = arith.constant 0 : index
    %13 = vector.load %arg4[%c0_11, %c0_12] : memref<16x64xf32, #tpu.memory_space<vmem>>, vector<16x64xf32>
    %14 = vector.extract_strided_slice %13 {offsets = [0, 0], sizes = [1, 64], strides = [1, 1]} : vector<16x64xf32> to vector<1x64xf32>
    %15 = vector.extract_strided_slice %13 {offsets = [1, 0], sizes = [1, 64], strides = [1, 1]} : vector<16x64xf32> to vector<1x64xf32>
    %16 = vector.extract_strided_slice %13 {offsets = [2, 0], sizes = [1, 64], strides = [1, 1]} : vector<16x64xf32> to vector<1x64xf32>
    %17 = vector.extract_strided_slice %13 {offsets = [3, 0], sizes = [1, 64], strides = [1, 1]} : vector<16x64xf32> to vector<1x64xf32>
    %18 = vector.extract_strided_slice %13 {offsets = [4, 0], sizes = [1, 64], strides = [1, 1]} : vector<16x64xf32> to vector<1x64xf32>
    %19 = vector.extract_strided_slice %13 {offsets = [5, 0], sizes = [1, 64], strides = [1, 1]} : vector<16x64xf32> to vector<1x64xf32>
    %20 = vector.extract_strided_slice %13 {offsets = [6, 0], sizes = [1, 64], strides = [1, 1]} : vector<16x64xf32> to vector<1x64xf32>
    %21 = vector.extract_strided_slice %13 {offsets = [7, 0], sizes = [1, 64], strides = [1, 1]} : vector<16x64xf32> to vector<1x64xf32>
    %22 = vector.extract_strided_slice %13 {offsets = [8, 0], sizes = [1, 64], strides = [1, 1]} : vector<16x64xf32> to vector<1x64xf32>
    %23 = vector.extract_strided_slice %13 {offsets = [9, 0], sizes = [1, 64], strides = [1, 1]} : vector<16x64xf32> to vector<1x64xf32>
    %24 = vector.extract_strided_slice %13 {offsets = [10, 0], sizes = [1, 64], strides = [1, 1]} : vector<16x64xf32> to vector<1x64xf32>
    %25 = vector.extract_strided_slice %13 {offsets = [11, 0], sizes = [1, 64], strides = [1, 1]} : vector<16x64xf32> to vector<1x64xf32>
    %26 = vector.extract_strided_slice %13 {offsets = [12, 0], sizes = [1, 64], strides = [1, 1]} : vector<16x64xf32> to vector<1x64xf32>
    %27 = vector.extract_strided_slice %13 {offsets = [13, 0], sizes = [1, 64], strides = [1, 1]} : vector<16x64xf32> to vector<1x64xf32>
    %28 = vector.extract_strided_slice %13 {offsets = [14, 0], sizes = [1, 64], strides = [1, 1]} : vector<16x64xf32> to vector<1x64xf32>
    %29 = vector.extract_strided_slice %13 {offsets = [15, 0], sizes = [1, 64], strides = [1, 1]} : vector<16x64xf32> to vector<1x64xf32>
    %cst_13 = arith.constant 0.000000e+00 : f32
    %30 = vector.broadcast %cst_13 : f32 to vector<2x16xf32>
    %cst_14 = arith.constant 0.000000e+00 : f32
    %31 = vector.broadcast %cst_14 : f32 to vector<2x16xf32>
    %32 = vector.extract_strided_slice %12 {offsets = [0, 0], sizes = [2, 64], strides = [1, 1]} : vector<28x64xf32> to vector<2x64xf32>
    %33 = vector.extract_strided_slice %30 {offsets = [0, 0], sizes = [2, 1], strides = [1, 1]} : vector<2x16xf32> to vector<2x1xf32>
    %34 = vector.broadcast %33 : vector<2x1xf32> to vector<2x64xf32>
    %35 = vector.broadcast %14 : vector<1x64xf32> to vector<2x64xf32>
    %36 = arith.mulf %34, %35 : vector<2x64xf32>
    %37 = vector.extract_strided_slice %30 {offsets = [0, 1], sizes = [2, 1], strides = [1, 1]} : vector<2x16xf32> to vector<2x1xf32>
    %38 = vector.broadcast %37 : vector<2x1xf32> to vector<2x64xf32>
    %39 = vector.broadcast %15 : vector<1x64xf32> to vector<2x64xf32>
    %40 = arith.mulf %38, %39 : vector<2x64xf32>
    %41 = vector.extract_strided_slice %30 {offsets = [0, 2], sizes = [2, 1], strides = [1, 1]} : vector<2x16xf32> to vector<2x1xf32>
    %42 = vector.broadcast %41 : vector<2x1xf32> to vector<2x64xf32>
    %43 = vector.broadcast %16 : vector<1x64xf32> to vector<2x64xf32>
    %44 = arith.mulf %42, %43 : vector<2x64xf32>
    %45 = vector.extract_strided_slice %30 {offsets = [0, 3], sizes = [2, 1], strides = [1, 1]} : vector<2x16xf32> to vector<2x1xf32>
    %46 = vector.broadcast %45 : vector<2x1xf32> to vector<2x64xf32>
    %47 = vector.broadcast %17 : vector<1x64xf32> to vector<2x64xf32>
    %48 = arith.mulf %46, %47 : vector<2x64xf32>
    %49 = vector.extract_strided_slice %30 {offsets = [0, 4], sizes = [2, 1], strides = [1, 1]} : vector<2x16xf32> to vector<2x1xf32>
    %50 = vector.broadcast %49 : vector<2x1xf32> to vector<2x64xf32>
    %51 = vector.broadcast %18 : vector<1x64xf32> to vector<2x64xf32>
    %52 = arith.mulf %50, %51 : vector<2x64xf32>
    %53 = vector.extract_strided_slice %30 {offsets = [0, 5], sizes = [2, 1], strides = [1, 1]} : vector<2x16xf32> to vector<2x1xf32>
    %54 = vector.broadcast %53 : vector<2x1xf32> to vector<2x64xf32>
    %55 = vector.broadcast %19 : vector<1x64xf32> to vector<2x64xf32>
    %56 = arith.mulf %54, %55 : vector<2x64xf32>
    %57 = vector.extract_strided_slice %30 {offsets = [0, 6], sizes = [2, 1], strides = [1, 1]} : vector<2x16xf32> to vector<2x1xf32>
    %58 = vector.broadcast %57 : vector<2x1xf32> to vector<2x64xf32>
    %59 = vector.broadcast %20 : vector<1x64xf32> to vector<2x64xf32>
    %60 = arith.mulf %58, %59 : vector<2x64xf32>
    %61 = vector.extract_strided_slice %30 {offsets = [0, 7], sizes = [2, 1], strides = [1, 1]} : vector<2x16xf32> to vector<2x1xf32>
    %62 = vector.broadcast %61 : vector<2x1xf32> to vector<2x64xf32>
    %63 = vector.broadcast %21 : vector<1x64xf32> to vector<2x64xf32>
    %64 = arith.mulf %62, %63 : vector<2x64xf32>
    %65 = vector.extract_strided_slice %30 {offsets = [0, 8], sizes = [2, 1], strides = [1, 1]} : vector<2x16xf32> to vector<2x1xf32>
    %66 = vector.broadcast %65 : vector<2x1xf32> to vector<2x64xf32>
    %67 = vector.broadcast %22 : vector<1x64xf32> to vector<2x64xf32>
    %68 = arith.mulf %66, %67 : vector<2x64xf32>
    %69 = vector.extract_strided_slice %30 {offsets = [0, 9], sizes = [2, 1], strides = [1, 1]} : vector<2x16xf32> to vector<2x1xf32>
    %70 = vector.broadcast %69 : vector<2x1xf32> to vector<2x64xf32>
    %71 = vector.broadcast %23 : vector<1x64xf32> to vector<2x64xf32>
    %72 = arith.mulf %70, %71 : vector<2x64xf32>
    %73 = vector.extract_strided_slice %30 {offsets = [0, 10], sizes = [2, 1], strides = [1, 1]} : vector<2x16xf32> to vector<2x1xf32>
    %74 = vector.broadcast %73 : vector<2x1xf32> to vector<2x64xf32>
    %75 = vector.broadcast %24 : vector<1x64xf32> to vector<2x64xf32>
    %76 = arith.mulf %74, %75 : vector<2x64xf32>
    %77 = vector.extract_strided_slice %30 {offsets = [0, 11], sizes = [2, 1], strides = [1, 1]} : vector<2x16xf32> to vector<2x1xf32>
    %78 = vector.broadcast %77 : vector<2x1xf32> to vector<2x64xf32>
    %79 = vector.broadcast %25 : vector<1x64xf32> to vector<2x64xf32>
    %80 = arith.mulf %78, %79 : vector<2x64xf32>
    %81 = vector.extract_strided_slice %30 {offsets = [0, 12], sizes = [2, 1], strides = [1, 1]} : vector<2x16xf32> to vector<2x1xf32>
    %82 = vector.broadcast %81 : vector<2x1xf32> to vector<2x64xf32>
    %83 = vector.broadcast %26 : vector<1x64xf32> to vector<2x64xf32>
    %84 = arith.mulf %82, %83 : vector<2x64xf32>
    %85 = vector.extract_strided_slice %30 {offsets = [0, 13], sizes = [2, 1], strides = [1, 1]} : vector<2x16xf32> to vector<2x1xf32>
    %86 = vector.broadcast %85 : vector<2x1xf32> to vector<2x64xf32>
    %87 = vector.broadcast %27 : vector<1x64xf32> to vector<2x64xf32>
    %88 = arith.mulf %86, %87 : vector<2x64xf32>
    %89 = vector.extract_strided_slice %30 {offsets = [0, 14], sizes = [2, 1], strides = [1, 1]} : vector<2x16xf32> to vector<2x1xf32>
    %90 = vector.broadcast %89 : vector<2x1xf32> to vector<2x64xf32>
    %91 = vector.broadcast %28 : vector<1x64xf32> to vector<2x64xf32>
    %92 = arith.mulf %90, %91 : vector<2x64xf32>
    %93 = vector.extract_strided_slice %30 {offsets = [0, 15], sizes = [2, 1], strides = [1, 1]} : vector<2x16xf32> to vector<2x1xf32>
    %94 = vector.broadcast %93 : vector<2x1xf32> to vector<2x64xf32>
    %95 = vector.broadcast %29 : vector<1x64xf32> to vector<2x64xf32>
    %96 = arith.mulf %94, %95 : vector<2x64xf32>
    %97 = arith.addf %36, %40 : vector<2x64xf32>
    %98 = arith.addf %44, %48 : vector<2x64xf32>
    %99 = arith.addf %52, %56 : vector<2x64xf32>
    %100 = arith.addf %60, %64 : vector<2x64xf32>
    %101 = arith.addf %68, %72 : vector<2x64xf32>
    %102 = arith.addf %76, %80 : vector<2x64xf32>
    %103 = arith.addf %84, %88 : vector<2x64xf32>
    %104 = arith.addf %92, %96 : vector<2x64xf32>
    %105 = arith.addf %97, %98 : vector<2x64xf32>
    %106 = arith.addf %99, %100 : vector<2x64xf32>
    %107 = arith.addf %101, %102 : vector<2x64xf32>
    %108 = arith.addf %103, %104 : vector<2x64xf32>
    %109 = arith.addf %105, %106 : vector<2x64xf32>
    %110 = arith.addf %107, %108 : vector<2x64xf32>
    %111 = arith.addf %109, %110 : vector<2x64xf32>
    %112 = arith.addf %32, %111 : vector<2x64xf32>
    %113 = arith.negf %112 : vector<2x64xf32>
    %114 = math.exp %113 : vector<2x64xf32>
    %cst_15 = arith.constant 1.000000e+00 : f32
    %115 = vector.broadcast %cst_15 : f32 to vector<2x64xf32>
    %116 = arith.addf %115, %114 : vector<2x64xf32>
    %117 = arith.divf %115, %116 : vector<2x64xf32>
    %118 = vector.extract_strided_slice %117 {offsets = [0, 0], sizes = [2, 16], strides = [1, 1]} : vector<2x64xf32> to vector<2x16xf32>
    %119 = vector.extract_strided_slice %117 {offsets = [0, 16], sizes = [2, 16], strides = [1, 1]} : vector<2x64xf32> to vector<2x16xf32>
    %120 = vector.extract_strided_slice %117 {offsets = [0, 32], sizes = [2, 16], strides = [1, 1]} : vector<2x64xf32> to vector<2x16xf32>
    %cst_16 = arith.constant 2.000000e+00 : f32
    %121 = vector.broadcast %cst_16 : f32 to vector<2x16xf32>
    %122 = arith.mulf %121, %120 : vector<2x16xf32>
    %cst_17 = arith.constant 1.000000e+00 : f32
    %123 = vector.broadcast %cst_17 : f32 to vector<2x16xf32>
    %124 = arith.subf %122, %123 : vector<2x16xf32>
    %125 = vector.extract_strided_slice %117 {offsets = [0, 48], sizes = [2, 16], strides = [1, 1]} : vector<2x64xf32> to vector<2x16xf32>
    %126 = arith.mulf %119, %31 : vector<2x16xf32>
    %127 = arith.mulf %118, %124 : vector<2x16xf32>
    %128 = arith.addf %126, %127 : vector<2x16xf32>
    %129 = math.tanh %128 : vector<2x16xf32>
    %130 = arith.mulf %125, %129 : vector<2x16xf32>
    %131 = vector.extract_strided_slice %12 {offsets = [2, 0], sizes = [2, 64], strides = [1, 1]} : vector<28x64xf32> to vector<2x64xf32>
    %132 = vector.extract_strided_slice %130 {offsets = [0, 0], sizes = [2, 1], strides = [1, 1]} : vector<2x16xf32> to vector<2x1xf32>
    %133 = vector.broadcast %132 : vector<2x1xf32> to vector<2x64xf32>
    %134 = vector.broadcast %14 : vector<1x64xf32> to vector<2x64xf32>
    %135 = arith.mulf %133, %134 : vector<2x64xf32>
    %136 = vector.extract_strided_slice %130 {offsets = [0, 1], sizes = [2, 1], strides = [1, 1]} : vector<2x16xf32> to vector<2x1xf32>
    %137 = vector.broadcast %136 : vector<2x1xf32> to vector<2x64xf32>
    %138 = vector.broadcast %15 : vector<1x64xf32> to vector<2x64xf32>
    %139 = arith.mulf %137, %138 : vector<2x64xf32>
    %140 = vector.extract_strided_slice %130 {offsets = [0, 2], sizes = [2, 1], strides = [1, 1]} : vector<2x16xf32> to vector<2x1xf32>
    %141 = vector.broadcast %140 : vector<2x1xf32> to vector<2x64xf32>
    %142 = vector.broadcast %16 : vector<1x64xf32> to vector<2x64xf32>
    %143 = arith.mulf %141, %142 : vector<2x64xf32>
    %144 = vector.extract_strided_slice %130 {offsets = [0, 3], sizes = [2, 1], strides = [1, 1]} : vector<2x16xf32> to vector<2x1xf32>
    %145 = vector.broadcast %144 : vector<2x1xf32> to vector<2x64xf32>
    %146 = vector.broadcast %17 : vector<1x64xf32> to vector<2x64xf32>
    %147 = arith.mulf %145, %146 : vector<2x64xf32>
    %148 = vector.extract_strided_slice %130 {offsets = [0, 4], sizes = [2, 1], strides = [1, 1]} : vector<2x16xf32> to vector<2x1xf32>
    %149 = vector.broadcast %148 : vector<2x1xf32> to vector<2x64xf32>
    %150 = vector.broadcast %18 : vector<1x64xf32> to vector<2x64xf32>
    %151 = arith.mulf %149, %150 : vector<2x64xf32>
    %152 = vector.extract_strided_slice %130 {offsets = [0, 5], sizes = [2, 1], strides = [1, 1]} : vector<2x16xf32> to vector<2x1xf32>
    %153 = vector.broadcast %152 : vector<2x1xf32> to vector<2x64xf32>
    %154 = vector.broadcast %19 : vector<1x64xf32> to vector<2x64xf32>
    %155 = arith.mulf %153, %154 : vector<2x64xf32>
    %156 = vector.extract_strided_slice %130 {offsets = [0, 6], sizes = [2, 1], strides = [1, 1]} : vector<2x16xf32> to vector<2x1xf32>
    %157 = vector.broadcast %156 : vector<2x1xf32> to vector<2x64xf32>
    %158 = vector.broadcast %20 : vector<1x64xf32> to vector<2x64xf32>
    %159 = arith.mulf %157, %158 : vector<2x64xf32>
    %160 = vector.extract_strided_slice %130 {offsets = [0, 7], sizes = [2, 1], strides = [1, 1]} : vector<2x16xf32> to vector<2x1xf32>
    %161 = vector.broadcast %160 : vector<2x1xf32> to vector<2x64xf32>
    %162 = vector.broadcast %21 : vector<1x64xf32> to vector<2x64xf32>
    %163 = arith.mulf %161, %162 : vector<2x64xf32>
    %164 = vector.extract_strided_slice %130 {offsets = [0, 8], sizes = [2, 1], strides = [1, 1]} : vector<2x16xf32> to vector<2x1xf32>
    %165 = vector.broadcast %164 : vector<2x1xf32> to vector<2x64xf32>
    %166 = vector.broadcast %22 : vector<1x64xf32> to vector<2x64xf32>
    %167 = arith.mulf %165, %166 : vector<2x64xf32>
    %168 = vector.extract_strided_slice %130 {offsets = [0, 9], sizes = [2, 1], strides = [1, 1]} : vector<2x16xf32> to vector<2x1xf32>
    %169 = vector.broadcast %168 : vector<2x1xf32> to vector<2x64xf32>
    %170 = vector.broadcast %23 : vector<1x64xf32> to vector<2x64xf32>
    %171 = arith.mulf %169, %170 : vector<2x64xf32>
    %172 = vector.extract_strided_slice %130 {offsets = [0, 10], sizes = [2, 1], strides = [1, 1]} : vector<2x16xf32> to vector<2x1xf32>
    %173 = vector.broadcast %172 : vector<2x1xf32> to vector<2x64xf32>
    %174 = vector.broadcast %24 : vector<1x64xf32> to vector<2x64xf32>
    %175 = arith.mulf %173, %174 : vector<2x64xf32>
    %176 = vector.extract_strided_slice %130 {offsets = [0, 11], sizes = [2, 1], strides = [1, 1]} : vector<2x16xf32> to vector<2x1xf32>
    %177 = vector.broadcast %176 : vector<2x1xf32> to vector<2x64xf32>
    %178 = vector.broadcast %25 : vector<1x64xf32> to vector<2x64xf32>
    %179 = arith.mulf %177, %178 : vector<2x64xf32>
    %180 = vector.extract_strided_slice %130 {offsets = [0, 12], sizes = [2, 1], strides = [1, 1]} : vector<2x16xf32> to vector<2x1xf32>
    %181 = vector.broadcast %180 : vector<2x1xf32> to vector<2x64xf32>
    %182 = vector.broadcast %26 : vector<1x64xf32> to vector<2x64xf32>
    %183 = arith.mulf %181, %182 : vector<2x64xf32>
    %184 = vector.extract_strided_slice %130 {offsets = [0, 13], sizes = [2, 1], strides = [1, 1]} : vector<2x16xf32> to vector<2x1xf32>
    %185 = vector.broadcast %184 : vector<2x1xf32> to vector<2x64xf32>
    %186 = vector.broadcast %27 : vector<1x64xf32> to vector<2x64xf32>
    %187 = arith.mulf %185, %186 : vector<2x64xf32>
    %188 = vector.extract_strided_slice %130 {offsets = [0, 14], sizes = [2, 1], strides = [1, 1]} : vector<2x16xf32> to vector<2x1xf32>
    %189 = vector.broadcast %188 : vector<2x1xf32> to vector<2x64xf32>
    %190 = vector.broadcast %28 : vector<1x64xf32> to vector<2x64xf32>
    %191 = arith.mulf %189, %190 : vector<2x64xf32>
    %192 = vector.extract_strided_slice %130 {offsets = [0, 15], sizes = [2, 1], strides = [1, 1]} : vector<2x16xf32> to vector<2x1xf32>
    %193 = vector.broadcast %192 : vector<2x1xf32> to vector<2x64xf32>
    %194 = vector.broadcast %29 : vector<1x64xf32> to vector<2x64xf32>
    %195 = arith.mulf %193, %194 : vector<2x64xf32>
    %196 = arith.addf %135, %139 : vector<2x64xf32>
    %197 = arith.addf %143, %147 : vector<2x64xf32>
    %198 = arith.addf %151, %155 : vector<2x64xf32>
    %199 = arith.addf %159, %163 : vector<2x64xf32>
    %200 = arith.addf %167, %171 : vector<2x64xf32>
    %201 = arith.addf %175, %179 : vector<2x64xf32>
    %202 = arith.addf %183, %187 : vector<2x64xf32>
    %203 = arith.addf %191, %195 : vector<2x64xf32>
    %204 = arith.addf %196, %197 : vector<2x64xf32>
    %205 = arith.addf %198, %199 : vector<2x64xf32>
    %206 = arith.addf %200, %201 : vector<2x64xf32>
    %207 = arith.addf %202, %203 : vector<2x64xf32>
    %208 = arith.addf %204, %205 : vector<2x64xf32>
    %209 = arith.addf %206, %207 : vector<2x64xf32>
    %210 = arith.addf %208, %209 : vector<2x64xf32>
    %211 = arith.addf %131, %210 : vector<2x64xf32>
    %212 = arith.negf %211 : vector<2x64xf32>
    %213 = math.exp %212 : vector<2x64xf32>
    %cst_18 = arith.constant 1.000000e+00 : f32
    %214 = vector.broadcast %cst_18 : f32 to vector<2x64xf32>
    %215 = arith.addf %214, %213 : vector<2x64xf32>
    %216 = arith.divf %214, %215 : vector<2x64xf32>
    %217 = vector.extract_strided_slice %216 {offsets = [0, 0], sizes = [2, 16], strides = [1, 1]} : vector<2x64xf32> to vector<2x16xf32>
    %218 = vector.extract_strided_slice %216 {offsets = [0, 16], sizes = [2, 16], strides = [1, 1]} : vector<2x64xf32> to vector<2x16xf32>
    %219 = vector.extract_strided_slice %216 {offsets = [0, 32], sizes = [2, 16], strides = [1, 1]} : vector<2x64xf32> to vector<2x16xf32>
    %cst_19 = arith.constant 2.000000e+00 : f32
    %220 = vector.broadcast %cst_19 : f32 to vector<2x16xf32>
    %221 = arith.mulf %220, %219 : vector<2x16xf32>
    %cst_20 = arith.constant 1.000000e+00 : f32
    %222 = vector.broadcast %cst_20 : f32 to vector<2x16xf32>
    %223 = arith.subf %221, %222 : vector<2x16xf32>
    %224 = vector.extract_strided_slice %216 {offsets = [0, 48], sizes = [2, 16], strides = [1, 1]} : vector<2x64xf32> to vector<2x16xf32>
    %225 = arith.mulf %218, %128 : vector<2x16xf32>
    %226 = arith.mulf %217, %223 : vector<2x16xf32>
    %227 = arith.addf %225, %226 : vector<2x16xf32>
    %228 = math.tanh %227 : vector<2x16xf32>
    %229 = arith.mulf %224, %228 : vector<2x16xf32>
    %230 = vector.extract_strided_slice %12 {offsets = [4, 0], sizes = [2, 64], strides = [1, 1]} : vector<28x64xf32> to vector<2x64xf32>
    %231 = vector.extract_strided_slice %229 {offsets = [0, 0], sizes = [2, 1], strides = [1, 1]} : vector<2x16xf32> to vector<2x1xf32>
    %232 = vector.broadcast %231 : vector<2x1xf32> to vector<2x64xf32>
    %233 = vector.broadcast %14 : vector<1x64xf32> to vector<2x64xf32>
    %234 = arith.mulf %232, %233 : vector<2x64xf32>
    %235 = vector.extract_strided_slice %229 {offsets = [0, 1], sizes = [2, 1], strides = [1, 1]} : vector<2x16xf32> to vector<2x1xf32>
    %236 = vector.broadcast %235 : vector<2x1xf32> to vector<2x64xf32>
    %237 = vector.broadcast %15 : vector<1x64xf32> to vector<2x64xf32>
    %238 = arith.mulf %236, %237 : vector<2x64xf32>
    %239 = vector.extract_strided_slice %229 {offsets = [0, 2], sizes = [2, 1], strides = [1, 1]} : vector<2x16xf32> to vector<2x1xf32>
    %240 = vector.broadcast %239 : vector<2x1xf32> to vector<2x64xf32>
    %241 = vector.broadcast %16 : vector<1x64xf32> to vector<2x64xf32>
    %242 = arith.mulf %240, %241 : vector<2x64xf32>
    %243 = vector.extract_strided_slice %229 {offsets = [0, 3], sizes = [2, 1], strides = [1, 1]} : vector<2x16xf32> to vector<2x1xf32>
    %244 = vector.broadcast %243 : vector<2x1xf32> to vector<2x64xf32>
    %245 = vector.broadcast %17 : vector<1x64xf32> to vector<2x64xf32>
    %246 = arith.mulf %244, %245 : vector<2x64xf32>
    %247 = vector.extract_strided_slice %229 {offsets = [0, 4], sizes = [2, 1], strides = [1, 1]} : vector<2x16xf32> to vector<2x1xf32>
    %248 = vector.broadcast %247 : vector<2x1xf32> to vector<2x64xf32>
    %249 = vector.broadcast %18 : vector<1x64xf32> to vector<2x64xf32>
    %250 = arith.mulf %248, %249 : vector<2x64xf32>
    %251 = vector.extract_strided_slice %229 {offsets = [0, 5], sizes = [2, 1], strides = [1, 1]} : vector<2x16xf32> to vector<2x1xf32>
    %252 = vector.broadcast %251 : vector<2x1xf32> to vector<2x64xf32>
    %253 = vector.broadcast %19 : vector<1x64xf32> to vector<2x64xf32>
    %254 = arith.mulf %252, %253 : vector<2x64xf32>
    %255 = vector.extract_strided_slice %229 {offsets = [0, 6], sizes = [2, 1], strides = [1, 1]} : vector<2x16xf32> to vector<2x1xf32>
    %256 = vector.broadcast %255 : vector<2x1xf32> to vector<2x64xf32>
    %257 = vector.broadcast %20 : vector<1x64xf32> to vector<2x64xf32>
    %258 = arith.mulf %256, %257 : vector<2x64xf32>
    %259 = vector.extract_strided_slice %229 {offsets = [0, 7], sizes = [2, 1], strides = [1, 1]} : vector<2x16xf32> to vector<2x1xf32>
    %260 = vector.broadcast %259 : vector<2x1xf32> to vector<2x64xf32>
    %261 = vector.broadcast %21 : vector<1x64xf32> to vector<2x64xf32>
    %262 = arith.mulf %260, %261 : vector<2x64xf32>
    %263 = vector.extract_strided_slice %229 {offsets = [0, 8], sizes = [2, 1], strides = [1, 1]} : vector<2x16xf32> to vector<2x1xf32>
    %264 = vector.broadcast %263 : vector<2x1xf32> to vector<2x64xf32>
    %265 = vector.broadcast %22 : vector<1x64xf32> to vector<2x64xf32>
    %266 = arith.mulf %264, %265 : vector<2x64xf32>
    %267 = vector.extract_strided_slice %229 {offsets = [0, 9], sizes = [2, 1], strides = [1, 1]} : vector<2x16xf32> to vector<2x1xf32>
    %268 = vector.broadcast %267 : vector<2x1xf32> to vector<2x64xf32>
    %269 = vector.broadcast %23 : vector<1x64xf32> to vector<2x64xf32>
    %270 = arith.mulf %268, %269 : vector<2x64xf32>
    %271 = vector.extract_strided_slice %229 {offsets = [0, 10], sizes = [2, 1], strides = [1, 1]} : vector<2x16xf32> to vector<2x1xf32>
    %272 = vector.broadcast %271 : vector<2x1xf32> to vector<2x64xf32>
    %273 = vector.broadcast %24 : vector<1x64xf32> to vector<2x64xf32>
    %274 = arith.mulf %272, %273 : vector<2x64xf32>
    %275 = vector.extract_strided_slice %229 {offsets = [0, 11], sizes = [2, 1], strides = [1, 1]} : vector<2x16xf32> to vector<2x1xf32>
    %276 = vector.broadcast %275 : vector<2x1xf32> to vector<2x64xf32>
    %277 = vector.broadcast %25 : vector<1x64xf32> to vector<2x64xf32>
    %278 = arith.mulf %276, %277 : vector<2x64xf32>
    %279 = vector.extract_strided_slice %229 {offsets = [0, 12], sizes = [2, 1], strides = [1, 1]} : vector<2x16xf32> to vector<2x1xf32>
    %280 = vector.broadcast %279 : vector<2x1xf32> to vector<2x64xf32>
    %281 = vector.broadcast %26 : vector<1x64xf32> to vector<2x64xf32>
    %282 = arith.mulf %280, %281 : vector<2x64xf32>
    %283 = vector.extract_strided_slice %229 {offsets = [0, 13], sizes = [2, 1], strides = [1, 1]} : vector<2x16xf32> to vector<2x1xf32>
    %284 = vector.broadcast %283 : vector<2x1xf32> to vector<2x64xf32>
    %285 = vector.broadcast %27 : vector<1x64xf32> to vector<2x64xf32>
    %286 = arith.mulf %284, %285 : vector<2x64xf32>
    %287 = vector.extract_strided_slice %229 {offsets = [0, 14], sizes = [2, 1], strides = [1, 1]} : vector<2x16xf32> to vector<2x1xf32>
    %288 = vector.broadcast %287 : vector<2x1xf32> to vector<2x64xf32>
    %289 = vector.broadcast %28 : vector<1x64xf32> to vector<2x64xf32>
    %290 = arith.mulf %288, %289 : vector<2x64xf32>
    %291 = vector.extract_strided_slice %229 {offsets = [0, 15], sizes = [2, 1], strides = [1, 1]} : vector<2x16xf32> to vector<2x1xf32>
    %292 = vector.broadcast %291 : vector<2x1xf32> to vector<2x64xf32>
    %293 = vector.broadcast %29 : vector<1x64xf32> to vector<2x64xf32>
    %294 = arith.mulf %292, %293 : vector<2x64xf32>
    %295 = arith.addf %234, %238 : vector<2x64xf32>
    %296 = arith.addf %242, %246 : vector<2x64xf32>
    %297 = arith.addf %250, %254 : vector<2x64xf32>
    %298 = arith.addf %258, %262 : vector<2x64xf32>
    %299 = arith.addf %266, %270 : vector<2x64xf32>
    %300 = arith.addf %274, %278 : vector<2x64xf32>
    %301 = arith.addf %282, %286 : vector<2x64xf32>
    %302 = arith.addf %290, %294 : vector<2x64xf32>
    %303 = arith.addf %295, %296 : vector<2x64xf32>
    %304 = arith.addf %297, %298 : vector<2x64xf32>
    %305 = arith.addf %299, %300 : vector<2x64xf32>
    %306 = arith.addf %301, %302 : vector<2x64xf32>
    %307 = arith.addf %303, %304 : vector<2x64xf32>
    %308 = arith.addf %305, %306 : vector<2x64xf32>
    %309 = arith.addf %307, %308 : vector<2x64xf32>
    %310 = arith.addf %230, %309 : vector<2x64xf32>
    %311 = arith.negf %310 : vector<2x64xf32>
    %312 = math.exp %311 : vector<2x64xf32>
    %cst_21 = arith.constant 1.000000e+00 : f32
    %313 = vector.broadcast %cst_21 : f32 to vector<2x64xf32>
    %314 = arith.addf %313, %312 : vector<2x64xf32>
    %315 = arith.divf %313, %314 : vector<2x64xf32>
    %316 = vector.extract_strided_slice %315 {offsets = [0, 0], sizes = [2, 16], strides = [1, 1]} : vector<2x64xf32> to vector<2x16xf32>
    %317 = vector.extract_strided_slice %315 {offsets = [0, 16], sizes = [2, 16], strides = [1, 1]} : vector<2x64xf32> to vector<2x16xf32>
    %318 = vector.extract_strided_slice %315 {offsets = [0, 32], sizes = [2, 16], strides = [1, 1]} : vector<2x64xf32> to vector<2x16xf32>
    %cst_22 = arith.constant 2.000000e+00 : f32
    %319 = vector.broadcast %cst_22 : f32 to vector<2x16xf32>
    %320 = arith.mulf %319, %318 : vector<2x16xf32>
    %cst_23 = arith.constant 1.000000e+00 : f32
    %321 = vector.broadcast %cst_23 : f32 to vector<2x16xf32>
    %322 = arith.subf %320, %321 : vector<2x16xf32>
    %323 = vector.extract_strided_slice %315 {offsets = [0, 48], sizes = [2, 16], strides = [1, 1]} : vector<2x64xf32> to vector<2x16xf32>
    %324 = arith.mulf %317, %227 : vector<2x16xf32>
    %325 = arith.mulf %316, %322 : vector<2x16xf32>
    %326 = arith.addf %324, %325 : vector<2x16xf32>
    %327 = math.tanh %326 : vector<2x16xf32>
    %328 = arith.mulf %323, %327 : vector<2x16xf32>
    %329 = vector.extract_strided_slice %12 {offsets = [6, 0], sizes = [2, 64], strides = [1, 1]} : vector<28x64xf32> to vector<2x64xf32>
    %330 = vector.extract_strided_slice %328 {offsets = [0, 0], sizes = [2, 1], strides = [1, 1]} : vector<2x16xf32> to vector<2x1xf32>
    %331 = vector.broadcast %330 : vector<2x1xf32> to vector<2x64xf32>
    %332 = vector.broadcast %14 : vector<1x64xf32> to vector<2x64xf32>
    %333 = arith.mulf %331, %332 : vector<2x64xf32>
    %334 = vector.extract_strided_slice %328 {offsets = [0, 1], sizes = [2, 1], strides = [1, 1]} : vector<2x16xf32> to vector<2x1xf32>
    %335 = vector.broadcast %334 : vector<2x1xf32> to vector<2x64xf32>
    %336 = vector.broadcast %15 : vector<1x64xf32> to vector<2x64xf32>
    %337 = arith.mulf %335, %336 : vector<2x64xf32>
    %338 = vector.extract_strided_slice %328 {offsets = [0, 2], sizes = [2, 1], strides = [1, 1]} : vector<2x16xf32> to vector<2x1xf32>
    %339 = vector.broadcast %338 : vector<2x1xf32> to vector<2x64xf32>
    %340 = vector.broadcast %16 : vector<1x64xf32> to vector<2x64xf32>
    %341 = arith.mulf %339, %340 : vector<2x64xf32>
    %342 = vector.extract_strided_slice %328 {offsets = [0, 3], sizes = [2, 1], strides = [1, 1]} : vector<2x16xf32> to vector<2x1xf32>
    %343 = vector.broadcast %342 : vector<2x1xf32> to vector<2x64xf32>
    %344 = vector.broadcast %17 : vector<1x64xf32> to vector<2x64xf32>
    %345 = arith.mulf %343, %344 : vector<2x64xf32>
    %346 = vector.extract_strided_slice %328 {offsets = [0, 4], sizes = [2, 1], strides = [1, 1]} : vector<2x16xf32> to vector<2x1xf32>
    %347 = vector.broadcast %346 : vector<2x1xf32> to vector<2x64xf32>
    %348 = vector.broadcast %18 : vector<1x64xf32> to vector<2x64xf32>
    %349 = arith.mulf %347, %348 : vector<2x64xf32>
    %350 = vector.extract_strided_slice %328 {offsets = [0, 5], sizes = [2, 1], strides = [1, 1]} : vector<2x16xf32> to vector<2x1xf32>
    %351 = vector.broadcast %350 : vector<2x1xf32> to vector<2x64xf32>
    %352 = vector.broadcast %19 : vector<1x64xf32> to vector<2x64xf32>
    %353 = arith.mulf %351, %352 : vector<2x64xf32>
    %354 = vector.extract_strided_slice %328 {offsets = [0, 6], sizes = [2, 1], strides = [1, 1]} : vector<2x16xf32> to vector<2x1xf32>
    %355 = vector.broadcast %354 : vector<2x1xf32> to vector<2x64xf32>
    %356 = vector.broadcast %20 : vector<1x64xf32> to vector<2x64xf32>
    %357 = arith.mulf %355, %356 : vector<2x64xf32>
    %358 = vector.extract_strided_slice %328 {offsets = [0, 7], sizes = [2, 1], strides = [1, 1]} : vector<2x16xf32> to vector<2x1xf32>
    %359 = vector.broadcast %358 : vector<2x1xf32> to vector<2x64xf32>
    %360 = vector.broadcast %21 : vector<1x64xf32> to vector<2x64xf32>
    %361 = arith.mulf %359, %360 : vector<2x64xf32>
    %362 = vector.extract_strided_slice %328 {offsets = [0, 8], sizes = [2, 1], strides = [1, 1]} : vector<2x16xf32> to vector<2x1xf32>
    %363 = vector.broadcast %362 : vector<2x1xf32> to vector<2x64xf32>
    %364 = vector.broadcast %22 : vector<1x64xf32> to vector<2x64xf32>
    %365 = arith.mulf %363, %364 : vector<2x64xf32>
    %366 = vector.extract_strided_slice %328 {offsets = [0, 9], sizes = [2, 1], strides = [1, 1]} : vector<2x16xf32> to vector<2x1xf32>
    %367 = vector.broadcast %366 : vector<2x1xf32> to vector<2x64xf32>
    %368 = vector.broadcast %23 : vector<1x64xf32> to vector<2x64xf32>
    %369 = arith.mulf %367, %368 : vector<2x64xf32>
    %370 = vector.extract_strided_slice %328 {offsets = [0, 10], sizes = [2, 1], strides = [1, 1]} : vector<2x16xf32> to vector<2x1xf32>
    %371 = vector.broadcast %370 : vector<2x1xf32> to vector<2x64xf32>
    %372 = vector.broadcast %24 : vector<1x64xf32> to vector<2x64xf32>
    %373 = arith.mulf %371, %372 : vector<2x64xf32>
    %374 = vector.extract_strided_slice %328 {offsets = [0, 11], sizes = [2, 1], strides = [1, 1]} : vector<2x16xf32> to vector<2x1xf32>
    %375 = vector.broadcast %374 : vector<2x1xf32> to vector<2x64xf32>
    %376 = vector.broadcast %25 : vector<1x64xf32> to vector<2x64xf32>
    %377 = arith.mulf %375, %376 : vector<2x64xf32>
    %378 = vector.extract_strided_slice %328 {offsets = [0, 12], sizes = [2, 1], strides = [1, 1]} : vector<2x16xf32> to vector<2x1xf32>
    %379 = vector.broadcast %378 : vector<2x1xf32> to vector<2x64xf32>
    %380 = vector.broadcast %26 : vector<1x64xf32> to vector<2x64xf32>
    %381 = arith.mulf %379, %380 : vector<2x64xf32>
    %382 = vector.extract_strided_slice %328 {offsets = [0, 13], sizes = [2, 1], strides = [1, 1]} : vector<2x16xf32> to vector<2x1xf32>
    %383 = vector.broadcast %382 : vector<2x1xf32> to vector<2x64xf32>
    %384 = vector.broadcast %27 : vector<1x64xf32> to vector<2x64xf32>
    %385 = arith.mulf %383, %384 : vector<2x64xf32>
    %386 = vector.extract_strided_slice %328 {offsets = [0, 14], sizes = [2, 1], strides = [1, 1]} : vector<2x16xf32> to vector<2x1xf32>
    %387 = vector.broadcast %386 : vector<2x1xf32> to vector<2x64xf32>
    %388 = vector.broadcast %28 : vector<1x64xf32> to vector<2x64xf32>
    %389 = arith.mulf %387, %388 : vector<2x64xf32>
    %390 = vector.extract_strided_slice %328 {offsets = [0, 15], sizes = [2, 1], strides = [1, 1]} : vector<2x16xf32> to vector<2x1xf32>
    %391 = vector.broadcast %390 : vector<2x1xf32> to vector<2x64xf32>
    %392 = vector.broadcast %29 : vector<1x64xf32> to vector<2x64xf32>
    %393 = arith.mulf %391, %392 : vector<2x64xf32>
    %394 = arith.addf %333, %337 : vector<2x64xf32>
    %395 = arith.addf %341, %345 : vector<2x64xf32>
    %396 = arith.addf %349, %353 : vector<2x64xf32>
    %397 = arith.addf %357, %361 : vector<2x64xf32>
    %398 = arith.addf %365, %369 : vector<2x64xf32>
    %399 = arith.addf %373, %377 : vector<2x64xf32>
    %400 = arith.addf %381, %385 : vector<2x64xf32>
    %401 = arith.addf %389, %393 : vector<2x64xf32>
    %402 = arith.addf %394, %395 : vector<2x64xf32>
    %403 = arith.addf %396, %397 : vector<2x64xf32>
    %404 = arith.addf %398, %399 : vector<2x64xf32>
    %405 = arith.addf %400, %401 : vector<2x64xf32>
    %406 = arith.addf %402, %403 : vector<2x64xf32>
    %407 = arith.addf %404, %405 : vector<2x64xf32>
    %408 = arith.addf %406, %407 : vector<2x64xf32>
    %409 = arith.addf %329, %408 : vector<2x64xf32>
    %410 = arith.negf %409 : vector<2x64xf32>
    %411 = math.exp %410 : vector<2x64xf32>
    %cst_24 = arith.constant 1.000000e+00 : f32
    %412 = vector.broadcast %cst_24 : f32 to vector<2x64xf32>
    %413 = arith.addf %412, %411 : vector<2x64xf32>
    %414 = arith.divf %412, %413 : vector<2x64xf32>
    %415 = vector.extract_strided_slice %414 {offsets = [0, 0], sizes = [2, 16], strides = [1, 1]} : vector<2x64xf32> to vector<2x16xf32>
    %416 = vector.extract_strided_slice %414 {offsets = [0, 16], sizes = [2, 16], strides = [1, 1]} : vector<2x64xf32> to vector<2x16xf32>
    %417 = vector.extract_strided_slice %414 {offsets = [0, 32], sizes = [2, 16], strides = [1, 1]} : vector<2x64xf32> to vector<2x16xf32>
    %cst_25 = arith.constant 2.000000e+00 : f32
    %418 = vector.broadcast %cst_25 : f32 to vector<2x16xf32>
    %419 = arith.mulf %418, %417 : vector<2x16xf32>
    %cst_26 = arith.constant 1.000000e+00 : f32
    %420 = vector.broadcast %cst_26 : f32 to vector<2x16xf32>
    %421 = arith.subf %419, %420 : vector<2x16xf32>
    %422 = vector.extract_strided_slice %414 {offsets = [0, 48], sizes = [2, 16], strides = [1, 1]} : vector<2x64xf32> to vector<2x16xf32>
    %423 = arith.mulf %416, %326 : vector<2x16xf32>
    %424 = arith.mulf %415, %421 : vector<2x16xf32>
    %425 = arith.addf %423, %424 : vector<2x16xf32>
    %426 = math.tanh %425 : vector<2x16xf32>
    %427 = arith.mulf %422, %426 : vector<2x16xf32>
    %428 = vector.extract_strided_slice %12 {offsets = [8, 0], sizes = [2, 64], strides = [1, 1]} : vector<28x64xf32> to vector<2x64xf32>
    %429 = vector.extract_strided_slice %427 {offsets = [0, 0], sizes = [2, 1], strides = [1, 1]} : vector<2x16xf32> to vector<2x1xf32>
    %430 = vector.broadcast %429 : vector<2x1xf32> to vector<2x64xf32>
    %431 = vector.broadcast %14 : vector<1x64xf32> to vector<2x64xf32>
    %432 = arith.mulf %430, %431 : vector<2x64xf32>
    %433 = vector.extract_strided_slice %427 {offsets = [0, 1], sizes = [2, 1], strides = [1, 1]} : vector<2x16xf32> to vector<2x1xf32>
    %434 = vector.broadcast %433 : vector<2x1xf32> to vector<2x64xf32>
    %435 = vector.broadcast %15 : vector<1x64xf32> to vector<2x64xf32>
    %436 = arith.mulf %434, %435 : vector<2x64xf32>
    %437 = vector.extract_strided_slice %427 {offsets = [0, 2], sizes = [2, 1], strides = [1, 1]} : vector<2x16xf32> to vector<2x1xf32>
    %438 = vector.broadcast %437 : vector<2x1xf32> to vector<2x64xf32>
    %439 = vector.broadcast %16 : vector<1x64xf32> to vector<2x64xf32>
    %440 = arith.mulf %438, %439 : vector<2x64xf32>
    %441 = vector.extract_strided_slice %427 {offsets = [0, 3], sizes = [2, 1], strides = [1, 1]} : vector<2x16xf32> to vector<2x1xf32>
    %442 = vector.broadcast %441 : vector<2x1xf32> to vector<2x64xf32>
    %443 = vector.broadcast %17 : vector<1x64xf32> to vector<2x64xf32>
    %444 = arith.mulf %442, %443 : vector<2x64xf32>
    %445 = vector.extract_strided_slice %427 {offsets = [0, 4], sizes = [2, 1], strides = [1, 1]} : vector<2x16xf32> to vector<2x1xf32>
    %446 = vector.broadcast %445 : vector<2x1xf32> to vector<2x64xf32>
    %447 = vector.broadcast %18 : vector<1x64xf32> to vector<2x64xf32>
    %448 = arith.mulf %446, %447 : vector<2x64xf32>
    %449 = vector.extract_strided_slice %427 {offsets = [0, 5], sizes = [2, 1], strides = [1, 1]} : vector<2x16xf32> to vector<2x1xf32>
    %450 = vector.broadcast %449 : vector<2x1xf32> to vector<2x64xf32>
    %451 = vector.broadcast %19 : vector<1x64xf32> to vector<2x64xf32>
    %452 = arith.mulf %450, %451 : vector<2x64xf32>
    %453 = vector.extract_strided_slice %427 {offsets = [0, 6], sizes = [2, 1], strides = [1, 1]} : vector<2x16xf32> to vector<2x1xf32>
    %454 = vector.broadcast %453 : vector<2x1xf32> to vector<2x64xf32>
    %455 = vector.broadcast %20 : vector<1x64xf32> to vector<2x64xf32>
    %456 = arith.mulf %454, %455 : vector<2x64xf32>
    %457 = vector.extract_strided_slice %427 {offsets = [0, 7], sizes = [2, 1], strides = [1, 1]} : vector<2x16xf32> to vector<2x1xf32>
    %458 = vector.broadcast %457 : vector<2x1xf32> to vector<2x64xf32>
    %459 = vector.broadcast %21 : vector<1x64xf32> to vector<2x64xf32>
    %460 = arith.mulf %458, %459 : vector<2x64xf32>
    %461 = vector.extract_strided_slice %427 {offsets = [0, 8], sizes = [2, 1], strides = [1, 1]} : vector<2x16xf32> to vector<2x1xf32>
    %462 = vector.broadcast %461 : vector<2x1xf32> to vector<2x64xf32>
    %463 = vector.broadcast %22 : vector<1x64xf32> to vector<2x64xf32>
    %464 = arith.mulf %462, %463 : vector<2x64xf32>
    %465 = vector.extract_strided_slice %427 {offsets = [0, 9], sizes = [2, 1], strides = [1, 1]} : vector<2x16xf32> to vector<2x1xf32>
    %466 = vector.broadcast %465 : vector<2x1xf32> to vector<2x64xf32>
    %467 = vector.broadcast %23 : vector<1x64xf32> to vector<2x64xf32>
    %468 = arith.mulf %466, %467 : vector<2x64xf32>
    %469 = vector.extract_strided_slice %427 {offsets = [0, 10], sizes = [2, 1], strides = [1, 1]} : vector<2x16xf32> to vector<2x1xf32>
    %470 = vector.broadcast %469 : vector<2x1xf32> to vector<2x64xf32>
    %471 = vector.broadcast %24 : vector<1x64xf32> to vector<2x64xf32>
    %472 = arith.mulf %470, %471 : vector<2x64xf32>
    %473 = vector.extract_strided_slice %427 {offsets = [0, 11], sizes = [2, 1], strides = [1, 1]} : vector<2x16xf32> to vector<2x1xf32>
    %474 = vector.broadcast %473 : vector<2x1xf32> to vector<2x64xf32>
    %475 = vector.broadcast %25 : vector<1x64xf32> to vector<2x64xf32>
    %476 = arith.mulf %474, %475 : vector<2x64xf32>
    %477 = vector.extract_strided_slice %427 {offsets = [0, 12], sizes = [2, 1], strides = [1, 1]} : vector<2x16xf32> to vector<2x1xf32>
    %478 = vector.broadcast %477 : vector<2x1xf32> to vector<2x64xf32>
    %479 = vector.broadcast %26 : vector<1x64xf32> to vector<2x64xf32>
    %480 = arith.mulf %478, %479 : vector<2x64xf32>
    %481 = vector.extract_strided_slice %427 {offsets = [0, 13], sizes = [2, 1], strides = [1, 1]} : vector<2x16xf32> to vector<2x1xf32>
    %482 = vector.broadcast %481 : vector<2x1xf32> to vector<2x64xf32>
    %483 = vector.broadcast %27 : vector<1x64xf32> to vector<2x64xf32>
    %484 = arith.mulf %482, %483 : vector<2x64xf32>
    %485 = vector.extract_strided_slice %427 {offsets = [0, 14], sizes = [2, 1], strides = [1, 1]} : vector<2x16xf32> to vector<2x1xf32>
    %486 = vector.broadcast %485 : vector<2x1xf32> to vector<2x64xf32>
    %487 = vector.broadcast %28 : vector<1x64xf32> to vector<2x64xf32>
    %488 = arith.mulf %486, %487 : vector<2x64xf32>
    %489 = vector.extract_strided_slice %427 {offsets = [0, 15], sizes = [2, 1], strides = [1, 1]} : vector<2x16xf32> to vector<2x1xf32>
    %490 = vector.broadcast %489 : vector<2x1xf32> to vector<2x64xf32>
    %491 = vector.broadcast %29 : vector<1x64xf32> to vector<2x64xf32>
    %492 = arith.mulf %490, %491 : vector<2x64xf32>
    %493 = arith.addf %432, %436 : vector<2x64xf32>
    %494 = arith.addf %440, %444 : vector<2x64xf32>
    %495 = arith.addf %448, %452 : vector<2x64xf32>
    %496 = arith.addf %456, %460 : vector<2x64xf32>
    %497 = arith.addf %464, %468 : vector<2x64xf32>
    %498 = arith.addf %472, %476 : vector<2x64xf32>
    %499 = arith.addf %480, %484 : vector<2x64xf32>
    %500 = arith.addf %488, %492 : vector<2x64xf32>
    %501 = arith.addf %493, %494 : vector<2x64xf32>
    %502 = arith.addf %495, %496 : vector<2x64xf32>
    %503 = arith.addf %497, %498 : vector<2x64xf32>
    %504 = arith.addf %499, %500 : vector<2x64xf32>
    %505 = arith.addf %501, %502 : vector<2x64xf32>
    %506 = arith.addf %503, %504 : vector<2x64xf32>
    %507 = arith.addf %505, %506 : vector<2x64xf32>
    %508 = arith.addf %428, %507 : vector<2x64xf32>
    %509 = arith.negf %508 : vector<2x64xf32>
    %510 = math.exp %509 : vector<2x64xf32>
    %cst_27 = arith.constant 1.000000e+00 : f32
    %511 = vector.broadcast %cst_27 : f32 to vector<2x64xf32>
    %512 = arith.addf %511, %510 : vector<2x64xf32>
    %513 = arith.divf %511, %512 : vector<2x64xf32>
    %514 = vector.extract_strided_slice %513 {offsets = [0, 0], sizes = [2, 16], strides = [1, 1]} : vector<2x64xf32> to vector<2x16xf32>
    %515 = vector.extract_strided_slice %513 {offsets = [0, 16], sizes = [2, 16], strides = [1, 1]} : vector<2x64xf32> to vector<2x16xf32>
    %516 = vector.extract_strided_slice %513 {offsets = [0, 32], sizes = [2, 16], strides = [1, 1]} : vector<2x64xf32> to vector<2x16xf32>
    %cst_28 = arith.constant 2.000000e+00 : f32
    %517 = vector.broadcast %cst_28 : f32 to vector<2x16xf32>
    %518 = arith.mulf %517, %516 : vector<2x16xf32>
    %cst_29 = arith.constant 1.000000e+00 : f32
    %519 = vector.broadcast %cst_29 : f32 to vector<2x16xf32>
    %520 = arith.subf %518, %519 : vector<2x16xf32>
    %521 = vector.extract_strided_slice %513 {offsets = [0, 48], sizes = [2, 16], strides = [1, 1]} : vector<2x64xf32> to vector<2x16xf32>
    %522 = arith.mulf %515, %425 : vector<2x16xf32>
    %523 = arith.mulf %514, %520 : vector<2x16xf32>
    %524 = arith.addf %522, %523 : vector<2x16xf32>
    %525 = math.tanh %524 : vector<2x16xf32>
    %526 = arith.mulf %521, %525 : vector<2x16xf32>
    %527 = vector.extract_strided_slice %12 {offsets = [10, 0], sizes = [2, 64], strides = [1, 1]} : vector<28x64xf32> to vector<2x64xf32>
    %528 = vector.extract_strided_slice %526 {offsets = [0, 0], sizes = [2, 1], strides = [1, 1]} : vector<2x16xf32> to vector<2x1xf32>
    %529 = vector.broadcast %528 : vector<2x1xf32> to vector<2x64xf32>
    %530 = vector.broadcast %14 : vector<1x64xf32> to vector<2x64xf32>
    %531 = arith.mulf %529, %530 : vector<2x64xf32>
    %532 = vector.extract_strided_slice %526 {offsets = [0, 1], sizes = [2, 1], strides = [1, 1]} : vector<2x16xf32> to vector<2x1xf32>
    %533 = vector.broadcast %532 : vector<2x1xf32> to vector<2x64xf32>
    %534 = vector.broadcast %15 : vector<1x64xf32> to vector<2x64xf32>
    %535 = arith.mulf %533, %534 : vector<2x64xf32>
    %536 = vector.extract_strided_slice %526 {offsets = [0, 2], sizes = [2, 1], strides = [1, 1]} : vector<2x16xf32> to vector<2x1xf32>
    %537 = vector.broadcast %536 : vector<2x1xf32> to vector<2x64xf32>
    %538 = vector.broadcast %16 : vector<1x64xf32> to vector<2x64xf32>
    %539 = arith.mulf %537, %538 : vector<2x64xf32>
    %540 = vector.extract_strided_slice %526 {offsets = [0, 3], sizes = [2, 1], strides = [1, 1]} : vector<2x16xf32> to vector<2x1xf32>
    %541 = vector.broadcast %540 : vector<2x1xf32> to vector<2x64xf32>
    %542 = vector.broadcast %17 : vector<1x64xf32> to vector<2x64xf32>
    %543 = arith.mulf %541, %542 : vector<2x64xf32>
    %544 = vector.extract_strided_slice %526 {offsets = [0, 4], sizes = [2, 1], strides = [1, 1]} : vector<2x16xf32> to vector<2x1xf32>
    %545 = vector.broadcast %544 : vector<2x1xf32> to vector<2x64xf32>
    %546 = vector.broadcast %18 : vector<1x64xf32> to vector<2x64xf32>
    %547 = arith.mulf %545, %546 : vector<2x64xf32>
    %548 = vector.extract_strided_slice %526 {offsets = [0, 5], sizes = [2, 1], strides = [1, 1]} : vector<2x16xf32> to vector<2x1xf32>
    %549 = vector.broadcast %548 : vector<2x1xf32> to vector<2x64xf32>
    %550 = vector.broadcast %19 : vector<1x64xf32> to vector<2x64xf32>
    %551 = arith.mulf %549, %550 : vector<2x64xf32>
    %552 = vector.extract_strided_slice %526 {offsets = [0, 6], sizes = [2, 1], strides = [1, 1]} : vector<2x16xf32> to vector<2x1xf32>
    %553 = vector.broadcast %552 : vector<2x1xf32> to vector<2x64xf32>
    %554 = vector.broadcast %20 : vector<1x64xf32> to vector<2x64xf32>
    %555 = arith.mulf %553, %554 : vector<2x64xf32>
    %556 = vector.extract_strided_slice %526 {offsets = [0, 7], sizes = [2, 1], strides = [1, 1]} : vector<2x16xf32> to vector<2x1xf32>
    %557 = vector.broadcast %556 : vector<2x1xf32> to vector<2x64xf32>
    %558 = vector.broadcast %21 : vector<1x64xf32> to vector<2x64xf32>
    %559 = arith.mulf %557, %558 : vector<2x64xf32>
    %560 = vector.extract_strided_slice %526 {offsets = [0, 8], sizes = [2, 1], strides = [1, 1]} : vector<2x16xf32> to vector<2x1xf32>
    %561 = vector.broadcast %560 : vector<2x1xf32> to vector<2x64xf32>
    %562 = vector.broadcast %22 : vector<1x64xf32> to vector<2x64xf32>
    %563 = arith.mulf %561, %562 : vector<2x64xf32>
    %564 = vector.extract_strided_slice %526 {offsets = [0, 9], sizes = [2, 1], strides = [1, 1]} : vector<2x16xf32> to vector<2x1xf32>
    %565 = vector.broadcast %564 : vector<2x1xf32> to vector<2x64xf32>
    %566 = vector.broadcast %23 : vector<1x64xf32> to vector<2x64xf32>
    %567 = arith.mulf %565, %566 : vector<2x64xf32>
    %568 = vector.extract_strided_slice %526 {offsets = [0, 10], sizes = [2, 1], strides = [1, 1]} : vector<2x16xf32> to vector<2x1xf32>
    %569 = vector.broadcast %568 : vector<2x1xf32> to vector<2x64xf32>
    %570 = vector.broadcast %24 : vector<1x64xf32> to vector<2x64xf32>
    %571 = arith.mulf %569, %570 : vector<2x64xf32>
    %572 = vector.extract_strided_slice %526 {offsets = [0, 11], sizes = [2, 1], strides = [1, 1]} : vector<2x16xf32> to vector<2x1xf32>
    %573 = vector.broadcast %572 : vector<2x1xf32> to vector<2x64xf32>
    %574 = vector.broadcast %25 : vector<1x64xf32> to vector<2x64xf32>
    %575 = arith.mulf %573, %574 : vector<2x64xf32>
    %576 = vector.extract_strided_slice %526 {offsets = [0, 12], sizes = [2, 1], strides = [1, 1]} : vector<2x16xf32> to vector<2x1xf32>
    %577 = vector.broadcast %576 : vector<2x1xf32> to vector<2x64xf32>
    %578 = vector.broadcast %26 : vector<1x64xf32> to vector<2x64xf32>
    %579 = arith.mulf %577, %578 : vector<2x64xf32>
    %580 = vector.extract_strided_slice %526 {offsets = [0, 13], sizes = [2, 1], strides = [1, 1]} : vector<2x16xf32> to vector<2x1xf32>
    %581 = vector.broadcast %580 : vector<2x1xf32> to vector<2x64xf32>
    %582 = vector.broadcast %27 : vector<1x64xf32> to vector<2x64xf32>
    %583 = arith.mulf %581, %582 : vector<2x64xf32>
    %584 = vector.extract_strided_slice %526 {offsets = [0, 14], sizes = [2, 1], strides = [1, 1]} : vector<2x16xf32> to vector<2x1xf32>
    %585 = vector.broadcast %584 : vector<2x1xf32> to vector<2x64xf32>
    %586 = vector.broadcast %28 : vector<1x64xf32> to vector<2x64xf32>
    %587 = arith.mulf %585, %586 : vector<2x64xf32>
    %588 = vector.extract_strided_slice %526 {offsets = [0, 15], sizes = [2, 1], strides = [1, 1]} : vector<2x16xf32> to vector<2x1xf32>
    %589 = vector.broadcast %588 : vector<2x1xf32> to vector<2x64xf32>
    %590 = vector.broadcast %29 : vector<1x64xf32> to vector<2x64xf32>
    %591 = arith.mulf %589, %590 : vector<2x64xf32>
    %592 = arith.addf %531, %535 : vector<2x64xf32>
    %593 = arith.addf %539, %543 : vector<2x64xf32>
    %594 = arith.addf %547, %551 : vector<2x64xf32>
    %595 = arith.addf %555, %559 : vector<2x64xf32>
    %596 = arith.addf %563, %567 : vector<2x64xf32>
    %597 = arith.addf %571, %575 : vector<2x64xf32>
    %598 = arith.addf %579, %583 : vector<2x64xf32>
    %599 = arith.addf %587, %591 : vector<2x64xf32>
    %600 = arith.addf %592, %593 : vector<2x64xf32>
    %601 = arith.addf %594, %595 : vector<2x64xf32>
    %602 = arith.addf %596, %597 : vector<2x64xf32>
    %603 = arith.addf %598, %599 : vector<2x64xf32>
    %604 = arith.addf %600, %601 : vector<2x64xf32>
    %605 = arith.addf %602, %603 : vector<2x64xf32>
    %606 = arith.addf %604, %605 : vector<2x64xf32>
    %607 = arith.addf %527, %606 : vector<2x64xf32>
    %608 = arith.negf %607 : vector<2x64xf32>
    %609 = math.exp %608 : vector<2x64xf32>
    %cst_30 = arith.constant 1.000000e+00 : f32
    %610 = vector.broadcast %cst_30 : f32 to vector<2x64xf32>
    %611 = arith.addf %610, %609 : vector<2x64xf32>
    %612 = arith.divf %610, %611 : vector<2x64xf32>
    %613 = vector.extract_strided_slice %612 {offsets = [0, 0], sizes = [2, 16], strides = [1, 1]} : vector<2x64xf32> to vector<2x16xf32>
    %614 = vector.extract_strided_slice %612 {offsets = [0, 16], sizes = [2, 16], strides = [1, 1]} : vector<2x64xf32> to vector<2x16xf32>
    %615 = vector.extract_strided_slice %612 {offsets = [0, 32], sizes = [2, 16], strides = [1, 1]} : vector<2x64xf32> to vector<2x16xf32>
    %cst_31 = arith.constant 2.000000e+00 : f32
    %616 = vector.broadcast %cst_31 : f32 to vector<2x16xf32>
    %617 = arith.mulf %616, %615 : vector<2x16xf32>
    %cst_32 = arith.constant 1.000000e+00 : f32
    %618 = vector.broadcast %cst_32 : f32 to vector<2x16xf32>
    %619 = arith.subf %617, %618 : vector<2x16xf32>
    %620 = vector.extract_strided_slice %612 {offsets = [0, 48], sizes = [2, 16], strides = [1, 1]} : vector<2x64xf32> to vector<2x16xf32>
    %621 = arith.mulf %614, %524 : vector<2x16xf32>
    %622 = arith.mulf %613, %619 : vector<2x16xf32>
    %623 = arith.addf %621, %622 : vector<2x16xf32>
    %624 = math.tanh %623 : vector<2x16xf32>
    %625 = arith.mulf %620, %624 : vector<2x16xf32>
    %626 = vector.extract_strided_slice %12 {offsets = [12, 0], sizes = [2, 64], strides = [1, 1]} : vector<28x64xf32> to vector<2x64xf32>
    %627 = vector.extract_strided_slice %625 {offsets = [0, 0], sizes = [2, 1], strides = [1, 1]} : vector<2x16xf32> to vector<2x1xf32>
    %628 = vector.broadcast %627 : vector<2x1xf32> to vector<2x64xf32>
    %629 = vector.broadcast %14 : vector<1x64xf32> to vector<2x64xf32>
    %630 = arith.mulf %628, %629 : vector<2x64xf32>
    %631 = vector.extract_strided_slice %625 {offsets = [0, 1], sizes = [2, 1], strides = [1, 1]} : vector<2x16xf32> to vector<2x1xf32>
    %632 = vector.broadcast %631 : vector<2x1xf32> to vector<2x64xf32>
    %633 = vector.broadcast %15 : vector<1x64xf32> to vector<2x64xf32>
    %634 = arith.mulf %632, %633 : vector<2x64xf32>
    %635 = vector.extract_strided_slice %625 {offsets = [0, 2], sizes = [2, 1], strides = [1, 1]} : vector<2x16xf32> to vector<2x1xf32>
    %636 = vector.broadcast %635 : vector<2x1xf32> to vector<2x64xf32>
    %637 = vector.broadcast %16 : vector<1x64xf32> to vector<2x64xf32>
    %638 = arith.mulf %636, %637 : vector<2x64xf32>
    %639 = vector.extract_strided_slice %625 {offsets = [0, 3], sizes = [2, 1], strides = [1, 1]} : vector<2x16xf32> to vector<2x1xf32>
    %640 = vector.broadcast %639 : vector<2x1xf32> to vector<2x64xf32>
    %641 = vector.broadcast %17 : vector<1x64xf32> to vector<2x64xf32>
    %642 = arith.mulf %640, %641 : vector<2x64xf32>
    %643 = vector.extract_strided_slice %625 {offsets = [0, 4], sizes = [2, 1], strides = [1, 1]} : vector<2x16xf32> to vector<2x1xf32>
    %644 = vector.broadcast %643 : vector<2x1xf32> to vector<2x64xf32>
    %645 = vector.broadcast %18 : vector<1x64xf32> to vector<2x64xf32>
    %646 = arith.mulf %644, %645 : vector<2x64xf32>
    %647 = vector.extract_strided_slice %625 {offsets = [0, 5], sizes = [2, 1], strides = [1, 1]} : vector<2x16xf32> to vector<2x1xf32>
    %648 = vector.broadcast %647 : vector<2x1xf32> to vector<2x64xf32>
    %649 = vector.broadcast %19 : vector<1x64xf32> to vector<2x64xf32>
    %650 = arith.mulf %648, %649 : vector<2x64xf32>
    %651 = vector.extract_strided_slice %625 {offsets = [0, 6], sizes = [2, 1], strides = [1, 1]} : vector<2x16xf32> to vector<2x1xf32>
    %652 = vector.broadcast %651 : vector<2x1xf32> to vector<2x64xf32>
    %653 = vector.broadcast %20 : vector<1x64xf32> to vector<2x64xf32>
    %654 = arith.mulf %652, %653 : vector<2x64xf32>
    %655 = vector.extract_strided_slice %625 {offsets = [0, 7], sizes = [2, 1], strides = [1, 1]} : vector<2x16xf32> to vector<2x1xf32>
    %656 = vector.broadcast %655 : vector<2x1xf32> to vector<2x64xf32>
    %657 = vector.broadcast %21 : vector<1x64xf32> to vector<2x64xf32>
    %658 = arith.mulf %656, %657 : vector<2x64xf32>
    %659 = vector.extract_strided_slice %625 {offsets = [0, 8], sizes = [2, 1], strides = [1, 1]} : vector<2x16xf32> to vector<2x1xf32>
    %660 = vector.broadcast %659 : vector<2x1xf32> to vector<2x64xf32>
    %661 = vector.broadcast %22 : vector<1x64xf32> to vector<2x64xf32>
    %662 = arith.mulf %660, %661 : vector<2x64xf32>
    %663 = vector.extract_strided_slice %625 {offsets = [0, 9], sizes = [2, 1], strides = [1, 1]} : vector<2x16xf32> to vector<2x1xf32>
    %664 = vector.broadcast %663 : vector<2x1xf32> to vector<2x64xf32>
    %665 = vector.broadcast %23 : vector<1x64xf32> to vector<2x64xf32>
    %666 = arith.mulf %664, %665 : vector<2x64xf32>
    %667 = vector.extract_strided_slice %625 {offsets = [0, 10], sizes = [2, 1], strides = [1, 1]} : vector<2x16xf32> to vector<2x1xf32>
    %668 = vector.broadcast %667 : vector<2x1xf32> to vector<2x64xf32>
    %669 = vector.broadcast %24 : vector<1x64xf32> to vector<2x64xf32>
    %670 = arith.mulf %668, %669 : vector<2x64xf32>
    %671 = vector.extract_strided_slice %625 {offsets = [0, 11], sizes = [2, 1], strides = [1, 1]} : vector<2x16xf32> to vector<2x1xf32>
    %672 = vector.broadcast %671 : vector<2x1xf32> to vector<2x64xf32>
    %673 = vector.broadcast %25 : vector<1x64xf32> to vector<2x64xf32>
    %674 = arith.mulf %672, %673 : vector<2x64xf32>
    %675 = vector.extract_strided_slice %625 {offsets = [0, 12], sizes = [2, 1], strides = [1, 1]} : vector<2x16xf32> to vector<2x1xf32>
    %676 = vector.broadcast %675 : vector<2x1xf32> to vector<2x64xf32>
    %677 = vector.broadcast %26 : vector<1x64xf32> to vector<2x64xf32>
    %678 = arith.mulf %676, %677 : vector<2x64xf32>
    %679 = vector.extract_strided_slice %625 {offsets = [0, 13], sizes = [2, 1], strides = [1, 1]} : vector<2x16xf32> to vector<2x1xf32>
    %680 = vector.broadcast %679 : vector<2x1xf32> to vector<2x64xf32>
    %681 = vector.broadcast %27 : vector<1x64xf32> to vector<2x64xf32>
    %682 = arith.mulf %680, %681 : vector<2x64xf32>
    %683 = vector.extract_strided_slice %625 {offsets = [0, 14], sizes = [2, 1], strides = [1, 1]} : vector<2x16xf32> to vector<2x1xf32>
    %684 = vector.broadcast %683 : vector<2x1xf32> to vector<2x64xf32>
    %685 = vector.broadcast %28 : vector<1x64xf32> to vector<2x64xf32>
    %686 = arith.mulf %684, %685 : vector<2x64xf32>
    %687 = vector.extract_strided_slice %625 {offsets = [0, 15], sizes = [2, 1], strides = [1, 1]} : vector<2x16xf32> to vector<2x1xf32>
    %688 = vector.broadcast %687 : vector<2x1xf32> to vector<2x64xf32>
    %689 = vector.broadcast %29 : vector<1x64xf32> to vector<2x64xf32>
    %690 = arith.mulf %688, %689 : vector<2x64xf32>
    %691 = arith.addf %630, %634 : vector<2x64xf32>
    %692 = arith.addf %638, %642 : vector<2x64xf32>
    %693 = arith.addf %646, %650 : vector<2x64xf32>
    %694 = arith.addf %654, %658 : vector<2x64xf32>
    %695 = arith.addf %662, %666 : vector<2x64xf32>
    %696 = arith.addf %670, %674 : vector<2x64xf32>
    %697 = arith.addf %678, %682 : vector<2x64xf32>
    %698 = arith.addf %686, %690 : vector<2x64xf32>
    %699 = arith.addf %691, %692 : vector<2x64xf32>
    %700 = arith.addf %693, %694 : vector<2x64xf32>
    %701 = arith.addf %695, %696 : vector<2x64xf32>
    %702 = arith.addf %697, %698 : vector<2x64xf32>
    %703 = arith.addf %699, %700 : vector<2x64xf32>
    %704 = arith.addf %701, %702 : vector<2x64xf32>
    %705 = arith.addf %703, %704 : vector<2x64xf32>
    %706 = arith.addf %626, %705 : vector<2x64xf32>
    %707 = arith.negf %706 : vector<2x64xf32>
    %708 = math.exp %707 : vector<2x64xf32>
    %cst_33 = arith.constant 1.000000e+00 : f32
    %709 = vector.broadcast %cst_33 : f32 to vector<2x64xf32>
    %710 = arith.addf %709, %708 : vector<2x64xf32>
    %711 = arith.divf %709, %710 : vector<2x64xf32>
    %712 = vector.extract_strided_slice %711 {offsets = [0, 0], sizes = [2, 16], strides = [1, 1]} : vector<2x64xf32> to vector<2x16xf32>
    %713 = vector.extract_strided_slice %711 {offsets = [0, 16], sizes = [2, 16], strides = [1, 1]} : vector<2x64xf32> to vector<2x16xf32>
    %714 = vector.extract_strided_slice %711 {offsets = [0, 32], sizes = [2, 16], strides = [1, 1]} : vector<2x64xf32> to vector<2x16xf32>
    %cst_34 = arith.constant 2.000000e+00 : f32
    %715 = vector.broadcast %cst_34 : f32 to vector<2x16xf32>
    %716 = arith.mulf %715, %714 : vector<2x16xf32>
    %cst_35 = arith.constant 1.000000e+00 : f32
    %717 = vector.broadcast %cst_35 : f32 to vector<2x16xf32>
    %718 = arith.subf %716, %717 : vector<2x16xf32>
    %719 = vector.extract_strided_slice %711 {offsets = [0, 48], sizes = [2, 16], strides = [1, 1]} : vector<2x64xf32> to vector<2x16xf32>
    %720 = arith.mulf %713, %623 : vector<2x16xf32>
    %721 = arith.mulf %712, %718 : vector<2x16xf32>
    %722 = arith.addf %720, %721 : vector<2x16xf32>
    %723 = math.tanh %722 : vector<2x16xf32>
    %724 = arith.mulf %719, %723 : vector<2x16xf32>
    %725 = vector.extract_strided_slice %12 {offsets = [14, 0], sizes = [2, 64], strides = [1, 1]} : vector<28x64xf32> to vector<2x64xf32>
    %726 = vector.extract_strided_slice %724 {offsets = [0, 0], sizes = [2, 1], strides = [1, 1]} : vector<2x16xf32> to vector<2x1xf32>
    %727 = vector.broadcast %726 : vector<2x1xf32> to vector<2x64xf32>
    %728 = vector.broadcast %14 : vector<1x64xf32> to vector<2x64xf32>
    %729 = arith.mulf %727, %728 : vector<2x64xf32>
    %730 = vector.extract_strided_slice %724 {offsets = [0, 1], sizes = [2, 1], strides = [1, 1]} : vector<2x16xf32> to vector<2x1xf32>
    %731 = vector.broadcast %730 : vector<2x1xf32> to vector<2x64xf32>
    %732 = vector.broadcast %15 : vector<1x64xf32> to vector<2x64xf32>
    %733 = arith.mulf %731, %732 : vector<2x64xf32>
    %734 = vector.extract_strided_slice %724 {offsets = [0, 2], sizes = [2, 1], strides = [1, 1]} : vector<2x16xf32> to vector<2x1xf32>
    %735 = vector.broadcast %734 : vector<2x1xf32> to vector<2x64xf32>
    %736 = vector.broadcast %16 : vector<1x64xf32> to vector<2x64xf32>
    %737 = arith.mulf %735, %736 : vector<2x64xf32>
    %738 = vector.extract_strided_slice %724 {offsets = [0, 3], sizes = [2, 1], strides = [1, 1]} : vector<2x16xf32> to vector<2x1xf32>
    %739 = vector.broadcast %738 : vector<2x1xf32> to vector<2x64xf32>
    %740 = vector.broadcast %17 : vector<1x64xf32> to vector<2x64xf32>
    %741 = arith.mulf %739, %740 : vector<2x64xf32>
    %742 = vector.extract_strided_slice %724 {offsets = [0, 4], sizes = [2, 1], strides = [1, 1]} : vector<2x16xf32> to vector<2x1xf32>
    %743 = vector.broadcast %742 : vector<2x1xf32> to vector<2x64xf32>
    %744 = vector.broadcast %18 : vector<1x64xf32> to vector<2x64xf32>
    %745 = arith.mulf %743, %744 : vector<2x64xf32>
    %746 = vector.extract_strided_slice %724 {offsets = [0, 5], sizes = [2, 1], strides = [1, 1]} : vector<2x16xf32> to vector<2x1xf32>
    %747 = vector.broadcast %746 : vector<2x1xf32> to vector<2x64xf32>
    %748 = vector.broadcast %19 : vector<1x64xf32> to vector<2x64xf32>
    %749 = arith.mulf %747, %748 : vector<2x64xf32>
    %750 = vector.extract_strided_slice %724 {offsets = [0, 6], sizes = [2, 1], strides = [1, 1]} : vector<2x16xf32> to vector<2x1xf32>
    %751 = vector.broadcast %750 : vector<2x1xf32> to vector<2x64xf32>
    %752 = vector.broadcast %20 : vector<1x64xf32> to vector<2x64xf32>
    %753 = arith.mulf %751, %752 : vector<2x64xf32>
    %754 = vector.extract_strided_slice %724 {offsets = [0, 7], sizes = [2, 1], strides = [1, 1]} : vector<2x16xf32> to vector<2x1xf32>
    %755 = vector.broadcast %754 : vector<2x1xf32> to vector<2x64xf32>
    %756 = vector.broadcast %21 : vector<1x64xf32> to vector<2x64xf32>
    %757 = arith.mulf %755, %756 : vector<2x64xf32>
    %758 = vector.extract_strided_slice %724 {offsets = [0, 8], sizes = [2, 1], strides = [1, 1]} : vector<2x16xf32> to vector<2x1xf32>
    %759 = vector.broadcast %758 : vector<2x1xf32> to vector<2x64xf32>
    %760 = vector.broadcast %22 : vector<1x64xf32> to vector<2x64xf32>
    %761 = arith.mulf %759, %760 : vector<2x64xf32>
    %762 = vector.extract_strided_slice %724 {offsets = [0, 9], sizes = [2, 1], strides = [1, 1]} : vector<2x16xf32> to vector<2x1xf32>
    %763 = vector.broadcast %762 : vector<2x1xf32> to vector<2x64xf32>
    %764 = vector.broadcast %23 : vector<1x64xf32> to vector<2x64xf32>
    %765 = arith.mulf %763, %764 : vector<2x64xf32>
    %766 = vector.extract_strided_slice %724 {offsets = [0, 10], sizes = [2, 1], strides = [1, 1]} : vector<2x16xf32> to vector<2x1xf32>
    %767 = vector.broadcast %766 : vector<2x1xf32> to vector<2x64xf32>
    %768 = vector.broadcast %24 : vector<1x64xf32> to vector<2x64xf32>
    %769 = arith.mulf %767, %768 : vector<2x64xf32>
    %770 = vector.extract_strided_slice %724 {offsets = [0, 11], sizes = [2, 1], strides = [1, 1]} : vector<2x16xf32> to vector<2x1xf32>
    %771 = vector.broadcast %770 : vector<2x1xf32> to vector<2x64xf32>
    %772 = vector.broadcast %25 : vector<1x64xf32> to vector<2x64xf32>
    %773 = arith.mulf %771, %772 : vector<2x64xf32>
    %774 = vector.extract_strided_slice %724 {offsets = [0, 12], sizes = [2, 1], strides = [1, 1]} : vector<2x16xf32> to vector<2x1xf32>
    %775 = vector.broadcast %774 : vector<2x1xf32> to vector<2x64xf32>
    %776 = vector.broadcast %26 : vector<1x64xf32> to vector<2x64xf32>
    %777 = arith.mulf %775, %776 : vector<2x64xf32>
    %778 = vector.extract_strided_slice %724 {offsets = [0, 13], sizes = [2, 1], strides = [1, 1]} : vector<2x16xf32> to vector<2x1xf32>
    %779 = vector.broadcast %778 : vector<2x1xf32> to vector<2x64xf32>
    %780 = vector.broadcast %27 : vector<1x64xf32> to vector<2x64xf32>
    %781 = arith.mulf %779, %780 : vector<2x64xf32>
    %782 = vector.extract_strided_slice %724 {offsets = [0, 14], sizes = [2, 1], strides = [1, 1]} : vector<2x16xf32> to vector<2x1xf32>
    %783 = vector.broadcast %782 : vector<2x1xf32> to vector<2x64xf32>
    %784 = vector.broadcast %28 : vector<1x64xf32> to vector<2x64xf32>
    %785 = arith.mulf %783, %784 : vector<2x64xf32>
    %786 = vector.extract_strided_slice %724 {offsets = [0, 15], sizes = [2, 1], strides = [1, 1]} : vector<2x16xf32> to vector<2x1xf32>
    %787 = vector.broadcast %786 : vector<2x1xf32> to vector<2x64xf32>
    %788 = vector.broadcast %29 : vector<1x64xf32> to vector<2x64xf32>
    %789 = arith.mulf %787, %788 : vector<2x64xf32>
    %790 = arith.addf %729, %733 : vector<2x64xf32>
    %791 = arith.addf %737, %741 : vector<2x64xf32>
    %792 = arith.addf %745, %749 : vector<2x64xf32>
    %793 = arith.addf %753, %757 : vector<2x64xf32>
    %794 = arith.addf %761, %765 : vector<2x64xf32>
    %795 = arith.addf %769, %773 : vector<2x64xf32>
    %796 = arith.addf %777, %781 : vector<2x64xf32>
    %797 = arith.addf %785, %789 : vector<2x64xf32>
    %798 = arith.addf %790, %791 : vector<2x64xf32>
    %799 = arith.addf %792, %793 : vector<2x64xf32>
    %800 = arith.addf %794, %795 : vector<2x64xf32>
    %801 = arith.addf %796, %797 : vector<2x64xf32>
    %802 = arith.addf %798, %799 : vector<2x64xf32>
    %803 = arith.addf %800, %801 : vector<2x64xf32>
    %804 = arith.addf %802, %803 : vector<2x64xf32>
    %805 = arith.addf %725, %804 : vector<2x64xf32>
    %806 = arith.negf %805 : vector<2x64xf32>
    %807 = math.exp %806 : vector<2x64xf32>
    %cst_36 = arith.constant 1.000000e+00 : f32
    %808 = vector.broadcast %cst_36 : f32 to vector<2x64xf32>
    %809 = arith.addf %808, %807 : vector<2x64xf32>
    %810 = arith.divf %808, %809 : vector<2x64xf32>
    %811 = vector.extract_strided_slice %810 {offsets = [0, 0], sizes = [2, 16], strides = [1, 1]} : vector<2x64xf32> to vector<2x16xf32>
    %812 = vector.extract_strided_slice %810 {offsets = [0, 16], sizes = [2, 16], strides = [1, 1]} : vector<2x64xf32> to vector<2x16xf32>
    %813 = vector.extract_strided_slice %810 {offsets = [0, 32], sizes = [2, 16], strides = [1, 1]} : vector<2x64xf32> to vector<2x16xf32>
    %cst_37 = arith.constant 2.000000e+00 : f32
    %814 = vector.broadcast %cst_37 : f32 to vector<2x16xf32>
    %815 = arith.mulf %814, %813 : vector<2x16xf32>
    %cst_38 = arith.constant 1.000000e+00 : f32
    %816 = vector.broadcast %cst_38 : f32 to vector<2x16xf32>
    %817 = arith.subf %815, %816 : vector<2x16xf32>
    %818 = vector.extract_strided_slice %810 {offsets = [0, 48], sizes = [2, 16], strides = [1, 1]} : vector<2x64xf32> to vector<2x16xf32>
    %819 = arith.mulf %812, %722 : vector<2x16xf32>
    %820 = arith.mulf %811, %817 : vector<2x16xf32>
    %821 = arith.addf %819, %820 : vector<2x16xf32>
    %822 = math.tanh %821 : vector<2x16xf32>
    %823 = arith.mulf %818, %822 : vector<2x16xf32>
    %824 = vector.extract_strided_slice %12 {offsets = [16, 0], sizes = [2, 64], strides = [1, 1]} : vector<28x64xf32> to vector<2x64xf32>
    %825 = vector.extract_strided_slice %823 {offsets = [0, 0], sizes = [2, 1], strides = [1, 1]} : vector<2x16xf32> to vector<2x1xf32>
    %826 = vector.broadcast %825 : vector<2x1xf32> to vector<2x64xf32>
    %827 = vector.broadcast %14 : vector<1x64xf32> to vector<2x64xf32>
    %828 = arith.mulf %826, %827 : vector<2x64xf32>
    %829 = vector.extract_strided_slice %823 {offsets = [0, 1], sizes = [2, 1], strides = [1, 1]} : vector<2x16xf32> to vector<2x1xf32>
    %830 = vector.broadcast %829 : vector<2x1xf32> to vector<2x64xf32>
    %831 = vector.broadcast %15 : vector<1x64xf32> to vector<2x64xf32>
    %832 = arith.mulf %830, %831 : vector<2x64xf32>
    %833 = vector.extract_strided_slice %823 {offsets = [0, 2], sizes = [2, 1], strides = [1, 1]} : vector<2x16xf32> to vector<2x1xf32>
    %834 = vector.broadcast %833 : vector<2x1xf32> to vector<2x64xf32>
    %835 = vector.broadcast %16 : vector<1x64xf32> to vector<2x64xf32>
    %836 = arith.mulf %834, %835 : vector<2x64xf32>
    %837 = vector.extract_strided_slice %823 {offsets = [0, 3], sizes = [2, 1], strides = [1, 1]} : vector<2x16xf32> to vector<2x1xf32>
    %838 = vector.broadcast %837 : vector<2x1xf32> to vector<2x64xf32>
    %839 = vector.broadcast %17 : vector<1x64xf32> to vector<2x64xf32>
    %840 = arith.mulf %838, %839 : vector<2x64xf32>
    %841 = vector.extract_strided_slice %823 {offsets = [0, 4], sizes = [2, 1], strides = [1, 1]} : vector<2x16xf32> to vector<2x1xf32>
    %842 = vector.broadcast %841 : vector<2x1xf32> to vector<2x64xf32>
    %843 = vector.broadcast %18 : vector<1x64xf32> to vector<2x64xf32>
    %844 = arith.mulf %842, %843 : vector<2x64xf32>
    %845 = vector.extract_strided_slice %823 {offsets = [0, 5], sizes = [2, 1], strides = [1, 1]} : vector<2x16xf32> to vector<2x1xf32>
    %846 = vector.broadcast %845 : vector<2x1xf32> to vector<2x64xf32>
    %847 = vector.broadcast %19 : vector<1x64xf32> to vector<2x64xf32>
    %848 = arith.mulf %846, %847 : vector<2x64xf32>
    %849 = vector.extract_strided_slice %823 {offsets = [0, 6], sizes = [2, 1], strides = [1, 1]} : vector<2x16xf32> to vector<2x1xf32>
    %850 = vector.broadcast %849 : vector<2x1xf32> to vector<2x64xf32>
    %851 = vector.broadcast %20 : vector<1x64xf32> to vector<2x64xf32>
    %852 = arith.mulf %850, %851 : vector<2x64xf32>
    %853 = vector.extract_strided_slice %823 {offsets = [0, 7], sizes = [2, 1], strides = [1, 1]} : vector<2x16xf32> to vector<2x1xf32>
    %854 = vector.broadcast %853 : vector<2x1xf32> to vector<2x64xf32>
    %855 = vector.broadcast %21 : vector<1x64xf32> to vector<2x64xf32>
    %856 = arith.mulf %854, %855 : vector<2x64xf32>
    %857 = vector.extract_strided_slice %823 {offsets = [0, 8], sizes = [2, 1], strides = [1, 1]} : vector<2x16xf32> to vector<2x1xf32>
    %858 = vector.broadcast %857 : vector<2x1xf32> to vector<2x64xf32>
    %859 = vector.broadcast %22 : vector<1x64xf32> to vector<2x64xf32>
    %860 = arith.mulf %858, %859 : vector<2x64xf32>
    %861 = vector.extract_strided_slice %823 {offsets = [0, 9], sizes = [2, 1], strides = [1, 1]} : vector<2x16xf32> to vector<2x1xf32>
    %862 = vector.broadcast %861 : vector<2x1xf32> to vector<2x64xf32>
    %863 = vector.broadcast %23 : vector<1x64xf32> to vector<2x64xf32>
    %864 = arith.mulf %862, %863 : vector<2x64xf32>
    %865 = vector.extract_strided_slice %823 {offsets = [0, 10], sizes = [2, 1], strides = [1, 1]} : vector<2x16xf32> to vector<2x1xf32>
    %866 = vector.broadcast %865 : vector<2x1xf32> to vector<2x64xf32>
    %867 = vector.broadcast %24 : vector<1x64xf32> to vector<2x64xf32>
    %868 = arith.mulf %866, %867 : vector<2x64xf32>
    %869 = vector.extract_strided_slice %823 {offsets = [0, 11], sizes = [2, 1], strides = [1, 1]} : vector<2x16xf32> to vector<2x1xf32>
    %870 = vector.broadcast %869 : vector<2x1xf32> to vector<2x64xf32>
    %871 = vector.broadcast %25 : vector<1x64xf32> to vector<2x64xf32>
    %872 = arith.mulf %870, %871 : vector<2x64xf32>
    %873 = vector.extract_strided_slice %823 {offsets = [0, 12], sizes = [2, 1], strides = [1, 1]} : vector<2x16xf32> to vector<2x1xf32>
    %874 = vector.broadcast %873 : vector<2x1xf32> to vector<2x64xf32>
    %875 = vector.broadcast %26 : vector<1x64xf32> to vector<2x64xf32>
    %876 = arith.mulf %874, %875 : vector<2x64xf32>
    %877 = vector.extract_strided_slice %823 {offsets = [0, 13], sizes = [2, 1], strides = [1, 1]} : vector<2x16xf32> to vector<2x1xf32>
    %878 = vector.broadcast %877 : vector<2x1xf32> to vector<2x64xf32>
    %879 = vector.broadcast %27 : vector<1x64xf32> to vector<2x64xf32>
    %880 = arith.mulf %878, %879 : vector<2x64xf32>
    %881 = vector.extract_strided_slice %823 {offsets = [0, 14], sizes = [2, 1], strides = [1, 1]} : vector<2x16xf32> to vector<2x1xf32>
    %882 = vector.broadcast %881 : vector<2x1xf32> to vector<2x64xf32>
    %883 = vector.broadcast %28 : vector<1x64xf32> to vector<2x64xf32>
    %884 = arith.mulf %882, %883 : vector<2x64xf32>
    %885 = vector.extract_strided_slice %823 {offsets = [0, 15], sizes = [2, 1], strides = [1, 1]} : vector<2x16xf32> to vector<2x1xf32>
    %886 = vector.broadcast %885 : vector<2x1xf32> to vector<2x64xf32>
    %887 = vector.broadcast %29 : vector<1x64xf32> to vector<2x64xf32>
    %888 = arith.mulf %886, %887 : vector<2x64xf32>
    %889 = arith.addf %828, %832 : vector<2x64xf32>
    %890 = arith.addf %836, %840 : vector<2x64xf32>
    %891 = arith.addf %844, %848 : vector<2x64xf32>
    %892 = arith.addf %852, %856 : vector<2x64xf32>
    %893 = arith.addf %860, %864 : vector<2x64xf32>
    %894 = arith.addf %868, %872 : vector<2x64xf32>
    %895 = arith.addf %876, %880 : vector<2x64xf32>
    %896 = arith.addf %884, %888 : vector<2x64xf32>
    %897 = arith.addf %889, %890 : vector<2x64xf32>
    %898 = arith.addf %891, %892 : vector<2x64xf32>
    %899 = arith.addf %893, %894 : vector<2x64xf32>
    %900 = arith.addf %895, %896 : vector<2x64xf32>
    %901 = arith.addf %897, %898 : vector<2x64xf32>
    %902 = arith.addf %899, %900 : vector<2x64xf32>
    %903 = arith.addf %901, %902 : vector<2x64xf32>
    %904 = arith.addf %824, %903 : vector<2x64xf32>
    %905 = arith.negf %904 : vector<2x64xf32>
    %906 = math.exp %905 : vector<2x64xf32>
    %cst_39 = arith.constant 1.000000e+00 : f32
    %907 = vector.broadcast %cst_39 : f32 to vector<2x64xf32>
    %908 = arith.addf %907, %906 : vector<2x64xf32>
    %909 = arith.divf %907, %908 : vector<2x64xf32>
    %910 = vector.extract_strided_slice %909 {offsets = [0, 0], sizes = [2, 16], strides = [1, 1]} : vector<2x64xf32> to vector<2x16xf32>
    %911 = vector.extract_strided_slice %909 {offsets = [0, 16], sizes = [2, 16], strides = [1, 1]} : vector<2x64xf32> to vector<2x16xf32>
    %912 = vector.extract_strided_slice %909 {offsets = [0, 32], sizes = [2, 16], strides = [1, 1]} : vector<2x64xf32> to vector<2x16xf32>
    %cst_40 = arith.constant 2.000000e+00 : f32
    %913 = vector.broadcast %cst_40 : f32 to vector<2x16xf32>
    %914 = arith.mulf %913, %912 : vector<2x16xf32>
    %cst_41 = arith.constant 1.000000e+00 : f32
    %915 = vector.broadcast %cst_41 : f32 to vector<2x16xf32>
    %916 = arith.subf %914, %915 : vector<2x16xf32>
    %917 = vector.extract_strided_slice %909 {offsets = [0, 48], sizes = [2, 16], strides = [1, 1]} : vector<2x64xf32> to vector<2x16xf32>
    %918 = arith.mulf %911, %821 : vector<2x16xf32>
    %919 = arith.mulf %910, %916 : vector<2x16xf32>
    %920 = arith.addf %918, %919 : vector<2x16xf32>
    %921 = math.tanh %920 : vector<2x16xf32>
    %922 = arith.mulf %917, %921 : vector<2x16xf32>
    %923 = vector.extract_strided_slice %12 {offsets = [18, 0], sizes = [2, 64], strides = [1, 1]} : vector<28x64xf32> to vector<2x64xf32>
    %924 = vector.extract_strided_slice %922 {offsets = [0, 0], sizes = [2, 1], strides = [1, 1]} : vector<2x16xf32> to vector<2x1xf32>
    %925 = vector.broadcast %924 : vector<2x1xf32> to vector<2x64xf32>
    %926 = vector.broadcast %14 : vector<1x64xf32> to vector<2x64xf32>
    %927 = arith.mulf %925, %926 : vector<2x64xf32>
    %928 = vector.extract_strided_slice %922 {offsets = [0, 1], sizes = [2, 1], strides = [1, 1]} : vector<2x16xf32> to vector<2x1xf32>
    %929 = vector.broadcast %928 : vector<2x1xf32> to vector<2x64xf32>
    %930 = vector.broadcast %15 : vector<1x64xf32> to vector<2x64xf32>
    %931 = arith.mulf %929, %930 : vector<2x64xf32>
    %932 = vector.extract_strided_slice %922 {offsets = [0, 2], sizes = [2, 1], strides = [1, 1]} : vector<2x16xf32> to vector<2x1xf32>
    %933 = vector.broadcast %932 : vector<2x1xf32> to vector<2x64xf32>
    %934 = vector.broadcast %16 : vector<1x64xf32> to vector<2x64xf32>
    %935 = arith.mulf %933, %934 : vector<2x64xf32>
    %936 = vector.extract_strided_slice %922 {offsets = [0, 3], sizes = [2, 1], strides = [1, 1]} : vector<2x16xf32> to vector<2x1xf32>
    %937 = vector.broadcast %936 : vector<2x1xf32> to vector<2x64xf32>
    %938 = vector.broadcast %17 : vector<1x64xf32> to vector<2x64xf32>
    %939 = arith.mulf %937, %938 : vector<2x64xf32>
    %940 = vector.extract_strided_slice %922 {offsets = [0, 4], sizes = [2, 1], strides = [1, 1]} : vector<2x16xf32> to vector<2x1xf32>
    %941 = vector.broadcast %940 : vector<2x1xf32> to vector<2x64xf32>
    %942 = vector.broadcast %18 : vector<1x64xf32> to vector<2x64xf32>
    %943 = arith.mulf %941, %942 : vector<2x64xf32>
    %944 = vector.extract_strided_slice %922 {offsets = [0, 5], sizes = [2, 1], strides = [1, 1]} : vector<2x16xf32> to vector<2x1xf32>
    %945 = vector.broadcast %944 : vector<2x1xf32> to vector<2x64xf32>
    %946 = vector.broadcast %19 : vector<1x64xf32> to vector<2x64xf32>
    %947 = arith.mulf %945, %946 : vector<2x64xf32>
    %948 = vector.extract_strided_slice %922 {offsets = [0, 6], sizes = [2, 1], strides = [1, 1]} : vector<2x16xf32> to vector<2x1xf32>
    %949 = vector.broadcast %948 : vector<2x1xf32> to vector<2x64xf32>
    %950 = vector.broadcast %20 : vector<1x64xf32> to vector<2x64xf32>
    %951 = arith.mulf %949, %950 : vector<2x64xf32>
    %952 = vector.extract_strided_slice %922 {offsets = [0, 7], sizes = [2, 1], strides = [1, 1]} : vector<2x16xf32> to vector<2x1xf32>
    %953 = vector.broadcast %952 : vector<2x1xf32> to vector<2x64xf32>
    %954 = vector.broadcast %21 : vector<1x64xf32> to vector<2x64xf32>
    %955 = arith.mulf %953, %954 : vector<2x64xf32>
    %956 = vector.extract_strided_slice %922 {offsets = [0, 8], sizes = [2, 1], strides = [1, 1]} : vector<2x16xf32> to vector<2x1xf32>
    %957 = vector.broadcast %956 : vector<2x1xf32> to vector<2x64xf32>
    %958 = vector.broadcast %22 : vector<1x64xf32> to vector<2x64xf32>
    %959 = arith.mulf %957, %958 : vector<2x64xf32>
    %960 = vector.extract_strided_slice %922 {offsets = [0, 9], sizes = [2, 1], strides = [1, 1]} : vector<2x16xf32> to vector<2x1xf32>
    %961 = vector.broadcast %960 : vector<2x1xf32> to vector<2x64xf32>
    %962 = vector.broadcast %23 : vector<1x64xf32> to vector<2x64xf32>
    %963 = arith.mulf %961, %962 : vector<2x64xf32>
    %964 = vector.extract_strided_slice %922 {offsets = [0, 10], sizes = [2, 1], strides = [1, 1]} : vector<2x16xf32> to vector<2x1xf32>
    %965 = vector.broadcast %964 : vector<2x1xf32> to vector<2x64xf32>
    %966 = vector.broadcast %24 : vector<1x64xf32> to vector<2x64xf32>
    %967 = arith.mulf %965, %966 : vector<2x64xf32>
    %968 = vector.extract_strided_slice %922 {offsets = [0, 11], sizes = [2, 1], strides = [1, 1]} : vector<2x16xf32> to vector<2x1xf32>
    %969 = vector.broadcast %968 : vector<2x1xf32> to vector<2x64xf32>
    %970 = vector.broadcast %25 : vector<1x64xf32> to vector<2x64xf32>
    %971 = arith.mulf %969, %970 : vector<2x64xf32>
    %972 = vector.extract_strided_slice %922 {offsets = [0, 12], sizes = [2, 1], strides = [1, 1]} : vector<2x16xf32> to vector<2x1xf32>
    %973 = vector.broadcast %972 : vector<2x1xf32> to vector<2x64xf32>
    %974 = vector.broadcast %26 : vector<1x64xf32> to vector<2x64xf32>
    %975 = arith.mulf %973, %974 : vector<2x64xf32>
    %976 = vector.extract_strided_slice %922 {offsets = [0, 13], sizes = [2, 1], strides = [1, 1]} : vector<2x16xf32> to vector<2x1xf32>
    %977 = vector.broadcast %976 : vector<2x1xf32> to vector<2x64xf32>
    %978 = vector.broadcast %27 : vector<1x64xf32> to vector<2x64xf32>
    %979 = arith.mulf %977, %978 : vector<2x64xf32>
    %980 = vector.extract_strided_slice %922 {offsets = [0, 14], sizes = [2, 1], strides = [1, 1]} : vector<2x16xf32> to vector<2x1xf32>
    %981 = vector.broadcast %980 : vector<2x1xf32> to vector<2x64xf32>
    %982 = vector.broadcast %28 : vector<1x64xf32> to vector<2x64xf32>
    %983 = arith.mulf %981, %982 : vector<2x64xf32>
    %984 = vector.extract_strided_slice %922 {offsets = [0, 15], sizes = [2, 1], strides = [1, 1]} : vector<2x16xf32> to vector<2x1xf32>
    %985 = vector.broadcast %984 : vector<2x1xf32> to vector<2x64xf32>
    %986 = vector.broadcast %29 : vector<1x64xf32> to vector<2x64xf32>
    %987 = arith.mulf %985, %986 : vector<2x64xf32>
    %988 = arith.addf %927, %931 : vector<2x64xf32>
    %989 = arith.addf %935, %939 : vector<2x64xf32>
    %990 = arith.addf %943, %947 : vector<2x64xf32>
    %991 = arith.addf %951, %955 : vector<2x64xf32>
    %992 = arith.addf %959, %963 : vector<2x64xf32>
    %993 = arith.addf %967, %971 : vector<2x64xf32>
    %994 = arith.addf %975, %979 : vector<2x64xf32>
    %995 = arith.addf %983, %987 : vector<2x64xf32>
    %996 = arith.addf %988, %989 : vector<2x64xf32>
    %997 = arith.addf %990, %991 : vector<2x64xf32>
    %998 = arith.addf %992, %993 : vector<2x64xf32>
    %999 = arith.addf %994, %995 : vector<2x64xf32>
    %1000 = arith.addf %996, %997 : vector<2x64xf32>
    %1001 = arith.addf %998, %999 : vector<2x64xf32>
    %1002 = arith.addf %1000, %1001 : vector<2x64xf32>
    %1003 = arith.addf %923, %1002 : vector<2x64xf32>
    %1004 = arith.negf %1003 : vector<2x64xf32>
    %1005 = math.exp %1004 : vector<2x64xf32>
    %cst_42 = arith.constant 1.000000e+00 : f32
    %1006 = vector.broadcast %cst_42 : f32 to vector<2x64xf32>
    %1007 = arith.addf %1006, %1005 : vector<2x64xf32>
    %1008 = arith.divf %1006, %1007 : vector<2x64xf32>
    %1009 = vector.extract_strided_slice %1008 {offsets = [0, 0], sizes = [2, 16], strides = [1, 1]} : vector<2x64xf32> to vector<2x16xf32>
    %1010 = vector.extract_strided_slice %1008 {offsets = [0, 16], sizes = [2, 16], strides = [1, 1]} : vector<2x64xf32> to vector<2x16xf32>
    %1011 = vector.extract_strided_slice %1008 {offsets = [0, 32], sizes = [2, 16], strides = [1, 1]} : vector<2x64xf32> to vector<2x16xf32>
    %cst_43 = arith.constant 2.000000e+00 : f32
    %1012 = vector.broadcast %cst_43 : f32 to vector<2x16xf32>
    %1013 = arith.mulf %1012, %1011 : vector<2x16xf32>
    %cst_44 = arith.constant 1.000000e+00 : f32
    %1014 = vector.broadcast %cst_44 : f32 to vector<2x16xf32>
    %1015 = arith.subf %1013, %1014 : vector<2x16xf32>
    %1016 = vector.extract_strided_slice %1008 {offsets = [0, 48], sizes = [2, 16], strides = [1, 1]} : vector<2x64xf32> to vector<2x16xf32>
    %1017 = arith.mulf %1010, %920 : vector<2x16xf32>
    %1018 = arith.mulf %1009, %1015 : vector<2x16xf32>
    %1019 = arith.addf %1017, %1018 : vector<2x16xf32>
    %1020 = math.tanh %1019 : vector<2x16xf32>
    %1021 = arith.mulf %1016, %1020 : vector<2x16xf32>
    %1022 = vector.extract_strided_slice %12 {offsets = [20, 0], sizes = [2, 64], strides = [1, 1]} : vector<28x64xf32> to vector<2x64xf32>
    %1023 = vector.extract_strided_slice %1021 {offsets = [0, 0], sizes = [2, 1], strides = [1, 1]} : vector<2x16xf32> to vector<2x1xf32>
    %1024 = vector.broadcast %1023 : vector<2x1xf32> to vector<2x64xf32>
    %1025 = vector.broadcast %14 : vector<1x64xf32> to vector<2x64xf32>
    %1026 = arith.mulf %1024, %1025 : vector<2x64xf32>
    %1027 = vector.extract_strided_slice %1021 {offsets = [0, 1], sizes = [2, 1], strides = [1, 1]} : vector<2x16xf32> to vector<2x1xf32>
    %1028 = vector.broadcast %1027 : vector<2x1xf32> to vector<2x64xf32>
    %1029 = vector.broadcast %15 : vector<1x64xf32> to vector<2x64xf32>
    %1030 = arith.mulf %1028, %1029 : vector<2x64xf32>
    %1031 = vector.extract_strided_slice %1021 {offsets = [0, 2], sizes = [2, 1], strides = [1, 1]} : vector<2x16xf32> to vector<2x1xf32>
    %1032 = vector.broadcast %1031 : vector<2x1xf32> to vector<2x64xf32>
    %1033 = vector.broadcast %16 : vector<1x64xf32> to vector<2x64xf32>
    %1034 = arith.mulf %1032, %1033 : vector<2x64xf32>
    %1035 = vector.extract_strided_slice %1021 {offsets = [0, 3], sizes = [2, 1], strides = [1, 1]} : vector<2x16xf32> to vector<2x1xf32>
    %1036 = vector.broadcast %1035 : vector<2x1xf32> to vector<2x64xf32>
    %1037 = vector.broadcast %17 : vector<1x64xf32> to vector<2x64xf32>
    %1038 = arith.mulf %1036, %1037 : vector<2x64xf32>
    %1039 = vector.extract_strided_slice %1021 {offsets = [0, 4], sizes = [2, 1], strides = [1, 1]} : vector<2x16xf32> to vector<2x1xf32>
    %1040 = vector.broadcast %1039 : vector<2x1xf32> to vector<2x64xf32>
    %1041 = vector.broadcast %18 : vector<1x64xf32> to vector<2x64xf32>
    %1042 = arith.mulf %1040, %1041 : vector<2x64xf32>
    %1043 = vector.extract_strided_slice %1021 {offsets = [0, 5], sizes = [2, 1], strides = [1, 1]} : vector<2x16xf32> to vector<2x1xf32>
    %1044 = vector.broadcast %1043 : vector<2x1xf32> to vector<2x64xf32>
    %1045 = vector.broadcast %19 : vector<1x64xf32> to vector<2x64xf32>
    %1046 = arith.mulf %1044, %1045 : vector<2x64xf32>
    %1047 = vector.extract_strided_slice %1021 {offsets = [0, 6], sizes = [2, 1], strides = [1, 1]} : vector<2x16xf32> to vector<2x1xf32>
    %1048 = vector.broadcast %1047 : vector<2x1xf32> to vector<2x64xf32>
    %1049 = vector.broadcast %20 : vector<1x64xf32> to vector<2x64xf32>
    %1050 = arith.mulf %1048, %1049 : vector<2x64xf32>
    %1051 = vector.extract_strided_slice %1021 {offsets = [0, 7], sizes = [2, 1], strides = [1, 1]} : vector<2x16xf32> to vector<2x1xf32>
    %1052 = vector.broadcast %1051 : vector<2x1xf32> to vector<2x64xf32>
    %1053 = vector.broadcast %21 : vector<1x64xf32> to vector<2x64xf32>
    %1054 = arith.mulf %1052, %1053 : vector<2x64xf32>
    %1055 = vector.extract_strided_slice %1021 {offsets = [0, 8], sizes = [2, 1], strides = [1, 1]} : vector<2x16xf32> to vector<2x1xf32>
    %1056 = vector.broadcast %1055 : vector<2x1xf32> to vector<2x64xf32>
    %1057 = vector.broadcast %22 : vector<1x64xf32> to vector<2x64xf32>
    %1058 = arith.mulf %1056, %1057 : vector<2x64xf32>
    %1059 = vector.extract_strided_slice %1021 {offsets = [0, 9], sizes = [2, 1], strides = [1, 1]} : vector<2x16xf32> to vector<2x1xf32>
    %1060 = vector.broadcast %1059 : vector<2x1xf32> to vector<2x64xf32>
    %1061 = vector.broadcast %23 : vector<1x64xf32> to vector<2x64xf32>
    %1062 = arith.mulf %1060, %1061 : vector<2x64xf32>
    %1063 = vector.extract_strided_slice %1021 {offsets = [0, 10], sizes = [2, 1], strides = [1, 1]} : vector<2x16xf32> to vector<2x1xf32>
    %1064 = vector.broadcast %1063 : vector<2x1xf32> to vector<2x64xf32>
    %1065 = vector.broadcast %24 : vector<1x64xf32> to vector<2x64xf32>
    %1066 = arith.mulf %1064, %1065 : vector<2x64xf32>
    %1067 = vector.extract_strided_slice %1021 {offsets = [0, 11], sizes = [2, 1], strides = [1, 1]} : vector<2x16xf32> to vector<2x1xf32>
    %1068 = vector.broadcast %1067 : vector<2x1xf32> to vector<2x64xf32>
    %1069 = vector.broadcast %25 : vector<1x64xf32> to vector<2x64xf32>
    %1070 = arith.mulf %1068, %1069 : vector<2x64xf32>
    %1071 = vector.extract_strided_slice %1021 {offsets = [0, 12], sizes = [2, 1], strides = [1, 1]} : vector<2x16xf32> to vector<2x1xf32>
    %1072 = vector.broadcast %1071 : vector<2x1xf32> to vector<2x64xf32>
    %1073 = vector.broadcast %26 : vector<1x64xf32> to vector<2x64xf32>
    %1074 = arith.mulf %1072, %1073 : vector<2x64xf32>
    %1075 = vector.extract_strided_slice %1021 {offsets = [0, 13], sizes = [2, 1], strides = [1, 1]} : vector<2x16xf32> to vector<2x1xf32>
    %1076 = vector.broadcast %1075 : vector<2x1xf32> to vector<2x64xf32>
    %1077 = vector.broadcast %27 : vector<1x64xf32> to vector<2x64xf32>
    %1078 = arith.mulf %1076, %1077 : vector<2x64xf32>
    %1079 = vector.extract_strided_slice %1021 {offsets = [0, 14], sizes = [2, 1], strides = [1, 1]} : vector<2x16xf32> to vector<2x1xf32>
    %1080 = vector.broadcast %1079 : vector<2x1xf32> to vector<2x64xf32>
    %1081 = vector.broadcast %28 : vector<1x64xf32> to vector<2x64xf32>
    %1082 = arith.mulf %1080, %1081 : vector<2x64xf32>
    %1083 = vector.extract_strided_slice %1021 {offsets = [0, 15], sizes = [2, 1], strides = [1, 1]} : vector<2x16xf32> to vector<2x1xf32>
    %1084 = vector.broadcast %1083 : vector<2x1xf32> to vector<2x64xf32>
    %1085 = vector.broadcast %29 : vector<1x64xf32> to vector<2x64xf32>
    %1086 = arith.mulf %1084, %1085 : vector<2x64xf32>
    %1087 = arith.addf %1026, %1030 : vector<2x64xf32>
    %1088 = arith.addf %1034, %1038 : vector<2x64xf32>
    %1089 = arith.addf %1042, %1046 : vector<2x64xf32>
    %1090 = arith.addf %1050, %1054 : vector<2x64xf32>
    %1091 = arith.addf %1058, %1062 : vector<2x64xf32>
    %1092 = arith.addf %1066, %1070 : vector<2x64xf32>
    %1093 = arith.addf %1074, %1078 : vector<2x64xf32>
    %1094 = arith.addf %1082, %1086 : vector<2x64xf32>
    %1095 = arith.addf %1087, %1088 : vector<2x64xf32>
    %1096 = arith.addf %1089, %1090 : vector<2x64xf32>
    %1097 = arith.addf %1091, %1092 : vector<2x64xf32>
    %1098 = arith.addf %1093, %1094 : vector<2x64xf32>
    %1099 = arith.addf %1095, %1096 : vector<2x64xf32>
    %1100 = arith.addf %1097, %1098 : vector<2x64xf32>
    %1101 = arith.addf %1099, %1100 : vector<2x64xf32>
    %1102 = arith.addf %1022, %1101 : vector<2x64xf32>
    %1103 = arith.negf %1102 : vector<2x64xf32>
    %1104 = math.exp %1103 : vector<2x64xf32>
    %cst_45 = arith.constant 1.000000e+00 : f32
    %1105 = vector.broadcast %cst_45 : f32 to vector<2x64xf32>
    %1106 = arith.addf %1105, %1104 : vector<2x64xf32>
    %1107 = arith.divf %1105, %1106 : vector<2x64xf32>
    %1108 = vector.extract_strided_slice %1107 {offsets = [0, 0], sizes = [2, 16], strides = [1, 1]} : vector<2x64xf32> to vector<2x16xf32>
    %1109 = vector.extract_strided_slice %1107 {offsets = [0, 16], sizes = [2, 16], strides = [1, 1]} : vector<2x64xf32> to vector<2x16xf32>
    %1110 = vector.extract_strided_slice %1107 {offsets = [0, 32], sizes = [2, 16], strides = [1, 1]} : vector<2x64xf32> to vector<2x16xf32>
    %cst_46 = arith.constant 2.000000e+00 : f32
    %1111 = vector.broadcast %cst_46 : f32 to vector<2x16xf32>
    %1112 = arith.mulf %1111, %1110 : vector<2x16xf32>
    %cst_47 = arith.constant 1.000000e+00 : f32
    %1113 = vector.broadcast %cst_47 : f32 to vector<2x16xf32>
    %1114 = arith.subf %1112, %1113 : vector<2x16xf32>
    %1115 = vector.extract_strided_slice %1107 {offsets = [0, 48], sizes = [2, 16], strides = [1, 1]} : vector<2x64xf32> to vector<2x16xf32>
    %1116 = arith.mulf %1109, %1019 : vector<2x16xf32>
    %1117 = arith.mulf %1108, %1114 : vector<2x16xf32>
    %1118 = arith.addf %1116, %1117 : vector<2x16xf32>
    %1119 = math.tanh %1118 : vector<2x16xf32>
    %1120 = arith.mulf %1115, %1119 : vector<2x16xf32>
    %1121 = vector.extract_strided_slice %12 {offsets = [22, 0], sizes = [2, 64], strides = [1, 1]} : vector<28x64xf32> to vector<2x64xf32>
    %1122 = vector.extract_strided_slice %1120 {offsets = [0, 0], sizes = [2, 1], strides = [1, 1]} : vector<2x16xf32> to vector<2x1xf32>
    %1123 = vector.broadcast %1122 : vector<2x1xf32> to vector<2x64xf32>
    %1124 = vector.broadcast %14 : vector<1x64xf32> to vector<2x64xf32>
    %1125 = arith.mulf %1123, %1124 : vector<2x64xf32>
    %1126 = vector.extract_strided_slice %1120 {offsets = [0, 1], sizes = [2, 1], strides = [1, 1]} : vector<2x16xf32> to vector<2x1xf32>
    %1127 = vector.broadcast %1126 : vector<2x1xf32> to vector<2x64xf32>
    %1128 = vector.broadcast %15 : vector<1x64xf32> to vector<2x64xf32>
    %1129 = arith.mulf %1127, %1128 : vector<2x64xf32>
    %1130 = vector.extract_strided_slice %1120 {offsets = [0, 2], sizes = [2, 1], strides = [1, 1]} : vector<2x16xf32> to vector<2x1xf32>
    %1131 = vector.broadcast %1130 : vector<2x1xf32> to vector<2x64xf32>
    %1132 = vector.broadcast %16 : vector<1x64xf32> to vector<2x64xf32>
    %1133 = arith.mulf %1131, %1132 : vector<2x64xf32>
    %1134 = vector.extract_strided_slice %1120 {offsets = [0, 3], sizes = [2, 1], strides = [1, 1]} : vector<2x16xf32> to vector<2x1xf32>
    %1135 = vector.broadcast %1134 : vector<2x1xf32> to vector<2x64xf32>
    %1136 = vector.broadcast %17 : vector<1x64xf32> to vector<2x64xf32>
    %1137 = arith.mulf %1135, %1136 : vector<2x64xf32>
    %1138 = vector.extract_strided_slice %1120 {offsets = [0, 4], sizes = [2, 1], strides = [1, 1]} : vector<2x16xf32> to vector<2x1xf32>
    %1139 = vector.broadcast %1138 : vector<2x1xf32> to vector<2x64xf32>
    %1140 = vector.broadcast %18 : vector<1x64xf32> to vector<2x64xf32>
    %1141 = arith.mulf %1139, %1140 : vector<2x64xf32>
    %1142 = vector.extract_strided_slice %1120 {offsets = [0, 5], sizes = [2, 1], strides = [1, 1]} : vector<2x16xf32> to vector<2x1xf32>
    %1143 = vector.broadcast %1142 : vector<2x1xf32> to vector<2x64xf32>
    %1144 = vector.broadcast %19 : vector<1x64xf32> to vector<2x64xf32>
    %1145 = arith.mulf %1143, %1144 : vector<2x64xf32>
    %1146 = vector.extract_strided_slice %1120 {offsets = [0, 6], sizes = [2, 1], strides = [1, 1]} : vector<2x16xf32> to vector<2x1xf32>
    %1147 = vector.broadcast %1146 : vector<2x1xf32> to vector<2x64xf32>
    %1148 = vector.broadcast %20 : vector<1x64xf32> to vector<2x64xf32>
    %1149 = arith.mulf %1147, %1148 : vector<2x64xf32>
    %1150 = vector.extract_strided_slice %1120 {offsets = [0, 7], sizes = [2, 1], strides = [1, 1]} : vector<2x16xf32> to vector<2x1xf32>
    %1151 = vector.broadcast %1150 : vector<2x1xf32> to vector<2x64xf32>
    %1152 = vector.broadcast %21 : vector<1x64xf32> to vector<2x64xf32>
    %1153 = arith.mulf %1151, %1152 : vector<2x64xf32>
    %1154 = vector.extract_strided_slice %1120 {offsets = [0, 8], sizes = [2, 1], strides = [1, 1]} : vector<2x16xf32> to vector<2x1xf32>
    %1155 = vector.broadcast %1154 : vector<2x1xf32> to vector<2x64xf32>
    %1156 = vector.broadcast %22 : vector<1x64xf32> to vector<2x64xf32>
    %1157 = arith.mulf %1155, %1156 : vector<2x64xf32>
    %1158 = vector.extract_strided_slice %1120 {offsets = [0, 9], sizes = [2, 1], strides = [1, 1]} : vector<2x16xf32> to vector<2x1xf32>
    %1159 = vector.broadcast %1158 : vector<2x1xf32> to vector<2x64xf32>
    %1160 = vector.broadcast %23 : vector<1x64xf32> to vector<2x64xf32>
    %1161 = arith.mulf %1159, %1160 : vector<2x64xf32>
    %1162 = vector.extract_strided_slice %1120 {offsets = [0, 10], sizes = [2, 1], strides = [1, 1]} : vector<2x16xf32> to vector<2x1xf32>
    %1163 = vector.broadcast %1162 : vector<2x1xf32> to vector<2x64xf32>
    %1164 = vector.broadcast %24 : vector<1x64xf32> to vector<2x64xf32>
    %1165 = arith.mulf %1163, %1164 : vector<2x64xf32>
    %1166 = vector.extract_strided_slice %1120 {offsets = [0, 11], sizes = [2, 1], strides = [1, 1]} : vector<2x16xf32> to vector<2x1xf32>
    %1167 = vector.broadcast %1166 : vector<2x1xf32> to vector<2x64xf32>
    %1168 = vector.broadcast %25 : vector<1x64xf32> to vector<2x64xf32>
    %1169 = arith.mulf %1167, %1168 : vector<2x64xf32>
    %1170 = vector.extract_strided_slice %1120 {offsets = [0, 12], sizes = [2, 1], strides = [1, 1]} : vector<2x16xf32> to vector<2x1xf32>
    %1171 = vector.broadcast %1170 : vector<2x1xf32> to vector<2x64xf32>
    %1172 = vector.broadcast %26 : vector<1x64xf32> to vector<2x64xf32>
    %1173 = arith.mulf %1171, %1172 : vector<2x64xf32>
    %1174 = vector.extract_strided_slice %1120 {offsets = [0, 13], sizes = [2, 1], strides = [1, 1]} : vector<2x16xf32> to vector<2x1xf32>
    %1175 = vector.broadcast %1174 : vector<2x1xf32> to vector<2x64xf32>
    %1176 = vector.broadcast %27 : vector<1x64xf32> to vector<2x64xf32>
    %1177 = arith.mulf %1175, %1176 : vector<2x64xf32>
    %1178 = vector.extract_strided_slice %1120 {offsets = [0, 14], sizes = [2, 1], strides = [1, 1]} : vector<2x16xf32> to vector<2x1xf32>
    %1179 = vector.broadcast %1178 : vector<2x1xf32> to vector<2x64xf32>
    %1180 = vector.broadcast %28 : vector<1x64xf32> to vector<2x64xf32>
    %1181 = arith.mulf %1179, %1180 : vector<2x64xf32>
    %1182 = vector.extract_strided_slice %1120 {offsets = [0, 15], sizes = [2, 1], strides = [1, 1]} : vector<2x16xf32> to vector<2x1xf32>
    %1183 = vector.broadcast %1182 : vector<2x1xf32> to vector<2x64xf32>
    %1184 = vector.broadcast %29 : vector<1x64xf32> to vector<2x64xf32>
    %1185 = arith.mulf %1183, %1184 : vector<2x64xf32>
    %1186 = arith.addf %1125, %1129 : vector<2x64xf32>
    %1187 = arith.addf %1133, %1137 : vector<2x64xf32>
    %1188 = arith.addf %1141, %1145 : vector<2x64xf32>
    %1189 = arith.addf %1149, %1153 : vector<2x64xf32>
    %1190 = arith.addf %1157, %1161 : vector<2x64xf32>
    %1191 = arith.addf %1165, %1169 : vector<2x64xf32>
    %1192 = arith.addf %1173, %1177 : vector<2x64xf32>
    %1193 = arith.addf %1181, %1185 : vector<2x64xf32>
    %1194 = arith.addf %1186, %1187 : vector<2x64xf32>
    %1195 = arith.addf %1188, %1189 : vector<2x64xf32>
    %1196 = arith.addf %1190, %1191 : vector<2x64xf32>
    %1197 = arith.addf %1192, %1193 : vector<2x64xf32>
    %1198 = arith.addf %1194, %1195 : vector<2x64xf32>
    %1199 = arith.addf %1196, %1197 : vector<2x64xf32>
    %1200 = arith.addf %1198, %1199 : vector<2x64xf32>
    %1201 = arith.addf %1121, %1200 : vector<2x64xf32>
    %1202 = arith.negf %1201 : vector<2x64xf32>
    %1203 = math.exp %1202 : vector<2x64xf32>
    %cst_48 = arith.constant 1.000000e+00 : f32
    %1204 = vector.broadcast %cst_48 : f32 to vector<2x64xf32>
    %1205 = arith.addf %1204, %1203 : vector<2x64xf32>
    %1206 = arith.divf %1204, %1205 : vector<2x64xf32>
    %1207 = vector.extract_strided_slice %1206 {offsets = [0, 0], sizes = [2, 16], strides = [1, 1]} : vector<2x64xf32> to vector<2x16xf32>
    %1208 = vector.extract_strided_slice %1206 {offsets = [0, 16], sizes = [2, 16], strides = [1, 1]} : vector<2x64xf32> to vector<2x16xf32>
    %1209 = vector.extract_strided_slice %1206 {offsets = [0, 32], sizes = [2, 16], strides = [1, 1]} : vector<2x64xf32> to vector<2x16xf32>
    %cst_49 = arith.constant 2.000000e+00 : f32
    %1210 = vector.broadcast %cst_49 : f32 to vector<2x16xf32>
    %1211 = arith.mulf %1210, %1209 : vector<2x16xf32>
    %cst_50 = arith.constant 1.000000e+00 : f32
    %1212 = vector.broadcast %cst_50 : f32 to vector<2x16xf32>
    %1213 = arith.subf %1211, %1212 : vector<2x16xf32>
    %1214 = vector.extract_strided_slice %1206 {offsets = [0, 48], sizes = [2, 16], strides = [1, 1]} : vector<2x64xf32> to vector<2x16xf32>
    %1215 = arith.mulf %1208, %1118 : vector<2x16xf32>
    %1216 = arith.mulf %1207, %1213 : vector<2x16xf32>
    %1217 = arith.addf %1215, %1216 : vector<2x16xf32>
    %1218 = math.tanh %1217 : vector<2x16xf32>
    %1219 = arith.mulf %1214, %1218 : vector<2x16xf32>
    %1220 = vector.extract_strided_slice %12 {offsets = [24, 0], sizes = [2, 64], strides = [1, 1]} : vector<28x64xf32> to vector<2x64xf32>
    %1221 = vector.extract_strided_slice %1219 {offsets = [0, 0], sizes = [2, 1], strides = [1, 1]} : vector<2x16xf32> to vector<2x1xf32>
    %1222 = vector.broadcast %1221 : vector<2x1xf32> to vector<2x64xf32>
    %1223 = vector.broadcast %14 : vector<1x64xf32> to vector<2x64xf32>
    %1224 = arith.mulf %1222, %1223 : vector<2x64xf32>
    %1225 = vector.extract_strided_slice %1219 {offsets = [0, 1], sizes = [2, 1], strides = [1, 1]} : vector<2x16xf32> to vector<2x1xf32>
    %1226 = vector.broadcast %1225 : vector<2x1xf32> to vector<2x64xf32>
    %1227 = vector.broadcast %15 : vector<1x64xf32> to vector<2x64xf32>
    %1228 = arith.mulf %1226, %1227 : vector<2x64xf32>
    %1229 = vector.extract_strided_slice %1219 {offsets = [0, 2], sizes = [2, 1], strides = [1, 1]} : vector<2x16xf32> to vector<2x1xf32>
    %1230 = vector.broadcast %1229 : vector<2x1xf32> to vector<2x64xf32>
    %1231 = vector.broadcast %16 : vector<1x64xf32> to vector<2x64xf32>
    %1232 = arith.mulf %1230, %1231 : vector<2x64xf32>
    %1233 = vector.extract_strided_slice %1219 {offsets = [0, 3], sizes = [2, 1], strides = [1, 1]} : vector<2x16xf32> to vector<2x1xf32>
    %1234 = vector.broadcast %1233 : vector<2x1xf32> to vector<2x64xf32>
    %1235 = vector.broadcast %17 : vector<1x64xf32> to vector<2x64xf32>
    %1236 = arith.mulf %1234, %1235 : vector<2x64xf32>
    %1237 = vector.extract_strided_slice %1219 {offsets = [0, 4], sizes = [2, 1], strides = [1, 1]} : vector<2x16xf32> to vector<2x1xf32>
    %1238 = vector.broadcast %1237 : vector<2x1xf32> to vector<2x64xf32>
    %1239 = vector.broadcast %18 : vector<1x64xf32> to vector<2x64xf32>
    %1240 = arith.mulf %1238, %1239 : vector<2x64xf32>
    %1241 = vector.extract_strided_slice %1219 {offsets = [0, 5], sizes = [2, 1], strides = [1, 1]} : vector<2x16xf32> to vector<2x1xf32>
    %1242 = vector.broadcast %1241 : vector<2x1xf32> to vector<2x64xf32>
    %1243 = vector.broadcast %19 : vector<1x64xf32> to vector<2x64xf32>
    %1244 = arith.mulf %1242, %1243 : vector<2x64xf32>
    %1245 = vector.extract_strided_slice %1219 {offsets = [0, 6], sizes = [2, 1], strides = [1, 1]} : vector<2x16xf32> to vector<2x1xf32>
    %1246 = vector.broadcast %1245 : vector<2x1xf32> to vector<2x64xf32>
    %1247 = vector.broadcast %20 : vector<1x64xf32> to vector<2x64xf32>
    %1248 = arith.mulf %1246, %1247 : vector<2x64xf32>
    %1249 = vector.extract_strided_slice %1219 {offsets = [0, 7], sizes = [2, 1], strides = [1, 1]} : vector<2x16xf32> to vector<2x1xf32>
    %1250 = vector.broadcast %1249 : vector<2x1xf32> to vector<2x64xf32>
    %1251 = vector.broadcast %21 : vector<1x64xf32> to vector<2x64xf32>
    %1252 = arith.mulf %1250, %1251 : vector<2x64xf32>
    %1253 = vector.extract_strided_slice %1219 {offsets = [0, 8], sizes = [2, 1], strides = [1, 1]} : vector<2x16xf32> to vector<2x1xf32>
    %1254 = vector.broadcast %1253 : vector<2x1xf32> to vector<2x64xf32>
    %1255 = vector.broadcast %22 : vector<1x64xf32> to vector<2x64xf32>
    %1256 = arith.mulf %1254, %1255 : vector<2x64xf32>
    %1257 = vector.extract_strided_slice %1219 {offsets = [0, 9], sizes = [2, 1], strides = [1, 1]} : vector<2x16xf32> to vector<2x1xf32>
    %1258 = vector.broadcast %1257 : vector<2x1xf32> to vector<2x64xf32>
    %1259 = vector.broadcast %23 : vector<1x64xf32> to vector<2x64xf32>
    %1260 = arith.mulf %1258, %1259 : vector<2x64xf32>
    %1261 = vector.extract_strided_slice %1219 {offsets = [0, 10], sizes = [2, 1], strides = [1, 1]} : vector<2x16xf32> to vector<2x1xf32>
    %1262 = vector.broadcast %1261 : vector<2x1xf32> to vector<2x64xf32>
    %1263 = vector.broadcast %24 : vector<1x64xf32> to vector<2x64xf32>
    %1264 = arith.mulf %1262, %1263 : vector<2x64xf32>
    %1265 = vector.extract_strided_slice %1219 {offsets = [0, 11], sizes = [2, 1], strides = [1, 1]} : vector<2x16xf32> to vector<2x1xf32>
    %1266 = vector.broadcast %1265 : vector<2x1xf32> to vector<2x64xf32>
    %1267 = vector.broadcast %25 : vector<1x64xf32> to vector<2x64xf32>
    %1268 = arith.mulf %1266, %1267 : vector<2x64xf32>
    %1269 = vector.extract_strided_slice %1219 {offsets = [0, 12], sizes = [2, 1], strides = [1, 1]} : vector<2x16xf32> to vector<2x1xf32>
    %1270 = vector.broadcast %1269 : vector<2x1xf32> to vector<2x64xf32>
    %1271 = vector.broadcast %26 : vector<1x64xf32> to vector<2x64xf32>
    %1272 = arith.mulf %1270, %1271 : vector<2x64xf32>
    %1273 = vector.extract_strided_slice %1219 {offsets = [0, 13], sizes = [2, 1], strides = [1, 1]} : vector<2x16xf32> to vector<2x1xf32>
    %1274 = vector.broadcast %1273 : vector<2x1xf32> to vector<2x64xf32>
    %1275 = vector.broadcast %27 : vector<1x64xf32> to vector<2x64xf32>
    %1276 = arith.mulf %1274, %1275 : vector<2x64xf32>
    %1277 = vector.extract_strided_slice %1219 {offsets = [0, 14], sizes = [2, 1], strides = [1, 1]} : vector<2x16xf32> to vector<2x1xf32>
    %1278 = vector.broadcast %1277 : vector<2x1xf32> to vector<2x64xf32>
    %1279 = vector.broadcast %28 : vector<1x64xf32> to vector<2x64xf32>
    %1280 = arith.mulf %1278, %1279 : vector<2x64xf32>
    %1281 = vector.extract_strided_slice %1219 {offsets = [0, 15], sizes = [2, 1], strides = [1, 1]} : vector<2x16xf32> to vector<2x1xf32>
    %1282 = vector.broadcast %1281 : vector<2x1xf32> to vector<2x64xf32>
    %1283 = vector.broadcast %29 : vector<1x64xf32> to vector<2x64xf32>
    %1284 = arith.mulf %1282, %1283 : vector<2x64xf32>
    %1285 = arith.addf %1224, %1228 : vector<2x64xf32>
    %1286 = arith.addf %1232, %1236 : vector<2x64xf32>
    %1287 = arith.addf %1240, %1244 : vector<2x64xf32>
    %1288 = arith.addf %1248, %1252 : vector<2x64xf32>
    %1289 = arith.addf %1256, %1260 : vector<2x64xf32>
    %1290 = arith.addf %1264, %1268 : vector<2x64xf32>
    %1291 = arith.addf %1272, %1276 : vector<2x64xf32>
    %1292 = arith.addf %1280, %1284 : vector<2x64xf32>
    %1293 = arith.addf %1285, %1286 : vector<2x64xf32>
    %1294 = arith.addf %1287, %1288 : vector<2x64xf32>
    %1295 = arith.addf %1289, %1290 : vector<2x64xf32>
    %1296 = arith.addf %1291, %1292 : vector<2x64xf32>
    %1297 = arith.addf %1293, %1294 : vector<2x64xf32>
    %1298 = arith.addf %1295, %1296 : vector<2x64xf32>
    %1299 = arith.addf %1297, %1298 : vector<2x64xf32>
    %1300 = arith.addf %1220, %1299 : vector<2x64xf32>
    %1301 = arith.negf %1300 : vector<2x64xf32>
    %1302 = math.exp %1301 : vector<2x64xf32>
    %cst_51 = arith.constant 1.000000e+00 : f32
    %1303 = vector.broadcast %cst_51 : f32 to vector<2x64xf32>
    %1304 = arith.addf %1303, %1302 : vector<2x64xf32>
    %1305 = arith.divf %1303, %1304 : vector<2x64xf32>
    %1306 = vector.extract_strided_slice %1305 {offsets = [0, 0], sizes = [2, 16], strides = [1, 1]} : vector<2x64xf32> to vector<2x16xf32>
    %1307 = vector.extract_strided_slice %1305 {offsets = [0, 16], sizes = [2, 16], strides = [1, 1]} : vector<2x64xf32> to vector<2x16xf32>
    %1308 = vector.extract_strided_slice %1305 {offsets = [0, 32], sizes = [2, 16], strides = [1, 1]} : vector<2x64xf32> to vector<2x16xf32>
    %cst_52 = arith.constant 2.000000e+00 : f32
    %1309 = vector.broadcast %cst_52 : f32 to vector<2x16xf32>
    %1310 = arith.mulf %1309, %1308 : vector<2x16xf32>
    %cst_53 = arith.constant 1.000000e+00 : f32
    %1311 = vector.broadcast %cst_53 : f32 to vector<2x16xf32>
    %1312 = arith.subf %1310, %1311 : vector<2x16xf32>
    %1313 = vector.extract_strided_slice %1305 {offsets = [0, 48], sizes = [2, 16], strides = [1, 1]} : vector<2x64xf32> to vector<2x16xf32>
    %1314 = arith.mulf %1307, %1217 : vector<2x16xf32>
    %1315 = arith.mulf %1306, %1312 : vector<2x16xf32>
    %1316 = arith.addf %1314, %1315 : vector<2x16xf32>
    %1317 = math.tanh %1316 : vector<2x16xf32>
    %1318 = arith.mulf %1313, %1317 : vector<2x16xf32>
    %1319 = vector.extract_strided_slice %12 {offsets = [26, 0], sizes = [2, 64], strides = [1, 1]} : vector<28x64xf32> to vector<2x64xf32>
    %1320 = vector.extract_strided_slice %1318 {offsets = [0, 0], sizes = [2, 1], strides = [1, 1]} : vector<2x16xf32> to vector<2x1xf32>
    %1321 = vector.broadcast %1320 : vector<2x1xf32> to vector<2x64xf32>
    %1322 = vector.broadcast %14 : vector<1x64xf32> to vector<2x64xf32>
    %1323 = arith.mulf %1321, %1322 : vector<2x64xf32>
    %1324 = vector.extract_strided_slice %1318 {offsets = [0, 1], sizes = [2, 1], strides = [1, 1]} : vector<2x16xf32> to vector<2x1xf32>
    %1325 = vector.broadcast %1324 : vector<2x1xf32> to vector<2x64xf32>
    %1326 = vector.broadcast %15 : vector<1x64xf32> to vector<2x64xf32>
    %1327 = arith.mulf %1325, %1326 : vector<2x64xf32>
    %1328 = vector.extract_strided_slice %1318 {offsets = [0, 2], sizes = [2, 1], strides = [1, 1]} : vector<2x16xf32> to vector<2x1xf32>
    %1329 = vector.broadcast %1328 : vector<2x1xf32> to vector<2x64xf32>
    %1330 = vector.broadcast %16 : vector<1x64xf32> to vector<2x64xf32>
    %1331 = arith.mulf %1329, %1330 : vector<2x64xf32>
    %1332 = vector.extract_strided_slice %1318 {offsets = [0, 3], sizes = [2, 1], strides = [1, 1]} : vector<2x16xf32> to vector<2x1xf32>
    %1333 = vector.broadcast %1332 : vector<2x1xf32> to vector<2x64xf32>
    %1334 = vector.broadcast %17 : vector<1x64xf32> to vector<2x64xf32>
    %1335 = arith.mulf %1333, %1334 : vector<2x64xf32>
    %1336 = vector.extract_strided_slice %1318 {offsets = [0, 4], sizes = [2, 1], strides = [1, 1]} : vector<2x16xf32> to vector<2x1xf32>
    %1337 = vector.broadcast %1336 : vector<2x1xf32> to vector<2x64xf32>
    %1338 = vector.broadcast %18 : vector<1x64xf32> to vector<2x64xf32>
    %1339 = arith.mulf %1337, %1338 : vector<2x64xf32>
    %1340 = vector.extract_strided_slice %1318 {offsets = [0, 5], sizes = [2, 1], strides = [1, 1]} : vector<2x16xf32> to vector<2x1xf32>
    %1341 = vector.broadcast %1340 : vector<2x1xf32> to vector<2x64xf32>
    %1342 = vector.broadcast %19 : vector<1x64xf32> to vector<2x64xf32>
    %1343 = arith.mulf %1341, %1342 : vector<2x64xf32>
    %1344 = vector.extract_strided_slice %1318 {offsets = [0, 6], sizes = [2, 1], strides = [1, 1]} : vector<2x16xf32> to vector<2x1xf32>
    %1345 = vector.broadcast %1344 : vector<2x1xf32> to vector<2x64xf32>
    %1346 = vector.broadcast %20 : vector<1x64xf32> to vector<2x64xf32>
    %1347 = arith.mulf %1345, %1346 : vector<2x64xf32>
    %1348 = vector.extract_strided_slice %1318 {offsets = [0, 7], sizes = [2, 1], strides = [1, 1]} : vector<2x16xf32> to vector<2x1xf32>
    %1349 = vector.broadcast %1348 : vector<2x1xf32> to vector<2x64xf32>
    %1350 = vector.broadcast %21 : vector<1x64xf32> to vector<2x64xf32>
    %1351 = arith.mulf %1349, %1350 : vector<2x64xf32>
    %1352 = vector.extract_strided_slice %1318 {offsets = [0, 8], sizes = [2, 1], strides = [1, 1]} : vector<2x16xf32> to vector<2x1xf32>
    %1353 = vector.broadcast %1352 : vector<2x1xf32> to vector<2x64xf32>
    %1354 = vector.broadcast %22 : vector<1x64xf32> to vector<2x64xf32>
    %1355 = arith.mulf %1353, %1354 : vector<2x64xf32>
    %1356 = vector.extract_strided_slice %1318 {offsets = [0, 9], sizes = [2, 1], strides = [1, 1]} : vector<2x16xf32> to vector<2x1xf32>
    %1357 = vector.broadcast %1356 : vector<2x1xf32> to vector<2x64xf32>
    %1358 = vector.broadcast %23 : vector<1x64xf32> to vector<2x64xf32>
    %1359 = arith.mulf %1357, %1358 : vector<2x64xf32>
    %1360 = vector.extract_strided_slice %1318 {offsets = [0, 10], sizes = [2, 1], strides = [1, 1]} : vector<2x16xf32> to vector<2x1xf32>
    %1361 = vector.broadcast %1360 : vector<2x1xf32> to vector<2x64xf32>
    %1362 = vector.broadcast %24 : vector<1x64xf32> to vector<2x64xf32>
    %1363 = arith.mulf %1361, %1362 : vector<2x64xf32>
    %1364 = vector.extract_strided_slice %1318 {offsets = [0, 11], sizes = [2, 1], strides = [1, 1]} : vector<2x16xf32> to vector<2x1xf32>
    %1365 = vector.broadcast %1364 : vector<2x1xf32> to vector<2x64xf32>
    %1366 = vector.broadcast %25 : vector<1x64xf32> to vector<2x64xf32>
    %1367 = arith.mulf %1365, %1366 : vector<2x64xf32>
    %1368 = vector.extract_strided_slice %1318 {offsets = [0, 12], sizes = [2, 1], strides = [1, 1]} : vector<2x16xf32> to vector<2x1xf32>
    %1369 = vector.broadcast %1368 : vector<2x1xf32> to vector<2x64xf32>
    %1370 = vector.broadcast %26 : vector<1x64xf32> to vector<2x64xf32>
    %1371 = arith.mulf %1369, %1370 : vector<2x64xf32>
    %1372 = vector.extract_strided_slice %1318 {offsets = [0, 13], sizes = [2, 1], strides = [1, 1]} : vector<2x16xf32> to vector<2x1xf32>
    %1373 = vector.broadcast %1372 : vector<2x1xf32> to vector<2x64xf32>
    %1374 = vector.broadcast %27 : vector<1x64xf32> to vector<2x64xf32>
    %1375 = arith.mulf %1373, %1374 : vector<2x64xf32>
    %1376 = vector.extract_strided_slice %1318 {offsets = [0, 14], sizes = [2, 1], strides = [1, 1]} : vector<2x16xf32> to vector<2x1xf32>
    %1377 = vector.broadcast %1376 : vector<2x1xf32> to vector<2x64xf32>
    %1378 = vector.broadcast %28 : vector<1x64xf32> to vector<2x64xf32>
    %1379 = arith.mulf %1377, %1378 : vector<2x64xf32>
    %1380 = vector.extract_strided_slice %1318 {offsets = [0, 15], sizes = [2, 1], strides = [1, 1]} : vector<2x16xf32> to vector<2x1xf32>
    %1381 = vector.broadcast %1380 : vector<2x1xf32> to vector<2x64xf32>
    %1382 = vector.broadcast %29 : vector<1x64xf32> to vector<2x64xf32>
    %1383 = arith.mulf %1381, %1382 : vector<2x64xf32>
    %1384 = arith.addf %1323, %1327 : vector<2x64xf32>
    %1385 = arith.addf %1331, %1335 : vector<2x64xf32>
    %1386 = arith.addf %1339, %1343 : vector<2x64xf32>
    %1387 = arith.addf %1347, %1351 : vector<2x64xf32>
    %1388 = arith.addf %1355, %1359 : vector<2x64xf32>
    %1389 = arith.addf %1363, %1367 : vector<2x64xf32>
    %1390 = arith.addf %1371, %1375 : vector<2x64xf32>
    %1391 = arith.addf %1379, %1383 : vector<2x64xf32>
    %1392 = arith.addf %1384, %1385 : vector<2x64xf32>
    %1393 = arith.addf %1386, %1387 : vector<2x64xf32>
    %1394 = arith.addf %1388, %1389 : vector<2x64xf32>
    %1395 = arith.addf %1390, %1391 : vector<2x64xf32>
    %1396 = arith.addf %1392, %1393 : vector<2x64xf32>
    %1397 = arith.addf %1394, %1395 : vector<2x64xf32>
    %1398 = arith.addf %1396, %1397 : vector<2x64xf32>
    %1399 = arith.addf %1319, %1398 : vector<2x64xf32>
    %1400 = arith.negf %1399 : vector<2x64xf32>
    %1401 = math.exp %1400 : vector<2x64xf32>
    %cst_54 = arith.constant 1.000000e+00 : f32
    %1402 = vector.broadcast %cst_54 : f32 to vector<2x64xf32>
    %1403 = arith.addf %1402, %1401 : vector<2x64xf32>
    %1404 = arith.divf %1402, %1403 : vector<2x64xf32>
    %1405 = vector.extract_strided_slice %1404 {offsets = [0, 0], sizes = [2, 16], strides = [1, 1]} : vector<2x64xf32> to vector<2x16xf32>
    %1406 = vector.extract_strided_slice %1404 {offsets = [0, 16], sizes = [2, 16], strides = [1, 1]} : vector<2x64xf32> to vector<2x16xf32>
    %1407 = vector.extract_strided_slice %1404 {offsets = [0, 32], sizes = [2, 16], strides = [1, 1]} : vector<2x64xf32> to vector<2x16xf32>
    %cst_55 = arith.constant 2.000000e+00 : f32
    %1408 = vector.broadcast %cst_55 : f32 to vector<2x16xf32>
    %1409 = arith.mulf %1408, %1407 : vector<2x16xf32>
    %cst_56 = arith.constant 1.000000e+00 : f32
    %1410 = vector.broadcast %cst_56 : f32 to vector<2x16xf32>
    %1411 = arith.subf %1409, %1410 : vector<2x16xf32>
    %1412 = vector.extract_strided_slice %1404 {offsets = [0, 48], sizes = [2, 16], strides = [1, 1]} : vector<2x64xf32> to vector<2x16xf32>
    %1413 = arith.mulf %1406, %1316 : vector<2x16xf32>
    %1414 = arith.mulf %1405, %1411 : vector<2x16xf32>
    %1415 = arith.addf %1413, %1414 : vector<2x16xf32>
    %1416 = math.tanh %1415 : vector<2x16xf32>
    %1417 = arith.mulf %1412, %1416 : vector<2x16xf32>
    %c0_57 = arith.constant 0 : index
    %c0_58 = arith.constant 0 : index
    %1418 = vector.load %arg6[%c0_57, %c0_58] : memref<16x2xf32, #tpu.memory_space<vmem>>, vector<16x2xf32>
    %cst_59 = arith.constant dense<0.000000e+00> : vector<2x2xf32>
    %1419 = tpu.matmul %1417, %1418, %cst_59 {dimension_numbers = #tpu.dot_dimension_numbers<[1], [0], [0], [1], [0, 0, 1, 1], [], []>, precision = #tpu.contract_precision<fp32>} : vector<2x16xf32>, vector<16x2xf32>, vector<2x2xf32> -> vector<2x2xf32>
    %c0_60 = arith.constant 0 : index
    %c0_61 = arith.constant 0 : index
    %1420 = vector.load %arg7[%c0_60, %c0_61] : memref<1x2xf32, #tpu.memory_space<vmem>>, vector<1x2xf32>
    %1421 = vector.broadcast %1420 : vector<1x2xf32> to vector<2x2xf32>
    %1422 = arith.addf %1419, %1421 : vector<2x2xf32>
    %c0_62 = arith.constant 0 : index
    %c0_63 = arith.constant 0 : index
    %1423 = vector.load %arg8[%c0_62, %c0_63] : memref<2x2xf32, #tpu.memory_space<vmem>>, vector<2x2xf32>
    tpu.vector_store %arg8[%c0_62, %c0_63], %1422 {strides = array<i32>} : memref<2x2xf32, #tpu.memory_space<vmem>>, vector<2x2xf32>,
    return
  }
}

</mosaic_0001>

<bundles_post_ra>
// kernel: hybrid_forward.1
= control target key start
LH: loop header
LB: loop body
LE: loop exit
PB: predicated region body
PF: predicated region fallthrough
CT: control target
= control target key end

     0   :  { %vm56_vm0 = vcmask 1043456   ;;  %vm43_vm1 = vcmask 97280   ;;  %s4981_s0 = inlined_call_operand.vmem [shape: f32[28,12], index: 0, kind: input, shape index: {}]   ;;  %s4982_s1 = inlined_call_operand.vmem [shape: f32[12,8], index: 1, kind: input, shape index: {}]   ;;  %s4983_s2 = inlined_call_operand.vmem [shape: f32[1,8], index: 2, kind: input, shape index: {}]   ;;  %s4984_s3 = inlined_call_operand.vmem [shape: f32[8,64], index: 3, kind: input, shape index: {}]   ;;  %s4985_s4 = inlined_call_operand.vmem [shape: f32[16,64], index: 4, kind: input, shape index: {}]   ;;  %s4986_s5 = inlined_call_operand.vmem [shape: f32[1,64], index: 5, kind: input, shape index: {}]   ;;  %s4987_s6 = inlined_call_operand.vmem [shape: f32[16,2], index: 6, kind: input, shape index: {}]   ;;  %s4988_s7 = inlined_call_operand.vmem [shape: f32[1,2], index: 7, kind: input, shape index: {}]   ;;  %s4989_s8 = inlined_call_operand.hbm [shape: f32[2,2], index: 8, kind: output, shape index: {}]  }
   0x1   :  { %v34_v0 = vld [vmem:[%s4982_s1] sm:$0xff]  ;;  %v35_v1 = vld [vmem:[%s4982_s1 + $0x8] sm:$0xf]  ;;  %v32_v7 = vld [vmem:[%s4981_s0 + $0x10] sm:$0xff] }
   0x2   :  { %v30_v2 = vld [vmem:[%s4981_s0] sm:$0xff]  ;;  %v58_v3 = vsel %vm56_vm0, %v35_v1, 0  ;;  %v61_v4 = vand.u32 4294901760, %v34_v0  ;;  %v31_v6 = vld [vmem:[%s4981_s0 + $0x8] sm:$0xff]  ;;  %v51_v11 = vsel %vm43_vm1, %v32_v7, 0 }
   0x3   :  { %v45_v5 = vsel %vm43_vm1, %v30_v2, 0  ;;  %v64_v8 = vand.u32 4294901760, %v58_v3  ;;  %v48_v10 = vsel %vm43_vm1, %v31_v6, 0  ;;  %v33_v12 = vld [vmem:[%s4981_s0 + $0x18] sm:$0xf]  ;;  %v4326_v15 = vand.u32 4294901760, %v51_v11 }
   0x4   :  { %v4319_v9 = vand.u32 4294901760, %v45_v5  ;;  %v4324_v13 = vand.u32 4294901760, %v48_v10  ;;  %v169_v14 = vsub.f32 %v34_v0, %v61_v4  ;;  %v54_v16 = vsel %vm43_vm1, %v33_v12, 0 }
   0x5   :  { %v3791_v17 = vpack.c.bf16 %v64_v8, %v61_v4  ;;  %v176_v19 = vsub.f32 %v58_v3, %v64_v8  ;;  %v157_v20 = vand.u32 4294901760, %v54_v16 }
   0x6   :  { %v128_v18 = vsub.f32 %v45_v5, %v4319_v9 }
   0x7   :  { %13 = vsyncpa [#allocation3], 0  ;;  %v138_v21 = vsub.f32 %v48_v10, %v4324_v13  ;;  %v170_v22 = vand.u32 4294901760, %v169_v14  ;;  %v148_v23 = vsub.f32 %v51_v11, %v4326_v15  ;;  %3792 = vmatprep.subr.bf16.mxu0 %v3791_v17  ;;  %v177_v25 = vand.u32 4294901760, %v176_v19  ;;  %v652_v45 = vld [vmem:[%s4984_s3] sm:$0xff]  ;;  %s4239_s23 = smov 32  }
   0x8   :  { %v129_v24 = vand.u32 4294901760, %v128_v18  ;;  %v158_v26 = vsub.f32 %v54_v16, %v157_v20  ;;  %3794 = vmatpush3.bf16.msra.mxu0 %v3791_v17  ;;  %v3799_v42 = vpack.c.bf16 %v176_v19, %v169_v14  ;;  %v4343_v46 = vand.u32 4294901760, %v652_v45  ;;  %v3526_v51 = vld [vmem:[%s4983_s2] ss:$0 sm:$0xff]  ;;  %s4258_s30 = smov [#allocation2]  }
   0x9   :  { %v139_v27 = vand.u32 4294901760, %v138_v21  ;;  %v171_v28 = vsub.f32 %v169_v14, %v170_v22  ;;  %v149_v29 = vand.u32 4294901760, %v148_v23  ;;  %v178_v31 = vsub.f32 %v176_v19, %v177_v25  ;;  %s3518_s9 = sshll.u32 %s4258_s30, 4  ;;  %s3519_s9 = int_to_ptr.vmem [resolvable:$true] %s3518_s9 }
   0xa   :  { %v130_v30 = vsub.f32 %v128_v18, %v129_v24  ;;  %v159_v32 = vand.u32 4294901760, %v158_v26  ;;  %v3807_v44 = vpack.c.bf16 %v177_v25, %v170_v22  ;;  %v781_v47 = vsub.f32 %v652_v45, %v4343_v46  ;;  %s4211_s10 = scalar_lea.vmem %s3519_s9, 32  ;;  %p4216_p1 = scmp.lt.s32.totalorder %s3519_s9, %s3519_s9 }
   0xb   :  { %v140_v33 = vsub.f32 %v138_v21, %v139_v27  ;;  %v172_v34 = vand.u32 4294901760, %v171_v28  ;;  %v150_v35 = vsub.f32 %v148_v23, %v149_v29  ;;  %v179_v37 = vand.u32 4294901760, %v178_v31  ;;  %v1248_v28 = vld [vmem:[%s4985_s4] sm:$0xff]  ;;  %p4212_p0 = scmp.ne.s32.totalorder %s3519_s9, %s4211_s10  ;;  %p4217_p2 = scmp.lt.s32.totalorder %s4211_s10, %s4211_s10 }
   0xc   :  { %v131_v36 = vand.u32 4294901760, %v130_v30  ;;  %v160_v38 = vsub.f32 %v158_v26, %v159_v32  ;;  %v4348_v48 = vand.u32 4294901760, %v781_v47  ;;  %vm660_vm2 = vcmask 64512  }
   0xd   :  { %v141_v39 = vand.u32 4294901760, %v140_v33  ;;  %v151_v40 = vand.u32 4294901760, %v150_v35  ;;  %v3795_v41 = vpack.c.bf16 %v179_v37, %v172_v34  ;;  %v1249_v37 = vld [vmem:[%s4985_s4 + $0x8] sm:$0xff]  ;;  %s4235_s4 = smov 96   ;;  %vm4255_vm3 = vmmov 0   ;;  %p4218_p3 = por %p4217_p2, %p4216_p1 }
   0xe   :  { %3645 = vmatprep.mubr.f32.mxu0 %v131_v36  ;;  %v161_v43 = vand.u32 4294901760, %v160_v38  ;;  %v783_v49 = vsub.f32 %v781_v47, %v4348_v48  ;;  %vm3048_vm4 = vcmask 130048   ;;  %vm3510_vm5 = vcmask 9216  }
   0xf   :  { %3646 = vmatmul.mubr.f32.vlgmr.msra.gmra.mrb[0].mxu0 %v141_v39  ;;  %3796 = vmatprep.subr.bf16.mxu0 %v3795_v41  ;;  %p4219_p4 = pnand %p4218_p3, %p4212_p0 }
  0x10   :  { %3648 = vmatprep.mubr.f32.mxu0 %v151_v40  ;;  %3798 = vmatpush3.bf16.msra.mxu0 %v3795_v41  ;;  %v784_v50 = vand.u32 4294901760, %v783_v49 }
  0x11   :  { %3800 = vmatprep.subr.bf16.mxu0 %v3799_v42 }
  0x12   :  { %3833 = vmatprep.subr.mxu1 %v784_v50 }
  0x13   :  { %3649 = vmatmul.mubr.f32.gmra.mrb[2].mxu0 %v161_v43  ;;  %3834 = vmatpush3.msra.mxu1 %v784_v50 }
  0x14   :  { %3655 = vmatprep.mubr.f32.mxu0 %v4319_v9  ;;  %3717 = vmatprep.subr.mxu1 %v781_v47 }
  0x17   :  { %3656 = vmatmul.mubr.f32.vlgmr.msra.gmra.mrb[0].mxu0 %v4324_v13 }
  0x18   :  { %3802 = vmatpush3.bf16.msra.mxu0 %v3799_v42  ;;  %3658 = vmatprep.mubr.f32.mxu0 %v4326_v15  ;;  %v3527_v42 = vld [vmem:[%s4986_s5] ss:$0 sm:$0xff]  ;;  %s4236_s5 = smov 16  }
  0x19   :  { %3804 = vmatprep.subr.bf16.mxu0 %v3791_v17 }
  0x1b   :  { %3659 = vmatmul.mubr.f32.gmra.mrb[2].mxu0 %v157_v20 }
  0x1c   :  { %3665 = vmatprep.mubr.f32.mxu0 %v128_v18 }
  0x1f   :  { %3666 = vmatmul.mubr.f32.vlgmr.msra.gmra.mrb[0].mxu0 %v138_v21 }
  0x20   :  { %3806 = vmatpush3.bf16.msra.mxu0 %v3791_v17  ;;  %3668 = vmatprep.mubr.f32.mxu0 %v148_v23 }
  0x21   :  { %3808 = vmatprep.subr.bf16.mxu0 %v3807_v44 }
  0x23   :  { %3669 = vmatmul.mubr.f32.gmra.mrb[2].mxu0 %v158_v26 }
  0x24   :  { %3675 = vmatprep.mubr.f32.mxu0 %v129_v24  ;;  %v1250_v24 = vlaneseq }
  0x26   :  { %v1251_v25 = vshrl.u32 %v1250_v24, 7 }
  0x27   :  { %3676 = vmatmul.mubr.f32.vlgmr.msra.gmra.mrb[0].mxu0 %v139_v27 }
  0x28   :  { %3810 = vmatpush3.bf16.msra.mxu0 %v3807_v44  ;;  %3678 = vmatprep.mubr.f32.mxu0 %v149_v29  ;;  %v1252_v26 = vsub.s32 0, %v1251_v25  ;;  %v1257_v27 = vsub.s32 1, %v1251_v25  ;;  %v1262_v29 = vsub.s32 2, %v1251_v25  ;;  %v1267_v30 = vsub.s32 3, %v1251_v25 }
  0x29   :  { %3812 = vmatprep.subr.bf16.mxu0 %v3791_v17  ;;  %v1272_v31 = vsub.s32 4, %v1251_v25  ;;  %v1282_v35 = vsub.s32 6, %v1251_v25  ;;  %v1287_v36 = vsub.s32 7, %v1251_v25 }
  0x2a   :  { %v4367_v33 = vrot.slane %v1248_v28, %v1252_v26  ;;  %v4369_v34 = vrot.slane %v1248_v28, %v1257_v27  ;;  %v4374_v38 = vrot.slane %v1248_v28, %v1262_v29  ;;  %v4376_v39 = vrot.slane %v1248_v28, %v1267_v30 }
  0x2b   :  { %3679 = vmatmul.mubr.f32.gmra.mrb[2].mxu0 %v159_v32  ;;  %v1277_v32 = vsub.s32 5, %v1251_v25  ;;  %v4378_v40 = vrot.slane %v1248_v28, %v1272_v31  ;;  %v4387_v45 = vrot.slane %v1248_v28, %v1282_v35  ;;  %v4395_v49 = vrot.slane %v1249_v37, %v1262_v29 }
  0x2c   :  { %3685 = vmatprep.mubr.f32.mxu0 %v4319_v9  ;;  %v1254_v43 = vmul.f32 0.0, %v4367_v33  ;;  %v1259_v44 = vmul.f32 0.0, %v4369_v34 }
  0x2d   :  { %v4380_v41 = vrot.slane %v1248_v28, %v1277_v32 }
  0x2f   :  { %3686 = vmatmul.mubr.f32.vlgmr.msra.gmra.mrb[0].mxu0 %v4324_v13 }
  0x30   :  { %3814 = vmatpush3.bf16.msra.mxu0 %v3791_v17  ;;  %3688 = vmatprep.mubr.f32.mxu0 %v4326_v15 }
  0x31   :  { %3701 = vmatprep.subr.mxu0 %v4343_v46 }
  0x33   :  { %3689 = vmatmul.mubr.f32.gmra.mrb[2].mxu0 %v157_v20 }
  0x34   :  { %3695 = vmatprep.mubr.f32.mxu0 %v4319_v9 }
  0x37   :  { %3696 = vmatmul.mubr.f32.vlgmr.msra.gmra.mrb[0].mxu0 %v4324_v13 }
  0x38   :  { %3698 = vmatprep.mubr.f32.mxu0 %v4326_v15  ;;  %3702 = vmatpush3.msra.mxu0 %v4343_v46 }
  0x39   :  { %3709 = vmatprep.subr.mxu0 %v784_v50 }
  0x3b   :  { %3699 = vmatmul.mubr.f32.gmra.mrb[2].mxu0 %v157_v20 }
 0x10a   :  { %v3697_v52 = vpop.f32.mrb[0].mxu0 }
 0x10b   :  { %v3835_v53 = vadd.f32 %v3697_v52, %v3526_v51  ;;  %v626_v54 = vpop.f32.mrb[1].mxu0  ;;  %v4399_v52 = vrot.slane %v1249_v37, %v1272_v31 }
 0x10c   :  { %v3836_v55 = vadd.f32 %v3526_v51, %v626_v54  ;;  %v4403_v54 = vrot.slane %v1249_v37, %v1282_v35 }
 0x10d   :  { %v649_v56 = vmax.f32 %v3835_v53, 0.0  ;;  %v4401_v53 = vrot.slane %v1249_v37, %v1277_v32 }
 0x10e   :  { %v648_v57 = vmax.f32 %v3836_v55, 0.0  ;;  %v3700_v58 = vpop.f32.mrb[2].mxu0  ;;  %v4405_v55 = vrot.slane %v1249_v37, %v1287_v36 }
 0x10f   :  { %v665_v59 = vsel %vm660_vm2, %v649_v56, 0  ;;  %v3837_v60 = vadd.f32 %v3700_v58, %v3526_v51  ;;  %v638_v61 = vpop.f32.mrb[3].mxu0  ;;  %v1264_v58 = vmul.f32 0.0, %v4374_v38 }
 0x110   :  { %v749_v62 = vand.u32 4294901760, %v665_v59  ;;  %v662_v63 = vsel %vm660_vm2, %v648_v57, 0  ;;  %v3838_v0 = vadd.f32 %v3526_v51, %v638_v61 }
 0x111   :  { %v739_v1 = vand.u32 4294901760, %v662_v63  ;;  %v651_v2 = vmax.f32 %v3837_v60, 0.0  ;;  %v1274_v60 = vmul.f32 0.0, %v4378_v40 }
 0x112   :  { %v750_v3 = vsub.f32 %v665_v59, %v749_v62  ;;  %v650_v4 = vmax.f32 %v3838_v0, 0.0  ;;  %v1269_v59 = vmul.f32 0.0, %v4376_v39 }
 0x113   :  { %v671_v5 = vsel %vm660_vm2, %v651_v2, 0  ;;  %v740_v6 = vsub.f32 %v662_v63, %v739_v1  ;;  %v1284_v63 = vmul.f32 0.0, %v4387_v45 }
 0x114   :  { %v751_v7 = vand.u32 4294901760, %v750_v3  ;;  %v769_v8 = vand.u32 4294901760, %v671_v5  ;;  %v668_v9 = vsel %vm660_vm2, %v650_v4, 0 }
 0x115   :  { %v759_v10 = vand.u32 4294901760, %v668_v9  ;;  %v741_v11 = vand.u32 4294901760, %v740_v6 }
 0x116   :  { %v752_v12 = vsub.f32 %v750_v3, %v751_v7  ;;  %v770_v13 = vsub.f32 %v671_v5, %v769_v8 }
 0x117   :  { %3714 = vmatprep.mubr.f32.mxu1 %v759_v10  ;;  %v742_v14 = vsub.f32 %v740_v6, %v741_v11  ;;  %v760_v15 = vsub.f32 %v668_v9, %v759_v10  ;;  %v1329_v9 = vmul.f32 0.0, %v4405_v55 }
 0x118   :  { %3715 = vmatmul.mubr.f32.vlgmr.msra.gmra.mrb[0].mxu1 %v769_v8  ;;  %v771_v16 = vand.u32 4294901760, %v770_v13  ;;  %v753_v19 = vand.u32 4294901760, %v752_v12  ;;  %v1330_v12 = vadd.f32 %v1259_v44, %v1254_v43 }
 0x119   :  { %3719 = vmatprep.mubr.f32.mxu1 %v740_v6  ;;  %3718 = vmatpush3.msra.mxu1 %v781_v47  ;;  %v743_v17 = vand.u32 4294901760, %v742_v14  ;;  %v761_v18 = vand.u32 4294901760, %v760_v15  ;;  %v4391_v47 = vrot.slane %v1249_v37, %v1252_v26  ;;  %v1314_v6 = vmul.f32 0.0, %v4399_v52 }
 0x11a   :  { %3725 = vmatprep.subr.mxu1 %v4343_v46  ;;  %v772_v20 = vsub.f32 %v770_v13, %v771_v16 }
 0x11b   :  { %3703 = vmatprep.mubr.f32.mxu0 %v743_v17  ;;  %v762_v21 = vsub.f32 %v760_v15, %v761_v18 }
 0x11c   :  { %3704 = vmatmul.mubr.f32.vlgmr.msra.gmra.mrb[4].mxu0 %v753_v19  ;;  %3720 = vmatmul.mubr.f32.vlgmr.msra.gmra.mrb[2].mxu1 %v750_v3  ;;  %v773_v23 = vand.u32 4294901760, %v772_v20  ;;  %v1304_v3 = vmul.f32 0.0, %v4395_v49 }
 0x11d   :  { %3722 = vmatprep.mubr.f32.mxu1 %v760_v15  ;;  %3726 = vmatpush3.msra.mxu1 %v4343_v46  ;;  %v763_v22 = vand.u32 4294901760, %v762_v21 }
 0x11e   :  { %3710 = vmatpush3.msra.mxu0 %v784_v50  ;;  %3733 = vmatprep.subr.mxu1 %v4348_v48  ;;  %v4397_v50 = vrot.slane %v1249_v37, %v1267_v30 }
 0x11f   :  { %3706 = vmatprep.mubr.f32.mxu0 %v763_v22 }
 0x120   :  { %3707 = vmatmul.mubr.f32.gmra.mrb[6].mxu0 %v773_v23  ;;  %3723 = vmatmul.mubr.f32.gmra.mrb[0].mxu1 %v770_v13  ;;  %v1309_v4 = vmul.f32 0.0, %v4397_v50  ;;  %v1331_v13 = vadd.f32 %v1269_v59, %v1264_v58 }
 0x121   :  { %3711 = vmatprep.mubr.f32.mxu0 %v739_v1  ;;  %3727 = vmatprep.mubr.f32.mxu1 %v741_v11 }
 0x122   :  { %v1335_v17 = vadd.f32 %v1309_v4, %v1304_v3  ;;  %v1338_v20 = vadd.f32 %v1331_v13, %v1330_v12  ;;  %v5006_v12 = vmov 54   ;;  %v5004_v13 = vmov 56  }
 0x124   :  { %3712 = vmatmul.mubr.f32.vlgmr.msra.gmra.mrb[4].mxu0 %v749_v62  ;;  %3728 = vmatmul.mubr.f32.vlgmr.msra.gmra.mrb[2].mxu1 %v751_v7  ;;  %v1319_v7 = vmul.f32 0.0, %v4401_v53 }
 0x125   :  { %3730 = vmatprep.mubr.f32.mxu1 %v761_v18  ;;  %3734 = vmatpush3.msra.mxu1 %v4348_v48  ;;  %v4393_v48 = vrot.slane %v1249_v37, %v1257_v27 }
 0x126   :  { %3741 = vmatprep.subr.mxu1 %v4343_v46  ;;  %v1336_v18 = vadd.f32 %v1319_v7, %v1314_v6  ;;  %v5018_v6 = vmov 50   ;;  %v5016_v7 = vmov 55  }
 0x127   :  { %v1299_v2 = vmul.f32 0.0, %v4393_v48 }
 0x128   :  { %3731 = vmatmul.mubr.f32.gmra.mrb[0].mxu1 %v771_v16 }
 0x129   :  { %3735 = vmatprep.mubr.f32.mxu1 %v739_v1 }
 0x12c   :  { %3736 = vmatmul.mubr.f32.vlgmr.msra.gmra.mrb[2].mxu1 %v749_v62 }
 0x12d   :  { %3738 = vmatprep.mubr.f32.mxu1 %v759_v10  ;;  %3742 = vmatpush3.msra.mxu1 %v4343_v46  ;;  %v4389_v46 = vrot.slane %v1248_v28, %v1287_v36 }
 0x12f   :  { %v1289_v0 = vmul.f32 0.0, %v4389_v46 }
 0x130   :  { %3739 = vmatmul.mubr.f32.gmra.mrb[0].mxu1 %v769_v8 }
 0x131   :  { %3743 = vmatprep.mubr.f32.mxu1 %v739_v1  ;;  %v1294_v1 = vmul.f32 0.0, %v4391_v47  ;;  %v1333_v15 = vadd.f32 %v1289_v0, %v1284_v63 }
 0x133   :  { %v1334_v16 = vadd.f32 %v1299_v2, %v1294_v1  ;;  %v4990_v1 = vmov 48  }
 0x134   :  { %3744 = vmatmul.mubr.f32.vlgmr.msra.gmra.mrb[2].mxu1 %v749_v62  ;;  %v1279_v62 = vmul.f32 0.0, %v4380_v41  ;;  %3918 = vset.pattern.permute.xlu1 %v4990_v1 }
 0x135   :  { %3746 = vmatprep.mubr.f32.mxu1 %v759_v10  ;;  %v1340_v22 = vadd.f32 %v1335_v17, %v1334_v16  ;;  %v4996_v16 = vmov 60   ;;  %v4994_v17 = vmov 62  }
 0x136   :  { %v1332_v14 = vadd.f32 %v1279_v62, %v1274_v60 }
 0x138   :  { %3747 = vmatmul.mubr.f32.gmra.mrb[0].mxu1 %v769_v8  ;;  %v1324_v8 = vmul.f32 0.0, %v4403_v54  ;;  %v1339_v21 = vadd.f32 %v1333_v15, %v1332_v14  ;;  %v5000_v14 = vmov 57   ;;  %v4998_v15 = vmov 59  }
 0x13a   :  { %v1337_v19 = vadd.f32 %v1329_v9, %v1324_v8  ;;  %v1342_v24 = vadd.f32 %v1339_v21, %v1338_v20  ;;  %v5014_v8 = vmov 51   ;;  %v5012_v9 = vmov 58  }
 0x13c   :  { %v1341_v23 = vadd.f32 %v1337_v19, %v1336_v18  ;;  %v4992_v18 = vmov 63  }
 0x13e   :  { %v1343_v25 = vadd.f32 %v1341_v23, %v1340_v22 }
 0x140   :  { %v1344_v28 = vadd.f32 %v1343_v25, %v1342_v24 }
 0x1f3   :  { %v3708_v51 = vpop.f32.mrb[6].mxu0 }
 0x1f4   :  { %v776_v56 = vadd.f32 %v3708_v51, %v3527_v42  ;;  %v765_v57 = vpop.f32.mrb[7].mxu0 }
 0x1f5   :  { %v766_v61 = vadd.f32 %v3527_v42, %v765_v57 }
 0x1f7   :  { %v3713_v5 = vpop.f32.mrb[4].mxu0 }
 0x1f8   :  { %v3839_v10 = vadd.f32 %v3713_v5, %v3527_v42  ;;  %v851_v11 = vpop.f32.mrb[5].mxu0  ;;  %v5020_v5 = vmov 52  }
 0x1f9   :  { %v3841_v26 = vadd.f32 %v3527_v42, %v851_v11  ;;  %v5008_v11 = vmov 61  }
 0x207   :  { %v3745_v27 = vpop.f32.mrb[2].mxu1 }
 0x208   :  { %v4421_v29 = vadd.f32 %v3839_v10, %v3745_v27  ;;  %v1226_v30 = vpop.f32.mrb[3].mxu1  ;;  %v5010_v10 = vmov 53  }
 0x209   :  { %v4423_v31 = vadd.f32 %v3841_v26, %v1226_v30 }
 0x20b   :  { %v1345_v32 = vadd.f32 %v4423_v31, %v1344_v28  ;;  %v3748_v35 = vpop.f32.mrb[0].mxu1 }
 0x20c   :  { %v4426_v36 = vadd.f32 %v3748_v35, %v776_v56  ;;  %v1238_v37 = vpop.f32.mrb[1].mxu1 }
 0x20d   :  { %v3528_v43 = vmul.f32 -1.442695, %v1345_v32  ;;  %v4428_v44 = vadd.f32 %v1238_v37, %v766_v61  ;;  %v5002_v61 = vmov 49  }
 0x20e   :  { %5023 = vst [vmem:[#allocation5_spill] sm:$0xff] %v4426_v36  ;;  %3919 = vset.pattern.permute.xlu0 %v5002_v61 }
 0x20f   :  { %4127 = vpow2.f32 %v3528_v43 }
 0x219   :  { %v4128_v51 = vpop.eup %4127 }
 0x21a   :  { %v1349_v57 = vadd.f32 1.0, %v4128_v51 }
 0x21c   :  { %4129 = vrcp.f32 %v1349_v57 }
 0x226   :  { %v4130_v42 = vpop.eup %4129 }
 0x227   :  { %v1352_v58 = vmul.f32 2.0, %v4130_v42  ;;  %v1354_v56 = vmul.f32 0.0, %v4130_v42 }
 0x229   :  { %v3529_v59 = vadd.f32 -1.0, %v1352_v58 }
 0x22b   :  { %1356 = vrot.lane.b32.xlu0 %v3529_v59, %s4235_s4 }
 0x29d   :  { %v1357_v60 = vpop.permute.xlu0 %1356 }
 0x29e   :  { %v1359_v62 = vmul.f32 %v4130_v42, %v1357_v60 }
 0x2a0   :  { %1361 = vrot.lane.b32.xlu0 %v1359_v62, %s4236_s5 }
 0x312   :  { %v1362_v63 = vpop.permute.xlu0 %1361 }
 0x313   :  { %v4432_v0 = vadd.f32 %v1362_v63, %v1354_v56 }
 0x315   :  { %4131 = vtanh.f32 %v4432_v0 }
 0x31f   :  { %v4132_v2 = vpop.eup %4131 }
 0x320   :  { %1367 = vrot.lane.b32.xlu1 %v4132_v2, %s4239_s23 }
 0x392   :  { %v1368_v3 = vpop.permute.xlu1 %1367 }
 0x393   :  { %v1370_v4 = vmul.f32 %v4130_v42, %v1368_v3 }
 0x395   :  { %1378 = vperm.xlu0 %3919, %v1370_v4   ;;  %1373 = vperm.xlu1 %3918, %v1370_v4  }
 0x399   :  { %3922 = vset.pattern.permute.xlu0 %v5020_v5  ;;  %3920 = vset.pattern.permute.xlu1 %v5018_v6 }
 0x39a   :  { %1393 = vperm.xlu0 %3922, %v1370_v4   ;;  %1383 = vperm.xlu1 %3920, %v1370_v4  }
 0x39e   :  { %3925 = vset.pattern.permute.xlu0 %v5016_v7  ;;  %3921 = vset.pattern.permute.xlu1 %v5014_v8 }
 0x39f   :  { %1408 = vperm.xlu0 %3925, %v1370_v4   ;;  %1388 = vperm.xlu1 %3921, %v1370_v4  }
 0x3a3   :  { %3928 = vset.pattern.permute.xlu0 %v5012_v9  ;;  %3923 = vset.pattern.permute.xlu1 %v5010_v10 }
 0x3a4   :  { %1423 = vperm.xlu0 %3928, %v1370_v4   ;;  %1398 = vperm.xlu1 %3923, %v1370_v4  }
 0x3a8   :  { %3931 = vset.pattern.permute.xlu0 %v5008_v11  ;;  %3924 = vset.pattern.permute.xlu1 %v5006_v12 }
 0x3a9   :  { %1438 = vperm.xlu0 %3931, %v1370_v4   ;;  %1403 = vperm.xlu1 %3924, %v1370_v4  }
 0x3ad   :  { %3926 = vset.pattern.permute.xlu1 %v5004_v13  ;;  %3935 = vset.pattern.permute.xlu0 %v5002_v61 }
 0x3ae   :  { %1413 = vperm.xlu1 %3926, %v1370_v4  }
 0x3b2   :  { %3927 = vset.pattern.permute.xlu1 %v5000_v14 }
 0x3b3   :  { %1418 = vperm.xlu1 %3927, %v1370_v4  }
 0x3b7   :  { %3929 = vset.pattern.permute.xlu1 %v4998_v15 }
 0x3b8   :  { %1428 = vperm.xlu1 %3929, %v1370_v4  }
 0x3bc   :  { %3930 = vset.pattern.permute.xlu1 %v4996_v16 }
 0x3bd   :  { %1433 = vperm.xlu1 %3930, %v1370_v4  }
 0x3c1   :  { %3932 = vset.pattern.permute.xlu1 %v4994_v17 }
 0x3c2   :  { %1443 = vperm.xlu1 %3932, %v1370_v4  }
 0x3c6   :  { %3933 = vset.pattern.permute.xlu1 %v4992_v18 }
 0x3c7   :  { %1448 = vperm.xlu1 %3933, %v1370_v4  }
 0x3cb   :  { %3934 = vset.pattern.permute.xlu1 %v4990_v1 }
 0x414   :  { %v1374_v19 = vpop.permute.xlu1 %1373  ;;  %v1379_v24 = vpop.permute.xlu0 %1378 }
 0x415   :  { %v1381_v60 = vmul.f32 %v1379_v24, %v4369_v34  ;;  %v1376_v62 = vmul.f32 %v1374_v19, %v4367_v33 }
 0x419   :  { %v1384_v20 = vpop.permute.xlu1 %1383  ;;  %v1394_v26 = vpop.permute.xlu0 %1393 }
 0x41a   :  { %v1396_v56 = vmul.f32 %v1394_v26, %v4378_v40  ;;  %v1386_v63 = vmul.f32 %v1384_v20, %v4374_v38  ;;  %v1452_v20 = vadd.f32 %v1381_v60, %v1376_v62 }
 0x41e   :  { %v1389_v21 = vpop.permute.xlu1 %1388  ;;  %v1409_v28 = vpop.permute.xlu0 %1408 }
 0x41f   :  { %v1391_v51 = vmul.f32 %v1389_v21, %v4376_v39  ;;  %v1411_v42 = vmul.f32 %v1409_v28, %v4389_v46 }
 0x423   :  { %v1399_v22 = vpop.permute.xlu1 %1398  ;;  %v1424_v35 = vpop.permute.xlu0 %1423 }
 0x424   :  { %v1401_v57 = vmul.f32 %v1399_v22, %v4380_v41  ;;  %v1426_v2 = vmul.f32 %v1424_v35, %v4395_v49  ;;  %v1453_v22 = vadd.f32 %v1391_v51, %v1386_v63 }
 0x428   :  { %v1404_v23 = vpop.permute.xlu1 %1403  ;;  %v1439_v58 = vpop.permute.xlu0 %1438 }
 0x429   :  { %v1406_v37 = vmul.f32 %v1404_v23, %v4387_v45  ;;  %v1454_v23 = vadd.f32 %v1401_v57, %v1396_v56  ;;  %v1441_v28 = vmul.f32 %v1439_v58, %v4401_v53 }
 0x42b   :  { %v1455_v3 = vadd.f32 %v1411_v42, %v1406_v37 }
 0x42d   :  { %v1414_v25 = vpop.permute.xlu1 %1413  ;;  %v1461_v18 = vadd.f32 %v1455_v3, %v1454_v23 }
 0x42e   :  { %v1416_v24 = vmul.f32 %v1414_v25, %v4391_v47 }
 0x432   :  { %v1419_v27 = vpop.permute.xlu1 %1418 }
 0x433   :  { %v1421_v4 = vmul.f32 %v1419_v27, %v4393_v48  ;;  %v1460_v27 = vadd.f32 %v1453_v22, %v1452_v20 }
 0x435   :  { %v1456_v35 = vadd.f32 %v1421_v4, %v1416_v24  ;;  %v1464_v51 = vadd.f32 %v1461_v18, %v1460_v27  ;;  %v5026_v24 = vmov 48  }
 0x437   :  { %v1429_v30 = vpop.permute.xlu1 %1428 }
 0x438   :  { %v1431_v59 = vmul.f32 %v1429_v30, %v4397_v50 }
 0x43a   :  { %v1457_v1 = vadd.f32 %v1431_v59, %v1426_v2 }
 0x43c   :  { %v1434_v32 = vpop.permute.xlu1 %1433  ;;  %v1462_v17 = vadd.f32 %v1457_v1, %v1456_v35  ;;  %v1480_v1 = vrot.slane %v4432_v0, 6  ;;  %v5024_v0 = vmov 62  }
 0x43d   :  { %v1436_v21 = vmul.f32 %v1434_v32, %v4399_v52 }
 0x43f   :  { %v1458_v37 = vadd.f32 %v1441_v28, %v1436_v21 }
 0x441   :  { %v1444_v43 = vpop.permute.xlu1 %1443 }
 0x442   :  { %v1446_v19 = vmul.f32 %v1444_v43, %v4403_v54 }
 0x446   :  { %v1449_v30 = vpop.permute.xlu1 %1448 }
 0x447   :  { %v1451_v26 = vmul.f32 %v1449_v30, %v4405_v55  ;;  %v5025_v30 = vmov 63  }
 0x449   :  { %v1459_v42 = vadd.f32 %v1451_v26, %v1446_v19 }
 0x44b   :  { %v1463_v32 = vadd.f32 %v1459_v42, %v1458_v37 }
 0x44d   :  { %v1465_v57 = vadd.f32 %v1463_v32, %v1462_v17 }
 0x44f   :  { %v1466_v56 = vadd.f32 %v1465_v57, %v1464_v51 }
 0x451   :  { %v1468_v58 = vrot.slane %v1466_v56, 6 }
 0x453   :  { %v1470_v63 = vadd.f32 %v4423_v31, %v1468_v58 }
 0x455   :  { %v3530_v25 = vmul.f32 -1.442695, %v1470_v63 }
 0x457   :  { %4133 = vpow2.f32 %v3530_v25 }
 0x461   :  { %v4134_v59 = vpop.eup %4133 }
 0x462   :  { %v1474_v43 = vadd.f32 1.0, %v4134_v59 }
 0x464   :  { %4135 = vrcp.f32 %v1474_v43 }
 0x46e   :  { %v4136_v2 = vpop.eup %4135 }
 0x46f   :  { %v1477_v60 = vmul.f32 2.0, %v4136_v2  ;;  %v1482_v17 = vmul.f32 %v4136_v2, %v1480_v1 }
 0x471   :  { %v3531_v62 = vadd.f32 -1.0, %v1477_v60 }
 0x473   :  { %1484 = vrot.lane.b32.xlu0 %v3531_v62, %s4235_s4 }
 0x4e5   :  { %v1485_v3 = vpop.permute.xlu0 %1484 }
 0x4e6   :  { %v1487_v4 = vmul.f32 %v4136_v2, %v1485_v3 }
 0x4e8   :  { %1489 = vrot.lane.b32.xlu1 %v1487_v4, %s4236_s5 }
 0x55a   :  { %v1490_v18 = vpop.permute.xlu1 %1489 }
 0x55b   :  { %v4474_v21 = vadd.f32 %v1490_v18, %v1482_v17 }
 0x55d   :  { %4137 = vtanh.f32 %v4474_v21 }
 0x567   :  { %v4138_v22 = vpop.eup %4137 }
 0x568   :  { %1495 = vrot.lane.b32.xlu0 %v4138_v22, %s4239_s23 }
 0x5da   :  { %v1496_v23 = vpop.permute.xlu0 %1495 }
 0x5db   :  { %v1498_v28 = vmul.f32 %v4136_v2, %v1496_v23 }
 0x5dd   :  { %1506 = vperm.xlu0 %3935, %v1498_v28   ;;  %1501 = vperm.xlu1 %3934, %v1498_v28  }
 0x5e1   :  { %3938 = vset.pattern.permute.xlu0 %v5020_v5  ;;  %3936 = vset.pattern.permute.xlu1 %v5018_v6 }
 0x5e2   :  { %1521 = vperm.xlu0 %3938, %v1498_v28   ;;  %1511 = vperm.xlu1 %3936, %v1498_v28  }
 0x5e6   :  { %3941 = vset.pattern.permute.xlu0 %v5016_v7  ;;  %3937 = vset.pattern.permute.xlu1 %v5014_v8 }
 0x5e7   :  { %1536 = vperm.xlu0 %3941, %v1498_v28   ;;  %1516 = vperm.xlu1 %3937, %v1498_v28  }
 0x5eb   :  { %3944 = vset.pattern.permute.xlu0 %v5012_v9  ;;  %3939 = vset.pattern.permute.xlu1 %v5010_v10 }
 0x5ec   :  { %1551 = vperm.xlu0 %3944, %v1498_v28   ;;  %1526 = vperm.xlu1 %3939, %v1498_v28  }
 0x5f0   :  { %3947 = vset.pattern.permute.xlu0 %v5008_v11  ;;  %3940 = vset.pattern.permute.xlu1 %v5006_v12 }
 0x5f1   :  { %1566 = vperm.xlu0 %3947, %v1498_v28   ;;  %1531 = vperm.xlu1 %3940, %v1498_v28  }
 0x5f5   :  { %3942 = vset.pattern.permute.xlu1 %v5004_v13  ;;  %3951 = vset.pattern.permute.xlu0 %v5002_v61 }
 0x5f6   :  { %1541 = vperm.xlu1 %3942, %v1498_v28  }
 0x5fa   :  { %3943 = vset.pattern.permute.xlu1 %v5000_v14 }
 0x5fb   :  { %1546 = vperm.xlu1 %3943, %v1498_v28  }
 0x5ff   :  { %3945 = vset.pattern.permute.xlu1 %v4998_v15 }
 0x600   :  { %1556 = vperm.xlu1 %3945, %v1498_v28  }
 0x604   :  { %3946 = vset.pattern.permute.xlu1 %v4996_v16 }
 0x605   :  { %1561 = vperm.xlu1 %3946, %v1498_v28  }
 0x609   :  { %3948 = vset.pattern.permute.xlu1 %v5024_v0 }
 0x60a   :  { %1571 = vperm.xlu1 %3948, %v1498_v28  }
 0x60e   :  { %3949 = vset.pattern.permute.xlu1 %v5025_v30 }
 0x60f   :  { %1576 = vperm.xlu1 %3949, %v1498_v28  }
 0x613   :  { %3950 = vset.pattern.permute.xlu1 %v5026_v24 }
 0x65c   :  { %v1502_v19 = vpop.permute.xlu1 %1501  ;;  %v1507_v42 = vpop.permute.xlu0 %1506 }
 0x65d   :  { %v1509_v4 = vmul.f32 %v1507_v42, %v4369_v34  ;;  %v1504_v1 = vmul.f32 %v1502_v19, %v4367_v33 }
 0x661   :  { %v1512_v26 = vpop.permute.xlu1 %1511  ;;  %v1522_v32 = vpop.permute.xlu0 %1521 }
 0x662   :  { %v1524_v17 = vmul.f32 %v1522_v32, %v4378_v40  ;;  %v1514_v18 = vmul.f32 %v1512_v26, %v4374_v38  ;;  %v1580_v26 = vadd.f32 %v1509_v4, %v1504_v1 }
 0x666   :  { %v1517_v20 = vpop.permute.xlu1 %1516  ;;  %v1537_v57 = vpop.permute.xlu0 %1536 }
 0x667   :  { %v1519_v43 = vmul.f32 %v1517_v20, %v4376_v39  ;;  %v1539_v60 = vmul.f32 %v1537_v57, %v4389_v46 }
 0x66b   :  { %v1527_v35 = vpop.permute.xlu1 %1526  ;;  %v1552_v63 = vpop.permute.xlu0 %1551 }
 0x66c   :  { %v1529_v2 = vmul.f32 %v1527_v35, %v4380_v41  ;;  %v1554_v22 = vmul.f32 %v1552_v63, %v4395_v49  ;;  %v1581_v35 = vadd.f32 %v1519_v43, %v1514_v18 }
 0x670   :  { %v1532_v37 = vpop.permute.xlu1 %1531  ;;  %v1567_v62 = vpop.permute.xlu0 %1566 }
 0x671   :  { %v1534_v25 = vmul.f32 %v1532_v37, %v4387_v45  ;;  %v1582_v37 = vadd.f32 %v1529_v2, %v1524_v17  ;;  %v1569_v57 = vmul.f32 %v1567_v62, %v4401_v53 }
 0x673   :  { %v1583_v23 = vadd.f32 %v1539_v60, %v1534_v25 }
 0x675   :  { %v1542_v27 = vpop.permute.xlu1 %1541  ;;  %v1589_v15 = vadd.f32 %v1583_v23, %v1582_v37 }
 0x676   :  { %v1544_v42 = vmul.f32 %v1542_v27, %v4391_v47 }
 0x67a   :  { %v1547_v51 = vpop.permute.xlu1 %1546 }
 0x67b   :  { %v1549_v28 = vmul.f32 %v1547_v51, %v4393_v48  ;;  %v1588_v51 = vadd.f32 %v1581_v35, %v1580_v26 }
 0x67d   :  { %v1584_v63 = vadd.f32 %v1549_v28, %v1544_v42  ;;  %v1592_v43 = vadd.f32 %v1589_v15, %v1588_v51  ;;  %v5029_v42 = vmov 60  }
 0x67f   :  { %v1557_v56 = vpop.permute.xlu1 %1556 }
 0x680   :  { %v1559_v3 = vmul.f32 %v1557_v56, %v4397_v50 }
 0x682   :  { %v1585_v16 = vadd.f32 %v1559_v3, %v1554_v22 }
 0x684   :  { %v1562_v58 = vpop.permute.xlu1 %1561  ;;  %v1590_v14 = vadd.f32 %v1585_v16, %v1584_v63 }
 0x685   :  { %v1564_v20 = vmul.f32 %v1562_v58, %v4399_v52 }
 0x687   :  { %v1586_v25 = vadd.f32 %v1569_v57, %v1564_v20 }
 0x689   :  { %v1572_v59 = vpop.permute.xlu1 %1571 }
 0x68a   :  { %v1574_v19 = vmul.f32 %v1572_v59, %v4403_v54 }
 0x68e   :  { %v1577_v56 = vpop.permute.xlu1 %1576 }
 0x68f   :  { %v1579_v32 = vmul.f32 %v1577_v56, %v4405_v55  ;;  %v5028_v56 = vmov 59  }
 0x691   :  { %v1587_v60 = vadd.f32 %v1579_v32, %v1574_v19 }
 0x693   :  { %v1591_v58 = vadd.f32 %v1587_v60, %v1586_v25 }
 0x695   :  { %v1593_v2 = vadd.f32 %v1591_v58, %v1590_v14  ;;  %v1608_v14 = vrot.slane %v4474_v21, 6  ;;  %v5027_v21 = vmov 57  }
 0x697   :  { %v1594_v17 = vadd.f32 %v1593_v2, %v1592_v43 }
 0x699   :  { %v1596_v62 = vrot.slane %v1594_v17, 6 }
 0x69b   :  { %v1598_v18 = vadd.f32 %v4423_v31, %v1596_v62 }
 0x69d   :  { %v3532_v27 = vmul.f32 -1.442695, %v1598_v18 }
 0x69f   :  { %4139 = vpow2.f32 %v3532_v27 }
 0x6a9   :  { %v4140_v3 = vpop.eup %4139 }
 0x6aa   :  { %v1602_v59 = vadd.f32 1.0, %v4140_v3 }
 0x6ac   :  { %4141 = vrcp.f32 %v1602_v59 }
 0x6b6   :  { %v4142_v22 = vpop.eup %4141 }
 0x6b7   :  { %v1605_v4 = vmul.f32 2.0, %v4142_v22  ;;  %v1610_v15 = vmul.f32 %v4142_v22, %v1608_v14 }
 0x6b9   :  { %v3533_v1 = vadd.f32 -1.0, %v1605_v4 }
 0x6bb   :  { %1612 = vrot.lane.b32.xlu0 %v3533_v1, %s4235_s4 }
 0x72d   :  { %v1613_v23 = vpop.permute.xlu0 %1612 }
 0x72e   :  { %v1615_v28 = vmul.f32 %v4142_v22, %v1613_v23 }
 0x730   :  { %1617 = vrot.lane.b32.xlu1 %v1615_v28, %s4236_s5 }
 0x7a2   :  { %v1618_v16 = vpop.permute.xlu1 %1617 }
 0x7a3   :  { %v4514_v20 = vadd.f32 %v1618_v16, %v1610_v15 }
 0x7a5   :  { %4143 = vtanh.f32 %v4514_v20 }
 0x7af   :  { %v4144_v35 = vpop.eup %4143 }
 0x7b0   :  { %1623 = vrot.lane.b32.xlu0 %v4144_v35, %s4239_s23 }
 0x822   :  { %v1624_v37 = vpop.permute.xlu0 %1623 }
 0x823   :  { %v1626_v57 = vmul.f32 %v4142_v22, %v1624_v37 }
 0x825   :  { %1634 = vperm.xlu0 %3951, %v1626_v57   ;;  %1629 = vperm.xlu1 %3950, %v1626_v57  }
 0x829   :  { %3954 = vset.pattern.permute.xlu0 %v5020_v5  ;;  %3952 = vset.pattern.permute.xlu1 %v5018_v6 }
 0x82a   :  { %1649 = vperm.xlu0 %3954, %v1626_v57   ;;  %1639 = vperm.xlu1 %3952, %v1626_v57  }
 0x82e   :  { %3957 = vset.pattern.permute.xlu0 %v5016_v7  ;;  %3953 = vset.pattern.permute.xlu1 %v5014_v8 }
 0x82f   :  { %1664 = vperm.xlu0 %3957, %v1626_v57   ;;  %1644 = vperm.xlu1 %3953, %v1626_v57  }
 0x833   :  { %3960 = vset.pattern.permute.xlu0 %v5012_v9  ;;  %3955 = vset.pattern.permute.xlu1 %v5010_v10 }
 0x834   :  { %1679 = vperm.xlu0 %3960, %v1626_v57   ;;  %1654 = vperm.xlu1 %3955, %v1626_v57  }
 0x838   :  { %3963 = vset.pattern.permute.xlu0 %v5008_v11  ;;  %3956 = vset.pattern.permute.xlu1 %v5006_v12 }
 0x839   :  { %1694 = vperm.xlu0 %3963, %v1626_v57   ;;  %1659 = vperm.xlu1 %3956, %v1626_v57  }
 0x83d   :  { %3958 = vset.pattern.permute.xlu1 %v5004_v13  ;;  %3967 = vset.pattern.permute.xlu0 %v5002_v61 }
 0x83e   :  { %1669 = vperm.xlu1 %3958, %v1626_v57  }
 0x842   :  { %3959 = vset.pattern.permute.xlu1 %v5027_v21 }
 0x843   :  { %1674 = vperm.xlu1 %3959, %v1626_v57  }
 0x847   :  { %3961 = vset.pattern.permute.xlu1 %v5028_v56 }
 0x848   :  { %1684 = vperm.xlu1 %3961, %v1626_v57  }
 0x84c   :  { %3962 = vset.pattern.permute.xlu1 %v5029_v42 }
 0x84d   :  { %1689 = vperm.xlu1 %3962, %v1626_v57  }
 0x851   :  { %3964 = vset.pattern.permute.xlu1 %v5024_v0 }
 0x852   :  { %1699 = vperm.xlu1 %3964, %v1626_v57  }
 0x856   :  { %3965 = vset.pattern.permute.xlu1 %v5025_v30 }
 0x857   :  { %1704 = vperm.xlu1 %3965, %v1626_v57  }
 0x85b   :  { %3966 = vset.pattern.permute.xlu1 %v5026_v24 }
 0x8a4   :  { %v1630_v19 = vpop.permute.xlu1 %1629  ;;  %v1635_v60 = vpop.permute.xlu0 %1634 }
 0x8a5   :  { %v1637_v28 = vmul.f32 %v1635_v60, %v4369_v34  ;;  %v1632_v14 = vmul.f32 %v1630_v19, %v4367_v33 }
 0x8a9   :  { %v1640_v32 = vpop.permute.xlu1 %1639  ;;  %v1650_v58 = vpop.permute.xlu0 %1649 }
 0x8aa   :  { %v1652_v15 = vmul.f32 %v1650_v58, %v4378_v40  ;;  %v1642_v16 = vmul.f32 %v1640_v32, %v4374_v38  ;;  %v1708_v32 = vadd.f32 %v1637_v28, %v1632_v14 }
 0x8ae   :  { %v1645_v26 = vpop.permute.xlu1 %1644  ;;  %v1665_v2 = vpop.permute.xlu0 %1664 }
 0x8af   :  { %v1647_v59 = vmul.f32 %v1645_v26, %v4376_v39  ;;  %v1667_v4 = vmul.f32 %v1665_v2, %v4389_v46 }
 0x8b3   :  { %v1655_v63 = vpop.permute.xlu1 %1654  ;;  %v1680_v18 = vpop.permute.xlu0 %1679 }
 0x8b4   :  { %v1657_v22 = vmul.f32 %v1655_v63, %v4380_v41  ;;  %v1682_v35 = vmul.f32 %v1680_v18, %v4395_v49  ;;  %v1709_v63 = vadd.f32 %v1647_v59, %v1642_v16 }
 0x8b8   :  { %v1660_v25 = vpop.permute.xlu1 %1659  ;;  %v1695_v1 = vpop.permute.xlu0 %1694 }
 0x8b9   :  { %v1662_v27 = vmul.f32 %v1660_v25, %v4387_v45  ;;  %v1710_v25 = vadd.f32 %v1657_v22, %v1652_v15  ;;  %v1697_v2 = vmul.f32 %v1695_v1, %v4401_v53 }
 0x8bb   :  { %v1711_v37 = vadd.f32 %v1667_v4, %v1662_v27 }
 0x8bd   :  { %v1670_v51 = vpop.permute.xlu1 %1669  ;;  %v1717_v13 = vadd.f32 %v1711_v37, %v1710_v25 }
 0x8be   :  { %v1672_v60 = vmul.f32 %v1670_v51, %v4391_v47 }
 0x8c2   :  { %v1675_v43 = vpop.permute.xlu1 %1674 }
 0x8c3   :  { %v1677_v57 = vmul.f32 %v1675_v43, %v4393_v48  ;;  %v1716_v43 = vadd.f32 %v1709_v63, %v1708_v32 }
 0x8c5   :  { %v1712_v18 = vadd.f32 %v1677_v57, %v1672_v60  ;;  %v1720_v59 = vadd.f32 %v1717_v13, %v1716_v43 }
 0x8c7   :  { %v1685_v17 = vpop.permute.xlu1 %1684 }
 0x8c8   :  { %v1687_v23 = vmul.f32 %v1685_v17, %v4397_v50 }
 0x8ca   :  { %v1713_v61 = vadd.f32 %v1687_v23, %v1682_v35 }
 0x8cc   :  { %v1690_v62 = vpop.permute.xlu1 %1689  ;;  %v1718_v12 = vadd.f32 %v1713_v61, %v1712_v18  ;;  %v1736_v61 = vrot.slane %v4514_v20, 6  ;;  %v5030_v20 = vmov 54  }
 0x8cd   :  { %v1692_v26 = vmul.f32 %v1690_v62, %v4399_v52 }
 0x8cf   :  { %v1714_v27 = vadd.f32 %v1697_v2, %v1692_v26  ;;  %v5031_v2 = vmov 56  }
 0x8d1   :  { %v1700_v3 = vpop.permute.xlu1 %1699 }
 0x8d2   :  { %v1702_v19 = vmul.f32 %v1700_v3, %v4403_v54 }
 0x8d6   :  { %v1705_v17 = vpop.permute.xlu1 %1704 }
 0x8d7   :  { %v1707_v58 = vmul.f32 %v1705_v17, %v4405_v55  ;;  %v5032_v17 = vmov 49  }
 0x8d9   :  { %v1715_v4 = vadd.f32 %v1707_v58, %v1702_v19 }
 0x8db   :  { %v1719_v62 = vadd.f32 %v1715_v4, %v1714_v27 }
 0x8dd   :  { %v1721_v22 = vadd.f32 %v1719_v62, %v1718_v12 }
 0x8df   :  { %v1722_v15 = vadd.f32 %v1721_v22, %v1720_v59 }
 0x8e1   :  { %v1724_v1 = vrot.slane %v1722_v15, 6 }
 0x8e3   :  { %v1726_v16 = vadd.f32 %v4423_v31, %v1724_v1 }
 0x8e5   :  { %v3534_v51 = vmul.f32 -1.442695, %v1726_v16 }
 0x8e7   :  { %4145 = vpow2.f32 %v3534_v51 }
 0x8f1   :  { %v4146_v23 = vpop.eup %4145 }
 0x8f2   :  { %v1730_v3 = vadd.f32 1.0, %v4146_v23 }
 0x8f4   :  { %4147 = vrcp.f32 %v1730_v3 }
 0x8fe   :  { %v4148_v35 = vpop.eup %4147 }
 0x8ff   :  { %v1733_v28 = vmul.f32 2.0, %v4148_v35  ;;  %v1738_v12 = vmul.f32 %v4148_v35, %v1736_v61 }
 0x901   :  { %v3535_v14 = vadd.f32 -1.0, %v1733_v28 }
 0x903   :  { %1740 = vrot.lane.b32.xlu0 %v3535_v14, %s4235_s4 }
 0x975   :  { %v1741_v37 = vpop.permute.xlu0 %1740 }
 0x976   :  { %v1743_v57 = vmul.f32 %v4148_v35, %v1741_v37 }
 0x978   :  { %1745 = vrot.lane.b32.xlu1 %v1743_v57, %s4236_s5 }
 0x9ea   :  { %v1746_v13 = vpop.permute.xlu1 %1745 }
 0x9eb   :  { %v4554_v26 = vadd.f32 %v1746_v13, %v1738_v12 }
 0x9ed   :  { %4149 = vtanh.f32 %v4554_v26 }
 0x9f7   :  { %v4150_v31 = vpop.eup %4149 }
 0x9f8   :  { %1751 = vrot.lane.b32.xlu0 %v4150_v31, %s4239_s23 }
 0xa6a   :  { %v1752_v63 = vpop.permute.xlu0 %1751 }
 0xa6b   :  { %v1754_v25 = vmul.f32 %v4148_v35, %v1752_v63 }
 0xa6d   :  { %1762 = vperm.xlu0 %3967, %v1754_v25   ;;  %1757 = vperm.xlu1 %3966, %v1754_v25  }
 0xa71   :  { %3970 = vset.pattern.permute.xlu0 %v5020_v5  ;;  %3968 = vset.pattern.permute.xlu1 %v5018_v6 }
 0xa72   :  { %1777 = vperm.xlu0 %3970, %v1754_v25   ;;  %1767 = vperm.xlu1 %3968, %v1754_v25  }
 0xa76   :  { %3973 = vset.pattern.permute.xlu0 %v5016_v7  ;;  %3969 = vset.pattern.permute.xlu1 %v5014_v8 }
 0xa77   :  { %1792 = vperm.xlu0 %3973, %v1754_v25   ;;  %1772 = vperm.xlu1 %3969, %v1754_v25  }
 0xa7b   :  { %3976 = vset.pattern.permute.xlu0 %v5012_v9  ;;  %3971 = vset.pattern.permute.xlu1 %v5010_v10 }
 0xa7c   :  { %1807 = vperm.xlu0 %3976, %v1754_v25   ;;  %1782 = vperm.xlu1 %3971, %v1754_v25  }
 0xa80   :  { %3979 = vset.pattern.permute.xlu0 %v5008_v11  ;;  %3972 = vset.pattern.permute.xlu1 %v5030_v20 }
 0xa81   :  { %1822 = vperm.xlu0 %3979, %v1754_v25   ;;  %1787 = vperm.xlu1 %3972, %v1754_v25  }
 0xa85   :  { %3974 = vset.pattern.permute.xlu1 %v5031_v2  ;;  %3983 = vset.pattern.permute.xlu0 %v5032_v17 }
 0xa86   :  { %1797 = vperm.xlu1 %3974, %v1754_v25  }
 0xa8a   :  { %3975 = vset.pattern.permute.xlu1 %v5027_v21 }
 0xa8b   :  { %1802 = vperm.xlu1 %3975, %v1754_v25  }
 0xa8f   :  { %3977 = vset.pattern.permute.xlu1 %v5028_v56 }
 0xa90   :  { %1812 = vperm.xlu1 %3977, %v1754_v25  }
 0xa94   :  { %3978 = vset.pattern.permute.xlu1 %v5029_v42 }
 0xa95   :  { %1817 = vperm.xlu1 %3978, %v1754_v25  }
 0xa99   :  { %3980 = vset.pattern.permute.xlu1 %v5024_v0 }
 0xa9a   :  { %1827 = vperm.xlu1 %3980, %v1754_v25  }
 0xa9e   :  { %3981 = vset.pattern.permute.xlu1 %v5025_v30 }
 0xa9f   :  { %1832 = vperm.xlu1 %3981, %v1754_v25  }
 0xaa3   :  { %3982 = vset.pattern.permute.xlu1 %v5026_v24 }
 0xaec   :  { %v1758_v60 = vpop.permute.xlu1 %1757  ;;  %v1763_v27 = vpop.permute.xlu0 %1762 }
 0xaed   :  { %v1765_v37 = vmul.f32 %v1763_v27, %v4369_v34  ;;  %v1760_v57 = vmul.f32 %v1758_v60, %v4367_v33 }
 0xaf1   :  { %v1768_v19 = vpop.permute.xlu1 %1767  ;;  %v1778_v43 = vpop.permute.xlu0 %1777 }
 0xaf2   :  { %v1780_v61 = vmul.f32 %v1778_v43, %v4378_v40  ;;  %v1770_v12 = vmul.f32 %v1768_v19, %v4374_v38  ;;  %v1836_v19 = vadd.f32 %v1765_v37, %v1760_v57 }
 0xaf6   :  { %v1773_v58 = vpop.permute.xlu1 %1772  ;;  %v1793_v59 = vpop.permute.xlu0 %1792 }
 0xaf7   :  { %v1775_v23 = vmul.f32 %v1773_v58, %v4376_v39  ;;  %v1795_v35 = vmul.f32 %v1793_v59, %v4389_v46 }
 0xaf9   :  { %v1837_v58 = vadd.f32 %v1775_v23, %v1770_v12 }
 0xafb   :  { %v1783_v32 = vpop.permute.xlu1 %1782  ;;  %v1808_v1 = vpop.permute.xlu0 %1807 }
 0xafc   :  { %v1785_v3 = vmul.f32 %v1783_v32, %v4380_v41  ;;  %v1810_v13 = vmul.f32 %v1808_v1, %v4395_v49 }
 0xafe   :  { %v1838_v32 = vadd.f32 %v1785_v3, %v1780_v61 }
 0xb00   :  { %v1788_v18 = vpop.permute.xlu1 %1787  ;;  %v1823_v28 = vpop.permute.xlu0 %1822 }
 0xb01   :  { %v1790_v16 = vmul.f32 %v1788_v18, %v4387_v45  ;;  %v1825_v18 = vmul.f32 %v1823_v28, %v4401_v53 }
 0xb03   :  { %v1839_v31 = vadd.f32 %v1795_v35, %v1790_v16 }
 0xb05   :  { %v1798_v4 = vpop.permute.xlu1 %1797  ;;  %v1845_v11 = vadd.f32 %v1839_v31, %v1838_v32 }
 0xb06   :  { %v1800_v27 = vmul.f32 %v1798_v4, %v4391_v47 }
 0xb0a   :  { %v1803_v62 = vpop.permute.xlu1 %1802 }
 0xb0b   :  { %v1805_v63 = vmul.f32 %v1803_v62, %v4393_v48  ;;  %v1844_v62 = vadd.f32 %v1837_v58, %v1836_v19 }
 0xb0d   :  { %v1840_v1 = vadd.f32 %v1805_v63, %v1800_v27  ;;  %v1848_v23 = vadd.f32 %v1845_v11, %v1844_v62  ;;  %v5034_v27 = vmov 61  }
 0xb0f   :  { %v1813_v22 = vpop.permute.xlu1 %1812 }
 0xb10   :  { %v1815_v14 = vmul.f32 %v1813_v22, %v4397_v50 }
 0xb12   :  { %v1841_v22 = vadd.f32 %v1815_v14, %v1810_v13 }
 0xb14   :  { %v1818_v15 = vpop.permute.xlu1 %1817  ;;  %v1846_v10 = vadd.f32 %v1841_v22, %v1840_v1 }
 0xb15   :  { %v1820_v25 = vmul.f32 %v1818_v15, %v4399_v52 }
 0xb17   :  { %v1842_v16 = vadd.f32 %v1825_v18, %v1820_v25 }
 0xb19   :  { %v1828_v51 = vpop.permute.xlu1 %1827 }
 0xb1a   :  { %v1830_v60 = vmul.f32 %v1828_v51, %v4403_v54 }
 0xb1e   :  { %v1833_v59 = vpop.permute.xlu1 %1832 }
 0xb1f   :  { %v1835_v43 = vmul.f32 %v1833_v59, %v4405_v55 }
 0xb21   :  { %v1843_v35 = vadd.f32 %v1835_v43, %v1830_v60 }
 0xb23   :  { %v1847_v15 = vadd.f32 %v1843_v35, %v1842_v16 }
 0xb25   :  { %v1849_v3 = vadd.f32 %v1847_v15, %v1846_v10  ;;  %v1864_v10 = vrot.slane %v4554_v26, 6  ;;  %v5033_v26 = vmov 53  }
 0xb27   :  { %v1850_v61 = vadd.f32 %v1849_v3, %v1848_v23 }
 0xb29   :  { %v1852_v28 = vrot.slane %v1850_v61, 6 }
 0xb2b   :  { %v1854_v12 = vadd.f32 %v4421_v29, %v1852_v28 }
 0xb2d   :  { %v3536_v4 = vmul.f32 -1.442695, %v1854_v12 }
 0xb2f   :  { %4151 = vpow2.f32 %v3536_v4 }
 0xb39   :  { %v4152_v14 = vpop.eup %4151 }
 0xb3a   :  { %v1858_v51 = vadd.f32 1.0, %v4152_v14 }
 0xb3c   :  { %4153 = vrcp.f32 %v1858_v51 }
 0xb46   :  { %v4154_v13 = vpop.eup %4153 }
 0xb47   :  { %v1861_v37 = vmul.f32 2.0, %v4154_v13  ;;  %v1866_v11 = vmul.f32 %v4154_v13, %v1864_v10 }
 0xb49   :  { %v3537_v57 = vadd.f32 -1.0, %v1861_v37 }
 0xb4b   :  { %1868 = vrot.lane.b32.xlu0 %v3537_v57, %s4235_s4 }
 0xbbd   :  { %v1869_v31 = vpop.permute.xlu0 %1868 }
 0xbbe   :  { %v1871_v63 = vmul.f32 %v4154_v13, %v1869_v31 }
 0xbc0   :  { %1873 = vrot.lane.b32.xlu1 %v1871_v63, %s4236_s5 }
 0xc32   :  { %v1874_v25 = vpop.permute.xlu1 %1873 }
 0xc33   :  { %v4594_v58 = vadd.f32 %v1874_v25, %v1866_v11 }
 0xc35   :  { %4155 = vtanh.f32 %v4594_v58 }
 0xc3f   :  { %v4156_v32 = vpop.eup %4155 }
 0xc40   :  { %1879 = vrot.lane.b32.xlu0 %v4156_v32, %s4239_s23 }
 0xcb2   :  { %v1880_v18 = vpop.permute.xlu0 %1879 }
 0xcb3   :  { %v1882_v59 = vmul.f32 %v4154_v13, %v1880_v18 }
 0xcb5   :  { %1890 = vperm.xlu0 %3983, %v1882_v59   ;;  %1885 = vperm.xlu1 %3982, %v1882_v59  }
 0xcb9   :  { %3986 = vset.pattern.permute.xlu0 %v5020_v5  ;;  %3984 = vset.pattern.permute.xlu1 %v5018_v6 }
 0xcba   :  { %1905 = vperm.xlu0 %3986, %v1882_v59   ;;  %1895 = vperm.xlu1 %3984, %v1882_v59  }
 0xcbe   :  { %3989 = vset.pattern.permute.xlu0 %v5016_v7  ;;  %3985 = vset.pattern.permute.xlu1 %v5014_v8 }
 0xcbf   :  { %1920 = vperm.xlu0 %3989, %v1882_v59   ;;  %1900 = vperm.xlu1 %3985, %v1882_v59  }
 0xcc3   :  { %3992 = vset.pattern.permute.xlu0 %v5012_v9  ;;  %3987 = vset.pattern.permute.xlu1 %v5033_v26 }
 0xcc4   :  { %1935 = vperm.xlu0 %3992, %v1882_v59   ;;  %1910 = vperm.xlu1 %3987, %v1882_v59  }
 0xcc8   :  { %3995 = vset.pattern.permute.xlu0 %v5034_v27  ;;  %3988 = vset.pattern.permute.xlu1 %v5030_v20 }
 0xcc9   :  { %1950 = vperm.xlu0 %3995, %v1882_v59   ;;  %1915 = vperm.xlu1 %3988, %v1882_v59  }
 0xccd   :  { %3990 = vset.pattern.permute.xlu1 %v5031_v2  ;;  %3999 = vset.pattern.permute.xlu0 %v5032_v17 }
 0xcce   :  { %1925 = vperm.xlu1 %3990, %v1882_v59  }
 0xcd2   :  { %3991 = vset.pattern.permute.xlu1 %v5027_v21 }
 0xcd3   :  { %1930 = vperm.xlu1 %3991, %v1882_v59  }
 0xcd7   :  { %3993 = vset.pattern.permute.xlu1 %v5028_v56 }
 0xcd8   :  { %1940 = vperm.xlu1 %3993, %v1882_v59  }
 0xcdc   :  { %3994 = vset.pattern.permute.xlu1 %v5029_v42 }
 0xcdd   :  { %1945 = vperm.xlu1 %3994, %v1882_v59  }
 0xce1   :  { %3996 = vset.pattern.permute.xlu1 %v5024_v0 }
 0xce2   :  { %1955 = vperm.xlu1 %3996, %v1882_v59  }
 0xce6   :  { %3997 = vset.pattern.permute.xlu1 %v5025_v30 }
 0xce7   :  { %1960 = vperm.xlu1 %3997, %v1882_v59  }
 0xceb   :  { %3998 = vset.pattern.permute.xlu1 %v5026_v24 }
 0xd34   :  { %v1886_v22 = vpop.permute.xlu1 %1885  ;;  %v1891_v16 = vpop.permute.xlu0 %1890 }
 0xd35   :  { %v1893_v31 = vmul.f32 %v1891_v16, %v4369_v34  ;;  %v1888_v63 = vmul.f32 %v1886_v22, %v4367_v33 }
 0xd39   :  { %v1896_v60 = vpop.permute.xlu1 %1895  ;;  %v1906_v62 = vpop.permute.xlu0 %1905 }
 0xd3a   :  { %v1908_v10 = vmul.f32 %v1906_v62, %v4378_v40  ;;  %v1898_v11 = vmul.f32 %v1896_v60, %v4374_v38  ;;  %v1964_v60 = vadd.f32 %v1893_v31, %v1888_v63 }
 0xd3e   :  { %v1901_v43 = vpop.permute.xlu1 %1900  ;;  %v1921_v23 = vpop.permute.xlu0 %1920 }
 0xd3f   :  { %v1903_v14 = vmul.f32 %v1901_v43, %v4376_v39  ;;  %v1923_v13 = vmul.f32 %v1921_v23, %v4389_v46 }
 0xd41   :  { %v1965_v43 = vadd.f32 %v1903_v14, %v1898_v11 }
 0xd43   :  { %v1911_v19 = vpop.permute.xlu1 %1910  ;;  %v1936_v28 = vpop.permute.xlu0 %1935 }
 0xd44   :  { %v1913_v51 = vmul.f32 %v1911_v19, %v4380_v41  ;;  %v1938_v25 = vmul.f32 %v1936_v28, %v4395_v49 }
 0xd46   :  { %v1966_v19 = vadd.f32 %v1913_v51, %v1908_v10 }
 0xd48   :  { %v1916_v1 = vpop.permute.xlu1 %1915  ;;  %v1951_v37 = vpop.permute.xlu0 %1950 }
 0xd49   :  { %v1918_v12 = vmul.f32 %v1916_v1, %v4387_v45  ;;  %v1953_v1 = vmul.f32 %v1951_v37, %v4401_v53 }
 0xd4b   :  { %v1967_v32 = vadd.f32 %v1923_v13, %v1918_v12 }
 0xd4d   :  { %v1926_v35 = vpop.permute.xlu1 %1925  ;;  %v1973_v9 = vadd.f32 %v1967_v32, %v1966_v19 }
 0xd4e   :  { %v1928_v16 = vmul.f32 %v1926_v35, %v4391_v47 }
 0xd52   :  { %v1931_v15 = vpop.permute.xlu1 %1930 }
 0xd53   :  { %v1933_v18 = vmul.f32 %v1931_v15, %v4393_v48  ;;  %v1972_v15 = vadd.f32 %v1965_v43, %v1964_v60 }
 0xd55   :  { %v1968_v28 = vadd.f32 %v1933_v18, %v1928_v16  ;;  %v1976_v14 = vadd.f32 %v1973_v9, %v1972_v15  ;;  %v5036_v16 = vmov 58  }
 0xd57   :  { %v1941_v3 = vpop.permute.xlu1 %1940 }
 0xd58   :  { %v1943_v57 = vmul.f32 %v1941_v3, %v4397_v50 }
 0xd5a   :  { %v1969_v3 = vadd.f32 %v1943_v57, %v1938_v25 }
 0xd5c   :  { %v1946_v61 = vpop.permute.xlu1 %1945  ;;  %v1974_v8 = vadd.f32 %v1969_v3, %v1968_v28 }
 0xd5d   :  { %v1948_v59 = vmul.f32 %v1946_v61, %v4399_v52 }
 0xd5f   :  { %v1970_v12 = vadd.f32 %v1953_v1, %v1948_v59 }
 0xd61   :  { %v1956_v4 = vpop.permute.xlu1 %1955 }
 0xd62   :  { %v1958_v22 = vmul.f32 %v1956_v4, %v4403_v54 }
 0xd66   :  { %v1961_v23 = vpop.permute.xlu1 %1960 }
 0xd67   :  { %v1963_v62 = vmul.f32 %v1961_v23, %v4405_v55 }
 0xd69   :  { %v1971_v13 = vadd.f32 %v1963_v62, %v1958_v22 }
 0xd6b   :  { %v1975_v61 = vadd.f32 %v1971_v13, %v1970_v12 }
 0xd6d   :  { %v1977_v51 = vadd.f32 %v1975_v61, %v1974_v8  ;;  %v1992_v8 = vrot.slane %v4594_v58, 6  ;;  %v5035_v58 = vmov 51  }
 0xd6f   :  { %v1978_v10 = vadd.f32 %v1977_v51, %v1976_v14 }
 0xd71   :  { %v1980_v37 = vrot.slane %v1978_v10, 6 }
 0xd73   :  { %v1982_v11 = vadd.f32 %v4421_v29, %v1980_v37 }
 0xd75   :  { %v3538_v35 = vmul.f32 -1.442695, %v1982_v11 }
 0xd77   :  { %4157 = vpow2.f32 %v3538_v35 }
 0xd81   :  { %v4158_v57 = vpop.eup %4157 }
 0xd82   :  { %v1986_v4 = vadd.f32 1.0, %v4158_v57 }
 0xd84   :  { %4159 = vrcp.f32 %v1986_v4 }
 0xd8e   :  { %v4160_v25 = vpop.eup %4159 }
 0xd8f   :  { %v1989_v31 = vmul.f32 2.0, %v4160_v25  ;;  %v1994_v9 = vmul.f32 %v4160_v25, %v1992_v8 }
 0xd91   :  { %v3539_v63 = vadd.f32 -1.0, %v1989_v31 }
 0xd93   :  { %1996 = vrot.lane.b32.xlu0 %v3539_v63, %s4235_s4 }
 0xe05   :  { %v1997_v32 = vpop.permute.xlu0 %1996 }
 0xe06   :  { %v1999_v18 = vmul.f32 %v4160_v25, %v1997_v32 }
 0xe08   :  { %2001 = vrot.lane.b32.xlu1 %v1999_v18, %s4236_s5 }
 0xe7a   :  { %v2002_v59 = vpop.permute.xlu1 %2001 }
 0xe7b   :  { %v4634_v43 = vadd.f32 %v2002_v59, %v1994_v9 }
 0xe7d   :  { %4161 = vtanh.f32 %v4634_v43 }
 0xe87   :  { %v4162_v19 = vpop.eup %4161 }
 0xe88   :  { %2007 = vrot.lane.b32.xlu0 %v4162_v19, %s4239_s23 }
 0xefa   :  { %v2008_v1 = vpop.permute.xlu0 %2007 }
 0xefb   :  { %v2010_v23 = vmul.f32 %v4160_v25, %v2008_v1 }
 0xefd   :  { %2018 = vperm.xlu0 %3999, %v2010_v23   ;;  %2013 = vperm.xlu1 %3998, %v2010_v23  }
 0xf01   :  { %4002 = vset.pattern.permute.xlu0 %v5020_v5  ;;  %4000 = vset.pattern.permute.xlu1 %v5018_v6 }
 0xf02   :  { %2033 = vperm.xlu0 %4002, %v2010_v23   ;;  %2023 = vperm.xlu1 %4000, %v2010_v23  }
 0xf06   :  { %4005 = vset.pattern.permute.xlu0 %v5016_v7  ;;  %4001 = vset.pattern.permute.xlu1 %v5035_v58 }
 0xf07   :  { %2048 = vperm.xlu0 %4005, %v2010_v23   ;;  %2028 = vperm.xlu1 %4001, %v2010_v23  }
 0xf0b   :  { %4008 = vset.pattern.permute.xlu0 %v5036_v16  ;;  %4003 = vset.pattern.permute.xlu1 %v5033_v26 }
 0xf0c   :  { %2063 = vperm.xlu0 %4008, %v2010_v23   ;;  %2038 = vperm.xlu1 %4003, %v2010_v23  }
 0xf10   :  { %4011 = vset.pattern.permute.xlu0 %v5034_v27  ;;  %4004 = vset.pattern.permute.xlu1 %v5030_v20 }
 0xf11   :  { %2078 = vperm.xlu0 %4011, %v2010_v23   ;;  %2043 = vperm.xlu1 %4004, %v2010_v23  }
 0xf15   :  { %4006 = vset.pattern.permute.xlu1 %v5031_v2  ;;  %4015 = vset.pattern.permute.xlu0 %v5032_v17 }
 0xf16   :  { %2053 = vperm.xlu1 %4006, %v2010_v23  }
 0xf1a   :  { %4007 = vset.pattern.permute.xlu1 %v5027_v21 }
 0xf1b   :  { %2058 = vperm.xlu1 %4007, %v2010_v23  }
 0xf1f   :  { %4009 = vset.pattern.permute.xlu1 %v5028_v56 }
 0xf20   :  { %2068 = vperm.xlu1 %4009, %v2010_v23  }
 0xf24   :  { %4010 = vset.pattern.permute.xlu1 %v5029_v42 }
 0xf25   :  { %2073 = vperm.xlu1 %4010, %v2010_v23  }
 0xf29   :  { %4012 = vset.pattern.permute.xlu1 %v5024_v0 }
 0xf2a   :  { %2083 = vperm.xlu1 %4012, %v2010_v23  }
 0xf2e   :  { %4013 = vset.pattern.permute.xlu1 %v5025_v30 }
 0xf2f   :  { %2088 = vperm.xlu1 %4013, %v2010_v23  }
 0xf33   :  { %4014 = vset.pattern.permute.xlu1 %v5026_v24 }
 0xf7c   :  { %v2014_v3 = vpop.permute.xlu1 %2013  ;;  %v2019_v12 = vpop.permute.xlu0 %2018 }
 0xf7d   :  { %v2021_v32 = vmul.f32 %v2019_v12, %v4369_v34  ;;  %v2016_v18 = vmul.f32 %v2014_v3, %v4367_v33 }
 0xf81   :  { %v2024_v22 = vpop.permute.xlu1 %2023  ;;  %v2034_v15 = vpop.permute.xlu0 %2033 }
 0xf82   :  { %v2036_v8 = vmul.f32 %v2034_v15, %v4378_v40  ;;  %v2026_v9 = vmul.f32 %v2024_v22, %v4374_v38  ;;  %v2092_v22 = vadd.f32 %v2021_v32, %v2016_v18 }
 0xf86   :  { %v2029_v62 = vpop.permute.xlu1 %2028  ;;  %v2049_v14 = vpop.permute.xlu0 %2048 }
 0xf87   :  { %v2031_v57 = vmul.f32 %v2029_v62, %v4376_v39  ;;  %v2051_v25 = vmul.f32 %v2049_v14, %v4389_v46 }
 0xf89   :  { %v2093_v62 = vadd.f32 %v2031_v57, %v2026_v9 }
 0xf8b   :  { %v2039_v60 = vpop.permute.xlu1 %2038  ;;  %v2064_v37 = vpop.permute.xlu0 %2063 }
 0xf8c   :  { %v2041_v4 = vmul.f32 %v2039_v60, %v4380_v41  ;;  %v2066_v59 = vmul.f32 %v2064_v37, %v4395_v49 }
 0xf8e   :  { %v2094_v60 = vadd.f32 %v2041_v4, %v2036_v8 }
 0xf90   :  { %v2044_v28 = vpop.permute.xlu1 %2043  ;;  %v2079_v31 = vpop.permute.xlu0 %2078 }
 0xf91   :  { %v2046_v11 = vmul.f32 %v2044_v28, %v4387_v45  ;;  %v2081_v28 = vmul.f32 %v2079_v31, %v4401_v53 }
 0xf93   :  { %v2095_v19 = vadd.f32 %v2051_v25, %v2046_v11 }
 0xf95   :  { %v2054_v13 = vpop.permute.xlu1 %2053  ;;  %v2101_v7 = vadd.f32 %v2095_v19, %v2094_v60 }
 0xf96   :  { %v2056_v12 = vmul.f32 %v2054_v13, %v4391_v47 }
 0xf9a   :  { %v2059_v61 = vpop.permute.xlu1 %2058 }
 0xf9b   :  { %v2061_v1 = vmul.f32 %v2059_v61, %v4393_v48  ;;  %v2100_v61 = vadd.f32 %v2093_v62, %v2092_v22 }
 0xf9d   :  { %v2096_v37 = vadd.f32 %v2061_v1, %v2056_v12  ;;  %v2104_v57 = vadd.f32 %v2101_v7, %v2100_v61  ;;  %v5037_v12 = vmov 50  }
 0xf9f   :  { %v2069_v51 = vpop.permute.xlu1 %2068 }
 0xfa0   :  { %v2071_v63 = vmul.f32 %v2069_v51, %v4397_v50 }
 0xfa2   :  { %v2097_v51 = vadd.f32 %v2071_v63, %v2066_v59 }
 0xfa4   :  { %v2074_v10 = vpop.permute.xlu1 %2073  ;;  %v2102_v6 = vadd.f32 %v2097_v51, %v2096_v37 }
 0xfa5   :  { %v2076_v23 = vmul.f32 %v2074_v10, %v4399_v52 }
 0xfa7   :  { %v2098_v11 = vadd.f32 %v2081_v28, %v2076_v23 }
 0xfa9   :  { %v2084_v35 = vpop.permute.xlu1 %2083 }
 0xfaa   :  { %v2086_v3 = vmul.f32 %v2084_v35, %v4403_v54 }
 0xfae   :  { %v2089_v14 = vpop.permute.xlu1 %2088 }
 0xfaf   :  { %v2091_v15 = vmul.f32 %v2089_v14, %v4405_v55 }
 0xfb1   :  { %v2099_v25 = vadd.f32 %v2091_v15, %v2086_v3 }
 0xfb3   :  { %v2103_v10 = vadd.f32 %v2099_v25, %v2098_v11 }
 0xfb5   :  { %v2105_v4 = vadd.f32 %v2103_v10, %v2102_v6  ;;  %v2120_v6 = vrot.slane %v4634_v43, 6  ;;  %v5038_v43 = vmov 55  }
 0xfb7   :  { %v2106_v8 = vadd.f32 %v2105_v4, %v2104_v57 }
 0xfb9   :  { %v2108_v31 = vrot.slane %v2106_v8, 6 }
 0xfbb   :  { %v2110_v9 = vadd.f32 %v4421_v29, %v2108_v31 }
 0xfbd   :  { %v3540_v13 = vmul.f32 -1.442695, %v2110_v9 }
 0xfbf   :  { %4163 = vpow2.f32 %v3540_v13 }
 0xfc9   :  { %v4164_v63 = vpop.eup %4163 }
 0xfca   :  { %v2114_v35 = vadd.f32 1.0, %v4164_v63 }
 0xfcc   :  { %4165 = vrcp.f32 %v2114_v35 }
 0xfd6   :  { %v4166_v59 = vpop.eup %4165 }
 0xfd7   :  { %v2117_v32 = vmul.f32 2.0, %v4166_v59  ;;  %v2122_v7 = vmul.f32 %v4166_v59, %v2120_v6 }
 0xfd9   :  { %v3541_v18 = vadd.f32 -1.0, %v2117_v32 }
 0xfdb   :  { %2124 = vrot.lane.b32.xlu0 %v3541_v18, %s4235_s4 }
0x104d   :  { %v2125_v19 = vpop.permute.xlu0 %2124 }
0x104e   :  { %v2127_v1 = vmul.f32 %v4166_v59, %v2125_v19 }
0x1050   :  { %2129 = vrot.lane.b32.xlu1 %v2127_v1, %s4236_s5 }
0x10c2   :  { %v2130_v23 = vpop.permute.xlu1 %2129 }
0x10c3   :  { %v4674_v62 = vadd.f32 %v2130_v23, %v2122_v7 }
0x10c5   :  { %4167 = vtanh.f32 %v4674_v62 }
0x10cf   :  { %v4168_v60 = vpop.eup %4167 }
0x10d0   :  { %2135 = vrot.lane.b32.xlu0 %v4168_v60, %s4239_s23 }
0x1142   :  { %v2136_v28 = vpop.permute.xlu0 %2135 }
0x1143   :  { %v2138_v14 = vmul.f32 %v4166_v59, %v2136_v28 }
0x1145   :  { %2146 = vperm.xlu0 %4015, %v2138_v14   ;;  %2141 = vperm.xlu1 %4014, %v2138_v14  }
0x1149   :  { %4018 = vset.pattern.permute.xlu0 %v5020_v5  ;;  %4016 = vset.pattern.permute.xlu1 %v5037_v12 }
0x114a   :  { %2161 = vperm.xlu0 %4018, %v2138_v14   ;;  %2151 = vperm.xlu1 %4016, %v2138_v14  }
0x114e   :  { %4021 = vset.pattern.permute.xlu0 %v5038_v43  ;;  %4017 = vset.pattern.permute.xlu1 %v5035_v58 }
0x114f   :  { %2176 = vperm.xlu0 %4021, %v2138_v14   ;;  %2156 = vperm.xlu1 %4017, %v2138_v14  }
0x1153   :  { %4024 = vset.pattern.permute.xlu0 %v5036_v16  ;;  %4019 = vset.pattern.permute.xlu1 %v5033_v26 }
0x1154   :  { %2191 = vperm.xlu0 %4024, %v2138_v14   ;;  %2166 = vperm.xlu1 %4019, %v2138_v14  }
0x1158   :  { %4027 = vset.pattern.permute.xlu0 %v5034_v27  ;;  %4020 = vset.pattern.permute.xlu1 %v5030_v20 }
0x1159   :  { %2206 = vperm.xlu0 %4027, %v2138_v14   ;;  %2171 = vperm.xlu1 %4020, %v2138_v14  }
0x115d   :  { %4022 = vset.pattern.permute.xlu1 %v5031_v2  ;;  %4031 = vset.pattern.permute.xlu0 %v5032_v17 }
0x115e   :  { %2181 = vperm.xlu1 %4022, %v2138_v14  }
0x1162   :  { %4023 = vset.pattern.permute.xlu1 %v5027_v21 }
0x1163   :  { %2186 = vperm.xlu1 %4023, %v2138_v14  }
0x1167   :  { %4025 = vset.pattern.permute.xlu1 %v5028_v56 }
0x1168   :  { %2196 = vperm.xlu1 %4025, %v2138_v14  }
0x116c   :  { %4026 = vset.pattern.permute.xlu1 %v5029_v42 }
0x116d   :  { %2201 = vperm.xlu1 %4026, %v2138_v14  }
0x1171   :  { %4028 = vset.pattern.permute.xlu1 %v5024_v0 }
0x1172   :  { %2211 = vperm.xlu1 %4028, %v2138_v14  }
0x1176   :  { %4029 = vset.pattern.permute.xlu1 %v5025_v30 }
0x1177   :  { %2216 = vperm.xlu1 %4029, %v2138_v14  }
0x117b   :  { %4030 = vset.pattern.permute.xlu1 %v5026_v24 }
0x11c4   :  { %v2142_v51 = vpop.permute.xlu1 %2141  ;;  %v2147_v11 = vpop.permute.xlu0 %2146 }
0x11c5   :  { %v2149_v19 = vmul.f32 %v2147_v11, %v4369_v34  ;;  %v2144_v1 = vmul.f32 %v2142_v51, %v4367_v33 }
0x11c9   :  { %v2152_v3 = vpop.permute.xlu1 %2151  ;;  %v2162_v61 = vpop.permute.xlu0 %2161 }
0x11ca   :  { %v2164_v6 = vmul.f32 %v2162_v61, %v4378_v40  ;;  %v2154_v7 = vmul.f32 %v2152_v3, %v4374_v38  ;;  %v2220_v3 = vadd.f32 %v2149_v19, %v2144_v1 }
0x11ce   :  { %v2157_v15 = vpop.permute.xlu1 %2156  ;;  %v2177_v57 = vpop.permute.xlu0 %2176 }
0x11cf   :  { %v2159_v63 = vmul.f32 %v2157_v15, %v4376_v39  ;;  %v2179_v59 = vmul.f32 %v2177_v57, %v4389_v46 }
0x11d1   :  { %v2221_v15 = vadd.f32 %v2159_v63, %v2154_v7 }
0x11d3   :  { %v2167_v22 = vpop.permute.xlu1 %2166  ;;  %v2192_v31 = vpop.permute.xlu0 %2191 }
0x11d4   :  { %v2169_v35 = vmul.f32 %v2167_v22, %v4380_v41  ;;  %v2194_v23 = vmul.f32 %v2192_v31, %v4395_v49 }
0x11d6   :  { %v2222_v22 = vadd.f32 %v2169_v35, %v2164_v6 }
0x11d8   :  { %v2172_v37 = vpop.permute.xlu1 %2171  ;;  %v2207_v32 = vpop.permute.xlu0 %2206 }
0x11d9   :  { %v2174_v9 = vmul.f32 %v2172_v37, %v4387_v45  ;;  %v2209_v37 = vmul.f32 %v2207_v32, %v4401_v53 }
0x11db   :  { %v2223_v60 = vadd.f32 %v2179_v59, %v2174_v9 }
0x11dd   :  { %v2182_v25 = vpop.permute.xlu1 %2181  ;;  %v2229_v5 = vadd.f32 %v2223_v60, %v2222_v22 }
0x11de   :  { %v2184_v11 = vmul.f32 %v2182_v25, %v4391_v47 }
0x11e2   :  { %v2187_v10 = vpop.permute.xlu1 %2186 }
0x11e3   :  { %v2189_v28 = vmul.f32 %v2187_v10, %v4393_v48  ;;  %v2228_v10 = vadd.f32 %v2221_v15, %v2220_v3 }
0x11e5   :  { %v2224_v31 = vadd.f32 %v2189_v28, %v2184_v11  ;;  %v2232_v63 = vadd.f32 %v2229_v5, %v2228_v10 }
0x11e7   :  { %v2197_v4 = vpop.permute.xlu1 %2196 }
0x11e8   :  { %v2199_v18 = vmul.f32 %v2197_v4, %v4397_v50 }
0x11ea   :  { %v2225_v4 = vadd.f32 %v2199_v18, %v2194_v23 }
0x11ec   :  { %v2202_v8 = vpop.permute.xlu1 %2201  ;;  %v2230_v36 = vadd.f32 %v2225_v4, %v2224_v31 }
0x11ed   :  { %v2204_v14 = vmul.f32 %v2202_v8, %v4399_v52 }
0x11ef   :  { %v2226_v9 = vadd.f32 %v2209_v37, %v2204_v14 }
0x11f1   :  { %v2212_v13 = vpop.permute.xlu1 %2211 }
0x11f2   :  { %v2214_v51 = vmul.f32 %v2212_v13, %v4403_v54 }
0x11f6   :  { %v2217_v57 = vpop.permute.xlu1 %2216 }
0x11f7   :  { %v2219_v61 = vmul.f32 %v2217_v57, %v4405_v55  ;;  %v5039_v57 = vmov 52  }
0x11f9   :  { %v2227_v59 = vadd.f32 %v2219_v61, %v2214_v51 }
0x11fb   :  { %v2231_v8 = vadd.f32 %v2227_v59, %v2226_v9 }
0x11fd   :  { %v2233_v35 = vadd.f32 %v2231_v8, %v2230_v36  ;;  %v2248_v36 = vrot.slane %v4674_v62, 6 }
0x11ff   :  { %v2234_v6 = vadd.f32 %v2233_v35, %v2232_v63 }
0x1201   :  { %v2236_v32 = vrot.slane %v2234_v6, 6 }
0x1203   :  { %v2238_v7 = vadd.f32 %v4421_v29, %v2236_v32 }
0x1205   :  { %v3542_v25 = vmul.f32 -1.442695, %v2238_v7 }
0x1207   :  { %4169 = vpow2.f32 %v3542_v25 }
0x1211   :  { %v4170_v18 = vpop.eup %4169 }
0x1212   :  { %v2242_v13 = vadd.f32 1.0, %v4170_v18 }
0x1214   :  { %4171 = vrcp.f32 %v2242_v13 }
0x121e   :  { %v4172_v23 = vpop.eup %4171 }
0x121f   :  { %v2245_v19 = vmul.f32 2.0, %v4172_v23  ;;  %v2250_v5 = vmul.f32 %v4172_v23, %v2248_v36 }
0x1221   :  { %v3543_v1 = vadd.f32 -1.0, %v2245_v19 }
0x1223   :  { %2252 = vrot.lane.b32.xlu0 %v3543_v1, %s4235_s4 }
0x1295   :  { %v2253_v60 = vpop.permute.xlu0 %2252 }
0x1296   :  { %v2255_v28 = vmul.f32 %v4172_v23, %v2253_v60 }
0x1298   :  { %2257 = vrot.lane.b32.xlu1 %v2255_v28, %s4236_s5 }
0x130a   :  { %v2258_v14 = vpop.permute.xlu1 %2257 }
0x130b   :  { %v4714_v15 = vadd.f32 %v2258_v14, %v2250_v5 }
0x130d   :  { %4173 = vtanh.f32 %v4714_v15 }
0x1317   :  { %v4174_v29 = vpop.eup %4173 }
0x1318   :  { %2263 = vrot.lane.b32.xlu0 %v4174_v29, %s4239_s23 }
0x138a   :  { %v2264_v22 = vpop.permute.xlu0 %2263 }
0x138b   :  { %v2266_v37 = vmul.f32 %v4172_v23, %v2264_v22 }
0x138d   :  { %2274 = vperm.xlu0 %4031, %v2266_v37   ;;  %2269 = vperm.xlu1 %4030, %v2266_v37  }
0x1391   :  { %4034 = vset.pattern.permute.xlu0 %v5039_v57  ;;  %4032 = vset.pattern.permute.xlu1 %v5037_v12 }
0x1392   :  { %2289 = vperm.xlu0 %4034, %v2266_v37   ;;  %2279 = vperm.xlu1 %4032, %v2266_v37  }
0x1396   :  { %4037 = vset.pattern.permute.xlu0 %v5038_v43  ;;  %4033 = vset.pattern.permute.xlu1 %v5035_v58 }
0x1397   :  { %2304 = vperm.xlu0 %4037, %v2266_v37   ;;  %2284 = vperm.xlu1 %4033, %v2266_v37  }
0x139b   :  { %4040 = vset.pattern.permute.xlu0 %v5036_v16  ;;  %4035 = vset.pattern.permute.xlu1 %v5033_v26 }
0x139c   :  { %2319 = vperm.xlu0 %4040, %v2266_v37   ;;  %2294 = vperm.xlu1 %4035, %v2266_v37  }
0x13a0   :  { %4043 = vset.pattern.permute.xlu0 %v5034_v27  ;;  %4036 = vset.pattern.permute.xlu1 %v5030_v20 }
0x13a1   :  { %2334 = vperm.xlu0 %4043, %v2266_v37   ;;  %2299 = vperm.xlu1 %4036, %v2266_v37  }
0x13a5   :  { %4038 = vset.pattern.permute.xlu1 %v5031_v2  ;;  %4047 = vset.pattern.permute.xlu0 %v5032_v17 }
0x13a6   :  { %2309 = vperm.xlu1 %4038, %v2266_v37  }
0x13aa   :  { %4039 = vset.pattern.permute.xlu1 %v5027_v21 }
0x13ab   :  { %2314 = vperm.xlu1 %4039, %v2266_v37  }
0x13af   :  { %4041 = vset.pattern.permute.xlu1 %v5028_v56 }
0x13b0   :  { %2324 = vperm.xlu1 %4041, %v2266_v37  }
0x13b4   :  { %4042 = vset.pattern.permute.xlu1 %v5029_v42 }
0x13b5   :  { %2329 = vperm.xlu1 %4042, %v2266_v37  }
0x13b9   :  { %4044 = vset.pattern.permute.xlu1 %v5024_v0 }
0x13ba   :  { %2339 = vperm.xlu1 %4044, %v2266_v37  }
0x13be   :  { %4045 = vset.pattern.permute.xlu1 %v5025_v30 }
0x13bf   :  { %2344 = vperm.xlu1 %4045, %v2266_v37  }
0x13c3   :  { %4046 = vset.pattern.permute.xlu1 %v5026_v24 }
0x140c   :  { %v2270_v62 = vpop.permute.xlu1 %2269  ;;  %v2275_v3 = vpop.permute.xlu0 %2274 }
0x140d   :  { %v2277_v19 = vmul.f32 %v2275_v3, %v4369_v34  ;;  %v2272_v1 = vmul.f32 %v2270_v62, %v4367_v33 }
0x1411   :  { %v2280_v11 = vpop.permute.xlu1 %2279  ;;  %v2290_v9 = vpop.permute.xlu0 %2289 }
0x1412   :  { %v2292_v60 = vmul.f32 %v2290_v9, %v4378_v40  ;;  %v2282_v28 = vmul.f32 %v2280_v11, %v4374_v38  ;;  %v2348_v11 = vadd.f32 %v2277_v19, %v2272_v1 }
0x1416   :  { %v2285_v4 = vpop.permute.xlu1 %2284  ;;  %v2305_v10 = vpop.permute.xlu0 %2304 }
0x1417   :  { %v2287_v7 = vmul.f32 %v2285_v4, %v4376_v39  ;;  %v2307_v18 = vmul.f32 %v2305_v10, %v4389_v46 }
0x1419   :  { %v2349_v22 = vadd.f32 %v2287_v7, %v2282_v28 }
0x141b   :  { %v2295_v51 = vpop.permute.xlu1 %2294  ;;  %v2320_v35 = vpop.permute.xlu0 %2319 }
0x141c   :  { %v2297_v25 = vmul.f32 %v2295_v51, %v4380_v41  ;;  %v2322_v36 = vmul.f32 %v2320_v35, %v4395_v49 }
0x141e   :  { %v2350_v37 = vadd.f32 %v2297_v25, %v2292_v60 }
0x1420   :  { %v2300_v61 = vpop.permute.xlu1 %2299  ;;  %v2335_v13 = vpop.permute.xlu0 %2334 }
0x1421   :  { %v2302_v6 = vmul.f32 %v2300_v61, %v4387_v45  ;;  %v2337_v4 = vmul.f32 %v2335_v13, %v4401_v53 }
0x1423   :  { %v2351_v5 = vadd.f32 %v2307_v18, %v2302_v6 }
0x1425   :  { %v2310_v31 = vpop.permute.xlu1 %2309  ;;  %v2357_v10 = vadd.f32 %v2351_v5, %v2350_v37 }
0x1426   :  { %v2312_v61 = vmul.f32 %v2310_v31, %v4391_v47 }
0x142a   :  { %v2315_v59 = vpop.permute.xlu1 %2314 }
0x142b   :  { %v2317_v14 = vmul.f32 %v2315_v59, %v4393_v48  ;;  %v2356_v59 = vadd.f32 %v2349_v22, %v2348_v11 }
0x142d   :  { %v2360_v7 = vadd.f32 %v2357_v10, %v2356_v59 }
0x142f   :  { %v2325_v8 = vpop.permute.xlu1 %2324 }
0x1430   :  { %v2327_v23 = vmul.f32 %v2325_v8, %v4397_v50  ;;  %v2352_v8 = vadd.f32 %v2317_v14, %v2312_v61 }
0x1432   :  { %v2353_v3 = vadd.f32 %v2327_v23, %v2322_v36 }
0x1434   :  { %v2330_v63 = vpop.permute.xlu1 %2329  ;;  %v2358_v18 = vadd.f32 %v2353_v3, %v2352_v8 }
0x1435   :  { %v2332_v29 = vmul.f32 %v2330_v63, %v4399_v52 }
0x1437   :  { %v2354_v35 = vadd.f32 %v2337_v4, %v2332_v29  ;;  %v2376_v29 = vrot.slane %v4714_v15, 6 }
0x1439   :  { %v2340_v32 = vpop.permute.xlu1 %2339 }
0x143a   :  { %v2342_v62 = vmul.f32 %v2340_v32, %v4403_v54 }
0x143e   :  { %v2345_v51 = vpop.permute.xlu1 %2344 }
0x143f   :  { %v2347_v9 = vmul.f32 %v2345_v51, %v4405_v55 }
0x1441   :  { %v2355_v6 = vadd.f32 %v2347_v9, %v2342_v62 }
0x1443   :  { %v2359_v63 = vadd.f32 %v2355_v6, %v2354_v35 }
0x1445   :  { %v2361_v25 = vadd.f32 %v2359_v63, %v2358_v18 }
0x1447   :  { %v2362_v60 = vadd.f32 %v2361_v25, %v2360_v7 }
0x1449   :  { %v2364_v13 = vrot.slane %v2362_v60, 6 }
0x144b   :  { %v2366_v28 = vadd.f32 %v4428_v44, %v2364_v13 }
0x144d   :  { %v3544_v31 = vmul.f32 -1.442695, %v2366_v28 }
0x144f   :  { %4175 = vpow2.f32 %v3544_v31 }
0x1459   :  { %v4176_v23 = vpop.eup %4175 }
0x145a   :  { %v2370_v32 = vadd.f32 1.0, %v4176_v23 }
0x145c   :  { %4177 = vrcp.f32 %v2370_v32 }
0x1466   :  { %v4178_v36 = vpop.eup %4177 }
0x1467   :  { %v2373_v19 = vmul.f32 2.0, %v4178_v36  ;;  %v2378_v22 = vmul.f32 %v4178_v36, %v2376_v29 }
0x1469   :  { %v3545_v1 = vadd.f32 -1.0, %v2373_v19 }
0x146b   :  { %2380 = vrot.lane.b32.xlu0 %v3545_v1, %s4235_s4 }
0x14dd   :  { %v2381_v5 = vpop.permute.xlu0 %2380 }
0x14de   :  { %v2383_v14 = vmul.f32 %v4178_v36, %v2381_v5 }
0x14e0   :  { %2385 = vrot.lane.b32.xlu1 %v2383_v14, %s4236_s5 }
0x1552   :  { %v2386_v37 = vpop.permute.xlu1 %2385 }
0x1553   :  { %v4754_v4 = vadd.f32 %v2386_v37, %v2378_v22 }
0x1555   :  { %4179 = vtanh.f32 %v4754_v4 }
0x155f   :  { %v4180_v51 = vpop.eup %4179 }
0x1560   :  { %2391 = vrot.lane.b32.xlu0 %v4180_v51, %s4239_s23 }
0x15d2   :  { %v2392_v61 = vpop.permute.xlu0 %2391 }
0x15d3   :  { %v2394_v3 = vmul.f32 %v4178_v36, %v2392_v61 }
0x15d5   :  { %2402 = vperm.xlu0 %4047, %v2394_v3   ;;  %2397 = vperm.xlu1 %4046, %v2394_v3  }
0x15d9   :  { %4050 = vset.pattern.permute.xlu0 %v5039_v57  ;;  %4048 = vset.pattern.permute.xlu1 %v5037_v12 }
0x15da   :  { %2417 = vperm.xlu0 %4050, %v2394_v3   ;;  %2407 = vperm.xlu1 %4048, %v2394_v3  }
0x15de   :  { %4053 = vset.pattern.permute.xlu0 %v5038_v43  ;;  %4049 = vset.pattern.permute.xlu1 %v5035_v58 }
0x15df   :  { %2432 = vperm.xlu0 %4053, %v2394_v3   ;;  %2412 = vperm.xlu1 %4049, %v2394_v3  }
0x15e3   :  { %4056 = vset.pattern.permute.xlu0 %v5036_v16  ;;  %4051 = vset.pattern.permute.xlu1 %v5033_v26 }
0x15e4   :  { %2447 = vperm.xlu0 %4056, %v2394_v3   ;;  %2422 = vperm.xlu1 %4051, %v2394_v3  }
0x15e8   :  { %4059 = vset.pattern.permute.xlu0 %v5034_v27  ;;  %4052 = vset.pattern.permute.xlu1 %v5030_v20 }
0x15e9   :  { %2462 = vperm.xlu0 %4059, %v2394_v3   ;;  %2427 = vperm.xlu1 %4052, %v2394_v3  }
0x15ed   :  { %4054 = vset.pattern.permute.xlu1 %v5031_v2  ;;  %4063 = vset.pattern.permute.xlu0 %v5032_v17 }
0x15ee   :  { %2437 = vperm.xlu1 %4054, %v2394_v3  }
0x15f2   :  { %4055 = vset.pattern.permute.xlu1 %v5027_v21 }
0x15f3   :  { %2442 = vperm.xlu1 %4055, %v2394_v3  }
0x15f7   :  { %4057 = vset.pattern.permute.xlu1 %v5028_v56 }
0x15f8   :  { %2452 = vperm.xlu1 %4057, %v2394_v3  }
0x15fc   :  { %4058 = vset.pattern.permute.xlu1 %v5029_v42 }
0x15fd   :  { %2457 = vperm.xlu1 %4058, %v2394_v3  }
0x1601   :  { %4060 = vset.pattern.permute.xlu1 %v5024_v0 }
0x1602   :  { %2467 = vperm.xlu1 %4060, %v2394_v3  }
0x1606   :  { %4061 = vset.pattern.permute.xlu1 %v5025_v30 }
0x1607   :  { %2472 = vperm.xlu1 %4061, %v2394_v3  }
0x160b   :  { %4062 = vset.pattern.permute.xlu1 %v5026_v24 }
0x1654   :  { %v2398_v15 = vpop.permute.xlu1 %2397  ;;  %v2403_v8 = vpop.permute.xlu0 %2402 }
0x1655   :  { %v2405_v19 = vmul.f32 %v2403_v8, %v4369_v34  ;;  %v2400_v1 = vmul.f32 %v2398_v15, %v4367_v33 }
0x1659   :  { %v2408_v62 = vpop.permute.xlu1 %2407  ;;  %v2418_v6 = vpop.permute.xlu0 %2417 }
0x165a   :  { %v2420_v5 = vmul.f32 %v2418_v6, %v4378_v40  ;;  %v2410_v14 = vmul.f32 %v2408_v62, %v4374_v38  ;;  %v2476_v62 = vadd.f32 %v2405_v19, %v2400_v1 }
0x165e   :  { %v2413_v9 = vpop.permute.xlu1 %2412  ;;  %v2433_v18 = vpop.permute.xlu0 %2432 }
0x165f   :  { %v2415_v28 = vmul.f32 %v2413_v9, %v4376_v39  ;;  %v2435_v23 = vmul.f32 %v2433_v18, %v4389_v46 }
0x1661   :  { %v2477_v61 = vadd.f32 %v2415_v28, %v2410_v14 }
0x1663   :  { %v2423_v11 = vpop.permute.xlu1 %2422  ;;  %v2448_v25 = vpop.permute.xlu0 %2447 }
0x1664   :  { %v2425_v31 = vmul.f32 %v2423_v11, %v4380_v41  ;;  %v2450_v29 = vmul.f32 %v2448_v25, %v4395_v49 }
0x1666   :  { %v2478_v3 = vadd.f32 %v2425_v31, %v2420_v5 }
0x1668   :  { %v2428_v10 = vpop.permute.xlu1 %2427  ;;  %v2463_v32 = vpop.permute.xlu0 %2462 }
0x1669   :  { %v2430_v60 = vmul.f32 %v2428_v10, %v4387_v45  ;;  %v2465_v9 = vmul.f32 %v2463_v32, %v4401_v53 }
0x166b   :  { %v2479_v22 = vadd.f32 %v2435_v23, %v2430_v60 }
0x166d   :  { %v2438_v35 = vpop.permute.xlu1 %2437  ;;  %v2485_v18 = vadd.f32 %v2479_v22, %v2478_v3 }
0x166e   :  { %v2440_v10 = vmul.f32 %v2438_v35, %v4391_v47 }
0x1672   :  { %v2443_v59 = vpop.permute.xlu1 %2442 }
0x1673   :  { %v2445_v37 = vmul.f32 %v2443_v59, %v4393_v48  ;;  %v2484_v59 = vadd.f32 %v2477_v61, %v2476_v62 }
0x1675   :  { %v2488_v28 = vadd.f32 %v2485_v18, %v2484_v59 }
0x1677   :  { %v2453_v63 = vpop.permute.xlu1 %2452 }
0x1678   :  { %v2455_v36 = vmul.f32 %v2453_v63, %v4397_v50  ;;  %v2480_v63 = vadd.f32 %v2445_v37, %v2440_v10 }
0x167a   :  { %v2481_v8 = vadd.f32 %v2455_v36, %v2450_v29 }
0x167c   :  { %v2458_v7 = vpop.permute.xlu1 %2457  ;;  %v2486_v23 = vadd.f32 %v2481_v8, %v2480_v63 }
0x167d   :  { %v2460_v51 = vmul.f32 %v2458_v7, %v4399_v52 }
0x167f   :  { %v2482_v25 = vadd.f32 %v2465_v9, %v2460_v51  ;;  %v2504_v51 = vrot.slane %v4754_v4, 6 }
0x1681   :  { %v2468_v13 = vpop.permute.xlu1 %2467 }
0x1682   :  { %v2470_v15 = vmul.f32 %v2468_v13, %v4403_v54 }
0x1686   :  { %v2473_v11 = vpop.permute.xlu1 %2472 }
0x1687   :  { %v2475_v6 = vmul.f32 %v2473_v11, %v4405_v55 }
0x1689   :  { %v2483_v60 = vadd.f32 %v2475_v6, %v2470_v15 }
0x168b   :  { %v2487_v7 = vadd.f32 %v2483_v60, %v2482_v25 }
0x168d   :  { %v2489_v31 = vadd.f32 %v2487_v7, %v2486_v23 }
0x168f   :  { %v2490_v5 = vadd.f32 %v2489_v31, %v2488_v28 }
0x1691   :  { %v2492_v32 = vrot.slane %v2490_v5, 6 }
0x1693   :  { %v2494_v14 = vadd.f32 %v4428_v44, %v2492_v32 }
0x1695   :  { %v3546_v35 = vmul.f32 -1.442695, %v2494_v14 }
0x1697   :  { %4181 = vpow2.f32 %v3546_v35 }
0x16a1   :  { %v4182_v36 = vpop.eup %4181 }
0x16a2   :  { %v2498_v13 = vadd.f32 1.0, %v4182_v36 }
0x16a4   :  { %4183 = vrcp.f32 %v2498_v13 }
0x16ae   :  { %v4184_v29 = vpop.eup %4183 }
0x16af   :  { %v2501_v19 = vmul.f32 2.0, %v4184_v29  ;;  %v2506_v61 = vmul.f32 %v4184_v29, %v2504_v51 }
0x16b1   :  { %v3547_v1 = vadd.f32 -1.0, %v2501_v19 }
0x16b3   :  { %2508 = vrot.lane.b32.xlu0 %v3547_v1, %s4235_s4 }
0x1725   :  { %v2509_v22 = vpop.permute.xlu0 %2508 }
0x1726   :  { %v2511_v37 = vmul.f32 %v4184_v29, %v2509_v22 }
0x1728   :  { %2513 = vrot.lane.b32.xlu1 %v2511_v37, %s4236_s5 }
0x179a   :  { %v2514_v3 = vpop.permute.xlu1 %2513 }
0x179b   :  { %v4794_v9 = vadd.f32 %v2514_v3, %v2506_v61 }
0x179d   :  { %4185 = vtanh.f32 %v4794_v9 }
0x17a7   :  { %v4186_v11 = vpop.eup %4185 }
0x17a8   :  { %2519 = vrot.lane.b32.xlu0 %v4186_v11, %s4239_s23 }
0x181a   :  { %v2520_v10 = vpop.permute.xlu0 %2519 }
0x181b   :  { %v2522_v8 = vmul.f32 %v4184_v29, %v2520_v10 }
0x181d   :  { %2530 = vperm.xlu0 %4063, %v2522_v8   ;;  %2525 = vperm.xlu1 %4062, %v2522_v8  }
0x1821   :  { %4066 = vset.pattern.permute.xlu0 %v5039_v57  ;;  %4064 = vset.pattern.permute.xlu1 %v5037_v12 }
0x1822   :  { %2545 = vperm.xlu0 %4066, %v2522_v8   ;;  %2535 = vperm.xlu1 %4064, %v2522_v8  }
0x1826   :  { %4069 = vset.pattern.permute.xlu0 %v5038_v43  ;;  %4065 = vset.pattern.permute.xlu1 %v5035_v58 }
0x1827   :  { %2560 = vperm.xlu0 %4069, %v2522_v8   ;;  %2540 = vperm.xlu1 %4065, %v2522_v8  }
0x182b   :  { %4072 = vset.pattern.permute.xlu0 %v5036_v16  ;;  %4067 = vset.pattern.permute.xlu1 %v5033_v26 }
0x182c   :  { %2575 = vperm.xlu0 %4072, %v2522_v8   ;;  %2550 = vperm.xlu1 %4067, %v2522_v8  }
0x1830   :  { %4075 = vset.pattern.permute.xlu0 %v5034_v27  ;;  %4068 = vset.pattern.permute.xlu1 %v5030_v20 }
0x1831   :  { %2590 = vperm.xlu0 %4075, %v2522_v8   ;;  %2555 = vperm.xlu1 %4068, %v2522_v8  }
0x1835   :  { %4070 = vset.pattern.permute.xlu1 %v5031_v2  ;;  %4079 = vset.pattern.permute.xlu0 %v5032_v17 }
0x1836   :  { %2565 = vperm.xlu1 %4070, %v2522_v8  }
0x183a   :  { %4071 = vset.pattern.permute.xlu1 %v5027_v21 }
0x183b   :  { %2570 = vperm.xlu1 %4071, %v2522_v8  }
0x183f   :  { %4073 = vset.pattern.permute.xlu1 %v5028_v56 }
0x1840   :  { %2580 = vperm.xlu1 %4073, %v2522_v8  }
0x1844   :  { %4074 = vset.pattern.permute.xlu1 %v5029_v42 }
0x1845   :  { %2585 = vperm.xlu1 %4074, %v2522_v8  }
0x1849   :  { %4076 = vset.pattern.permute.xlu1 %v5024_v0 }
0x184a   :  { %2595 = vperm.xlu1 %4076, %v2522_v8  }
0x184e   :  { %4077 = vset.pattern.permute.xlu1 %v5025_v30 }
0x184f   :  { %2600 = vperm.xlu1 %4077, %v2522_v8  }
0x1853   :  { %4078 = vset.pattern.permute.xlu1 %v5026_v24 }
0x189c   :  { %v2526_v4 = vpop.permute.xlu1 %2525  ;;  %v2531_v63 = vpop.permute.xlu0 %2530 }
0x189d   :  { %v2533_v19 = vmul.f32 %v2531_v63, %v4369_v34  ;;  %v2528_v1 = vmul.f32 %v2526_v4, %v4367_v33 }
0x18a1   :  { %v2536_v15 = vpop.permute.xlu1 %2535  ;;  %v2546_v60 = vpop.permute.xlu0 %2545 }
0x18a2   :  { %v2548_v22 = vmul.f32 %v2546_v60, %v4378_v40  ;;  %v2538_v37 = vmul.f32 %v2536_v15, %v4374_v38  ;;  %v2604_v15 = vadd.f32 %v2533_v19, %v2528_v1 }
0x18a6   :  { %v2541_v6 = vpop.permute.xlu1 %2540  ;;  %v2561_v23 = vpop.permute.xlu0 %2560 }
0x18a7   :  { %v2543_v14 = vmul.f32 %v2541_v6, %v4376_v39  ;;  %v2563_v36 = vmul.f32 %v2561_v23, %v4389_v46 }
0x18a9   :  { %v2605_v10 = vadd.f32 %v2543_v14, %v2538_v37 }
0x18ab   :  { %v2551_v62 = vpop.permute.xlu1 %2550  ;;  %v2576_v31 = vpop.permute.xlu0 %2575 }
0x18ac   :  { %v2553_v35 = vmul.f32 %v2551_v62, %v4380_v41  ;;  %v2578_v51 = vmul.f32 %v2576_v31, %v4395_v49 }
0x18ae   :  { %v2606_v8 = vadd.f32 %v2553_v35, %v2548_v22 }
0x18b0   :  { %v2556_v18 = vpop.permute.xlu1 %2555  ;;  %v2591_v13 = vpop.permute.xlu0 %2590 }
0x18b1   :  { %v2558_v5 = vmul.f32 %v2556_v18, %v4387_v45  ;;  %v2593_v6 = vmul.f32 %v2591_v13, %v4401_v53 }
0x18b3   :  { %v2607_v61 = vadd.f32 %v2563_v36, %v2558_v5 }
0x18b5   :  { %v2566_v25 = vpop.permute.xlu1 %2565  ;;  %v2613_v23 = vadd.f32 %v2607_v61, %v2606_v8 }
0x18b6   :  { %v2568_v18 = vmul.f32 %v2566_v25, %v4391_v47 }
0x18ba   :  { %v2571_v59 = vpop.permute.xlu1 %2570 }
0x18bb   :  { %v2573_v3 = vmul.f32 %v2571_v59, %v4393_v48  ;;  %v2612_v59 = vadd.f32 %v2605_v10, %v2604_v15 }
0x18bd   :  { %v2616_v14 = vadd.f32 %v2613_v23, %v2612_v59 }
0x18bf   :  { %v2581_v7 = vpop.permute.xlu1 %2580 }
0x18c0   :  { %v2583_v29 = vmul.f32 %v2581_v7, %v4397_v50  ;;  %v2608_v7 = vadd.f32 %v2573_v3, %v2568_v18 }
0x18c2   :  { %v2609_v63 = vadd.f32 %v2583_v29, %v2578_v51 }
0x18c4   :  { %v2586_v28 = vpop.permute.xlu1 %2585  ;;  %v2614_v36 = vadd.f32 %v2609_v63, %v2608_v7 }
0x18c5   :  { %v2588_v11 = vmul.f32 %v2586_v28, %v4399_v52 }
0x18c7   :  { %v2610_v31 = vadd.f32 %v2593_v6, %v2588_v11  ;;  %v2632_v11 = vrot.slane %v4794_v9, 6 }
0x18c9   :  { %v2596_v32 = vpop.permute.xlu1 %2595 }
0x18ca   :  { %v2598_v4 = vmul.f32 %v2596_v32, %v4403_v54 }
0x18ce   :  { %v2601_v62 = vpop.permute.xlu1 %2600 }
0x18cf   :  { %v2603_v60 = vmul.f32 %v2601_v62, %v4405_v55 }
0x18d1   :  { %v2611_v5 = vadd.f32 %v2603_v60, %v2598_v4 }
0x18d3   :  { %v2615_v28 = vadd.f32 %v2611_v5, %v2610_v31 }
0x18d5   :  { %v2617_v35 = vadd.f32 %v2615_v28, %v2614_v36 }
0x18d7   :  { %v2618_v22 = vadd.f32 %v2617_v35, %v2616_v14 }
0x18d9   :  { %v2620_v13 = vrot.slane %v2618_v22, 6 }
0x18db   :  { %v2622_v37 = vadd.f32 %v4428_v44, %v2620_v13 }
0x18dd   :  { %v3548_v25 = vmul.f32 -1.442695, %v2622_v37 }
0x18df   :  { %4187 = vpow2.f32 %v3548_v25 }
0x18e9   :  { %v4188_v29 = vpop.eup %4187 }
0x18ea   :  { %v2626_v32 = vadd.f32 1.0, %v4188_v29 }
0x18ec   :  { %4189 = vrcp.f32 %v2626_v32 }
0x18f6   :  { %v4190_v51 = vpop.eup %4189 }
0x18f7   :  { %v2629_v19 = vmul.f32 2.0, %v4190_v51  ;;  %v2634_v10 = vmul.f32 %v4190_v51, %v2632_v11 }
0x18f9   :  { %v3549_v1 = vadd.f32 -1.0, %v2629_v19 }
0x18fb   :  { %2636 = vrot.lane.b32.xlu0 %v3549_v1, %s4235_s4 }
0x196d   :  { %v2637_v61 = vpop.permute.xlu0 %2636 }
0x196e   :  { %v2639_v3 = vmul.f32 %v4190_v51, %v2637_v61 }
0x1970   :  { %2641 = vrot.lane.b32.xlu1 %v2639_v3, %s4236_s5 }
0x19e2   :  { %v2642_v8 = vpop.permute.xlu1 %2641 }
0x19e3   :  { %v4834_v6 = vadd.f32 %v2642_v8, %v2634_v10 }
0x19e5   :  { %4191 = vtanh.f32 %v4834_v6 }
0x19ef   :  { %v4192_v62 = vpop.eup %4191 }
0x19f0   :  { %2647 = vrot.lane.b32.xlu0 %v4192_v62, %s4239_s23 }
0x1a62   :  { %v2648_v18 = vpop.permute.xlu0 %2647 }
0x1a63   :  { %v2650_v63 = vmul.f32 %v4190_v51, %v2648_v18 }
0x1a65   :  { %2658 = vperm.xlu0 %4079, %v2650_v63   ;;  %2653 = vperm.xlu1 %4078, %v2650_v63  }
0x1a69   :  { %4082 = vset.pattern.permute.xlu0 %v5039_v57  ;;  %4080 = vset.pattern.permute.xlu1 %v5037_v12 }
0x1a6a   :  { %2673 = vperm.xlu0 %4082, %v2650_v63   ;;  %2663 = vperm.xlu1 %4080, %v2650_v63  }
0x1a6e   :  { %4085 = vset.pattern.permute.xlu0 %v5038_v43  ;;  %4081 = vset.pattern.permute.xlu1 %v5035_v58 }
0x1a6f   :  { %2688 = vperm.xlu0 %4085, %v2650_v63   ;;  %2668 = vperm.xlu1 %4081, %v2650_v63  }
0x1a73   :  { %4088 = vset.pattern.permute.xlu0 %v5036_v16  ;;  %4083 = vset.pattern.permute.xlu1 %v5033_v26 }
0x1a74   :  { %2703 = vperm.xlu0 %4088, %v2650_v63   ;;  %2678 = vperm.xlu1 %4083, %v2650_v63  }
0x1a78   :  { %4091 = vset.pattern.permute.xlu0 %v5034_v27  ;;  %4084 = vset.pattern.permute.xlu1 %v5030_v20 }
0x1a79   :  { %2718 = vperm.xlu0 %4091, %v2650_v63   ;;  %2683 = vperm.xlu1 %4084, %v2650_v63  }
0x1a7d   :  { %4086 = vset.pattern.permute.xlu1 %v5031_v2  ;;  %4095 = vset.pattern.permute.xlu0 %v5032_v17 }
0x1a7e   :  { %2693 = vperm.xlu1 %4086, %v2650_v63  }
0x1a82   :  { %4087 = vset.pattern.permute.xlu1 %v5027_v21 }
0x1a83   :  { %2698 = vperm.xlu1 %4087, %v2650_v63  }
0x1a87   :  { %4089 = vset.pattern.permute.xlu1 %v5028_v56 }
0x1a88   :  { %2708 = vperm.xlu1 %4089, %v2650_v63  }
0x1a8c   :  { %4090 = vset.pattern.permute.xlu1 %v5029_v42 }
0x1a8d   :  { %2713 = vperm.xlu1 %4090, %v2650_v63  }
0x1a91   :  { %4092 = vset.pattern.permute.xlu1 %v5024_v0 }
0x1a92   :  { %2723 = vperm.xlu1 %4092, %v2650_v63  }
0x1a96   :  { %4093 = vset.pattern.permute.xlu1 %v5025_v30 }
0x1a97   :  { %2728 = vperm.xlu1 %4093, %v2650_v63  }
0x1a9b   :  { %4094 = vset.pattern.permute.xlu1 %v5026_v24 }
0x1ae4   :  { %v2654_v9 = vpop.permute.xlu1 %2653  ;;  %v2659_v7 = vpop.permute.xlu0 %2658 }
0x1ae5   :  { %v2661_v19 = vmul.f32 %v2659_v7, %v4369_v34  ;;  %v2656_v1 = vmul.f32 %v2654_v9, %v4367_v33 }
0x1ae9   :  { %v2664_v4 = vpop.permute.xlu1 %2663  ;;  %v2674_v5 = vpop.permute.xlu0 %2673 }
0x1aea   :  { %v2676_v61 = vmul.f32 %v2674_v5, %v4378_v40  ;;  %v2666_v3 = vmul.f32 %v2664_v4, %v4374_v38  ;;  %v2732_v4 = vadd.f32 %v2661_v19, %v2656_v1 }
0x1aee   :  { %v2669_v60 = vpop.permute.xlu1 %2668  ;;  %v2689_v36 = vpop.permute.xlu0 %2688 }
0x1aef   :  { %v2671_v37 = vmul.f32 %v2669_v60, %v4376_v39  ;;  %v2691_v29 = vmul.f32 %v2689_v36, %v4389_v46 }
0x1af1   :  { %v2733_v18 = vadd.f32 %v2671_v37, %v2666_v3 }
0x1af3   :  { %v2679_v15 = vpop.permute.xlu1 %2678  ;;  %v2704_v35 = vpop.permute.xlu0 %2703 }
0x1af4   :  { %v2681_v25 = vmul.f32 %v2679_v15, %v4380_v41  ;;  %v2706_v11 = vmul.f32 %v2704_v35, %v4395_v49 }
0x1af6   :  { %v2734_v63 = vadd.f32 %v2681_v25, %v2676_v61 }
0x1af8   :  { %v2684_v23 = vpop.permute.xlu1 %2683  ;;  %v2719_v32 = vpop.permute.xlu0 %2718 }
0x1af9   :  { %v2686_v22 = vmul.f32 %v2684_v23, %v4387_v45  ;;  %v2721_v60 = vmul.f32 %v2719_v32, %v4401_v53 }
0x1afb   :  { %v2735_v10 = vadd.f32 %v2691_v29, %v2686_v22 }
0x1afd   :  { %v2694_v31 = vpop.permute.xlu1 %2693  ;;  %v2741_v36 = vadd.f32 %v2735_v10, %v2734_v63 }
0x1afe   :  { %v2696_v23 = vmul.f32 %v2694_v31, %v4391_v47 }
0x1b02   :  { %v2699_v59 = vpop.permute.xlu1 %2698 }
0x1b03   :  { %v2701_v8 = vmul.f32 %v2699_v59, %v4393_v48  ;;  %v2740_v59 = vadd.f32 %v2733_v18, %v2732_v4 }
0x1b05   :  { %v2744_v37 = vadd.f32 %v2741_v36, %v2740_v59 }
0x1b07   :  { %v2709_v28 = vpop.permute.xlu1 %2708 }
0x1b08   :  { %v2711_v51 = vmul.f32 %v2709_v28, %v4397_v50  ;;  %v2736_v28 = vadd.f32 %v2701_v8, %v2696_v23 }
0x1b0a   :  { %v2737_v7 = vadd.f32 %v2711_v51, %v2706_v11 }
0x1b0c   :  { %v2714_v14 = vpop.permute.xlu1 %2713  ;;  %v2742_v29 = vadd.f32 %v2737_v7, %v2736_v28 }
0x1b0d   :  { %v2716_v62 = vmul.f32 %v2714_v14, %v4399_v52 }
0x1b0f   :  { %v2738_v35 = vadd.f32 %v2721_v60, %v2716_v62  ;;  %v2760_v62 = vrot.slane %v4834_v6, 6 }
0x1b11   :  { %v2724_v13 = vpop.permute.xlu1 %2723 }
0x1b12   :  { %v2726_v9 = vmul.f32 %v2724_v13, %v4403_v54 }
0x1b16   :  { %v2729_v15 = vpop.permute.xlu1 %2728 }
0x1b17   :  { %v2731_v5 = vmul.f32 %v2729_v15, %v4405_v55 }
0x1b19   :  { %v2739_v22 = vadd.f32 %v2731_v5, %v2726_v9 }
0x1b1b   :  { %v2743_v14 = vadd.f32 %v2739_v22, %v2738_v35 }
0x1b1d   :  { %v2745_v25 = vadd.f32 %v2743_v14, %v2742_v29 }
0x1b1f   :  { %v2746_v61 = vadd.f32 %v2745_v25, %v2744_v37 }
0x1b21   :  { %v2748_v32 = vrot.slane %v2746_v61, 6 }
0x1b23   :  { %v2750_v3 = vadd.f32 %v4428_v44, %v2748_v32 }
0x1b25   :  { %v3550_v31 = vmul.f32 -1.442695, %v2750_v3 }
0x1b27   :  { %4193 = vpow2.f32 %v3550_v31 }
0x1b31   :  { %v4194_v51 = vpop.eup %4193 }
0x1b32   :  { %v2754_v13 = vadd.f32 1.0, %v4194_v51 }
0x1b34   :  { %4195 = vrcp.f32 %v2754_v13 }
0x1b3e   :  { %v4196_v11 = vpop.eup %4195 }
0x1b3f   :  { %v2757_v19 = vmul.f32 2.0, %v4196_v11  ;;  %v2762_v18 = vmul.f32 %v4196_v11, %v2760_v62 }
0x1b41   :  { %v3551_v1 = vadd.f32 -1.0, %v2757_v19 }
0x1b43   :  { %2764 = vrot.lane.b32.xlu0 %v3551_v1, %s4235_s4 }
0x1bb5   :  { %v2765_v10 = vpop.permute.xlu0 %2764 }
0x1bb6   :  { %v2767_v8 = vmul.f32 %v4196_v11, %v2765_v10 }
0x1bb8   :  { %2769 = vrot.lane.b32.xlu1 %v2767_v8, %s4236_s5 }
0x1c2a   :  { %v2770_v63 = vpop.permute.xlu1 %2769 }
0x1c2b   :  { %v4874_v60 = vadd.f32 %v2770_v63, %v2762_v18 }
0x1c2d   :  { %4197 = vtanh.f32 %v4874_v60 }
0x1c37   :  { %v4198_v44 = vpop.eup %4197 }
0x1c38   :  { %2775 = vrot.lane.b32.xlu0 %v4198_v44, %s4239_s23 }
0x1caa   :  { %v2776_v15 = vpop.permute.xlu0 %2775 }
0x1cab   :  { %v2778_v23 = vmul.f32 %v4196_v11, %v2776_v15 }
0x1cad   :  { %2786 = vperm.xlu0 %4095, %v2778_v23   ;;  %2781 = vperm.xlu1 %4094, %v2778_v23  }
0x1cb1   :  { %4098 = vset.pattern.permute.xlu0 %v5039_v57  ;;  %4096 = vset.pattern.permute.xlu1 %v5037_v12 }
0x1cb2   :  { %2801 = vperm.xlu0 %4098, %v2778_v23   ;;  %2791 = vperm.xlu1 %4096, %v2778_v23  }
0x1cb6   :  { %4101 = vset.pattern.permute.xlu0 %v5038_v43  ;;  %4097 = vset.pattern.permute.xlu1 %v5035_v58 }
0x1cb7   :  { %2816 = vperm.xlu0 %4101, %v2778_v23   ;;  %2796 = vperm.xlu1 %4097, %v2778_v23  }
0x1cbb   :  { %4104 = vset.pattern.permute.xlu0 %v5036_v16  ;;  %4099 = vset.pattern.permute.xlu1 %v5033_v26 }
0x1cbc   :  { %2831 = vperm.xlu0 %4104, %v2778_v23   ;;  %2806 = vperm.xlu1 %4099, %v2778_v23  }
0x1cc0   :  { %4107 = vset.pattern.permute.xlu0 %v5034_v27  ;;  %4100 = vset.pattern.permute.xlu1 %v5030_v20 }
0x1cc1   :  { %2846 = vperm.xlu0 %4107, %v2778_v23   ;;  %2811 = vperm.xlu1 %4100, %v2778_v23  }
0x1cc5   :  { %4102 = vset.pattern.permute.xlu1 %v5031_v2  ;;  %4111 = vset.pattern.permute.xlu0 %v5032_v17 }
0x1cc6   :  { %2821 = vperm.xlu1 %4102, %v2778_v23  }
0x1cca   :  { %4103 = vset.pattern.permute.xlu1 %v5027_v21 }
0x1ccb   :  { %2826 = vperm.xlu1 %4103, %v2778_v23  }
0x1ccf   :  { %4105 = vset.pattern.permute.xlu1 %v5028_v56 }
0x1cd0   :  { %2836 = vperm.xlu1 %4105, %v2778_v23  }
0x1cd4   :  { %4106 = vset.pattern.permute.xlu1 %v5029_v42 }
0x1cd5   :  { %2841 = vperm.xlu1 %4106, %v2778_v23  }
0x1cd9   :  { %4108 = vset.pattern.permute.xlu1 %v5024_v0 }
0x1cda   :  { %2851 = vperm.xlu1 %4108, %v2778_v23  }
0x1cde   :  { %4109 = vset.pattern.permute.xlu1 %v5025_v30 }
0x1cdf   :  { %2856 = vperm.xlu1 %4109, %v2778_v23  }
0x1ce3   :  { %4110 = vset.pattern.permute.xlu1 %v5026_v24 }
0x1d2c   :  { %v2782_v6 = vpop.permute.xlu1 %2781  ;;  %v2787_v4 = vpop.permute.xlu0 %2786 }
0x1d2d   :  { %v2789_v51 = vmul.f32 %v2787_v4, %v4369_v34  ;;  %v2784_v13 = vmul.f32 %v2782_v6, %v4367_v33 }
0x1d31   :  { %v2792_v17 = vpop.permute.xlu1 %2791  ;;  %v2802_v28 = vpop.permute.xlu0 %2801 }
0x1d32   :  { %v2804_v11 = vmul.f32 %v2802_v28, %v4378_v40  ;;  %v2794_v19 = vmul.f32 %v2792_v17, %v4374_v38  ;;  %v2860_v17 = vadd.f32 %v2789_v51, %v2784_v13 }
0x1d36   :  { %v2797_v7 = vpop.permute.xlu1 %2796  ;;  %v2817_v22 = vpop.permute.xlu0 %2816 }
0x1d37   :  { %v2799_v61 = vmul.f32 %v2797_v7, %v4376_v39  ;;  %v2819_v32 = vmul.f32 %v2817_v22, %v4389_v46 }
0x1d39   :  { %v2861_v18 = vadd.f32 %v2799_v61, %v2794_v19 }
0x1d3b   :  { %v2807_v9 = vpop.permute.xlu1 %2806  ;;  %v2832_v14 = vpop.permute.xlu0 %2831 }
0x1d3c   :  { %v2809_v24 = vmul.f32 %v2807_v9, %v4380_v41  ;;  %v2834_v1 = vmul.f32 %v2832_v14, %v4395_v49 }
0x1d3e   :  { %v2862_v63 = vadd.f32 %v2809_v24, %v2804_v11 }
0x1d40   :  { %v2812_v5 = vpop.permute.xlu1 %2811  ;;  %v2847_v3 = vpop.permute.xlu0 %2846 }
0x1d41   :  { %v2814_v37 = vmul.f32 %v2812_v5, %v4387_v45  ;;  %v2849_v44 = vmul.f32 %v2847_v3, %v4401_v53 }
0x1d43   :  { %v2863_v10 = vadd.f32 %v2819_v32, %v2814_v37  ;;  %v5040_v32 = vld [vmem:[#allocation5_spill] sm:$0xff] }
0x1d45   :  { %v2822_v36 = vpop.permute.xlu1 %2821  ;;  %v2869_v5 = vadd.f32 %v2863_v10, %v2862_v63  ;;  %v2888_v10 = vrot.slane %v4874_v60, 6 }
0x1d46   :  { %v2824_v23 = vmul.f32 %v2822_v36, %v4391_v47 }
0x1d4a   :  { %v2827_v35 = vpop.permute.xlu1 %2826 }
0x1d4b   :  { %v2829_v8 = vmul.f32 %v2827_v35, %v4393_v48  ;;  %v2868_v35 = vadd.f32 %v2861_v18, %v2860_v17 }
0x1d4d   :  { %v2864_v4 = vadd.f32 %v2829_v8, %v2824_v23  ;;  %v2872_v14 = vadd.f32 %v2869_v5, %v2868_v35 }
0x1d4f   :  { %v2837_v59 = vpop.permute.xlu1 %2836 }
0x1d50   :  { %v2839_v31 = vmul.f32 %v2837_v59, %v4397_v50 }
0x1d52   :  { %v2865_v7 = vadd.f32 %v2839_v31, %v2834_v1 }
0x1d54   :  { %v2842_v29 = vpop.permute.xlu1 %2841  ;;  %v2870_v59 = vadd.f32 %v2865_v7, %v2864_v4 }
0x1d55   :  { %v2844_v62 = vmul.f32 %v2842_v29, %v4399_v52 }
0x1d57   :  { %v2866_v28 = vadd.f32 %v2849_v44, %v2844_v62 }
0x1d59   :  { %v2852_v25 = vpop.permute.xlu1 %2851 }
0x1d5a   :  { %v2854_v6 = vmul.f32 %v2852_v25, %v4403_v54 }
0x1d5e   :  { %v2857_v15 = vpop.permute.xlu1 %2856 }
0x1d5f   :  { %v2859_v9 = vmul.f32 %v2857_v15, %v4405_v55 }
0x1d61   :  { %v2867_v22 = vadd.f32 %v2859_v9, %v2854_v6 }
0x1d63   :  { %v2871_v29 = vadd.f32 %v2867_v22, %v2866_v28 }
0x1d65   :  { %v2873_v37 = vadd.f32 %v2871_v29, %v2870_v59 }
0x1d67   :  { %v2874_v61 = vadd.f32 %v2873_v37, %v2872_v14 }
0x1d69   :  { %v2876_v24 = vrot.slane %v2874_v61, 6 }
0x1d6b   :  { %v2878_v3 = vadd.f32 %v5040_v32, %v2876_v24 }
0x1d6d   :  { %v3552_v36 = vmul.f32 -1.442695, %v2878_v3 }
0x1d6f   :  { %4199 = vpow2.f32 %v3552_v36 }
0x1d79   :  { %v4200_v31 = vpop.eup %4199 }
0x1d7a   :  { %v2882_v25 = vadd.f32 1.0, %v4200_v31 }
0x1d7c   :  { %4201 = vrcp.f32 %v2882_v25 }
0x1d86   :  { %v4202_v11 = vpop.eup %4201 }
0x1d87   :  { %v2885_v51 = vmul.f32 2.0, %v4202_v11  ;;  %v2890_v8 = vmul.f32 %v4202_v11, %v2888_v10 }
0x1d89   :  { %v3553_v13 = vadd.f32 -1.0, %v2885_v51 }
0x1d8b   :  { %2892 = vrot.lane.b32.xlu0 %v3553_v13, %s4235_s4 }
0x1dfd   :  { %v2893_v19 = vpop.permute.xlu0 %2892 }
0x1dfe   :  { %v2895_v1 = vmul.f32 %v4202_v11, %v2893_v19 }
0x1e00   :  { %2897 = vrot.lane.b32.xlu1 %v2895_v1, %s4236_s5 }
0x1e72   :  { %v2898_v62 = vpop.permute.xlu1 %2897 }
0x1e73   :  { %v4914_v18 = vadd.f32 %v2898_v62, %v2890_v8 }
0x1e75   :  { %4203 = vtanh.f32 %v4914_v18  ;;  %v3016_v8 = vrot.slane %v4914_v18, 6 }
0x1e7f   :  { %v4204_v63 = vpop.eup %4203 }
0x1e80   :  { %2903 = vrot.lane.b32.xlu0 %v4204_v63, %s4239_s23 }
0x1ef2   :  { %v2904_v44 = vpop.permute.xlu0 %2903 }
0x1ef3   :  { %v2906_v15 = vmul.f32 %v4202_v11, %v2904_v44 }
0x1ef5   :  { %2914 = vperm.xlu0 %4111, %v2906_v15   ;;  %2909 = vperm.xlu1 %4110, %v2906_v15  }
0x1ef9   :  { %4114 = vset.pattern.permute.xlu0 %v5039_v57  ;;  %4112 = vset.pattern.permute.xlu1 %v5037_v12 }
0x1efa   :  { %2929 = vperm.xlu0 %4114, %v2906_v15   ;;  %2919 = vperm.xlu1 %4112, %v2906_v15  }
0x1efe   :  { %4117 = vset.pattern.permute.xlu0 %v5038_v43  ;;  %4113 = vset.pattern.permute.xlu1 %v5035_v58 }
0x1eff   :  { %2944 = vperm.xlu0 %4117, %v2906_v15   ;;  %2924 = vperm.xlu1 %4113, %v2906_v15  }
0x1f03   :  { %4120 = vset.pattern.permute.xlu0 %v5036_v16  ;;  %4115 = vset.pattern.permute.xlu1 %v5033_v26 }
0x1f04   :  { %2959 = vperm.xlu0 %4120, %v2906_v15   ;;  %2934 = vperm.xlu1 %4115, %v2906_v15  }
0x1f08   :  { %4123 = vset.pattern.permute.xlu0 %v5034_v27  ;;  %4116 = vset.pattern.permute.xlu1 %v5030_v20 }
0x1f09   :  { %2974 = vperm.xlu0 %4123, %v2906_v15   ;;  %2939 = vperm.xlu1 %4116, %v2906_v15  }
0x1f0d   :  { %4118 = vset.pattern.permute.xlu1 %v5031_v2  ;;  %4126 = vset.pattern.permute.xlu0 %v5025_v30 }
0x1f0e   :  { %2949 = vperm.xlu1 %4118, %v2906_v15  }
0x1f12   :  { %4119 = vset.pattern.permute.xlu1 %v5027_v21 }
0x1f13   :  { %2954 = vperm.xlu1 %4119, %v2906_v15  }
0x1f17   :  { %4121 = vset.pattern.permute.xlu1 %v5028_v56 }
0x1f18   :  { %2964 = vperm.xlu1 %4121, %v2906_v15  }
0x1f1c   :  { %4122 = vset.pattern.permute.xlu1 %v5029_v42 }
0x1f1d   :  { %2969 = vperm.xlu1 %4122, %v2906_v15  }
0x1f21   :  { %4124 = vset.pattern.permute.xlu1 %v5024_v0 }
0x1f22   :  { %2979 = vperm.xlu1 %4124, %v2906_v15  }
0x1f26   :  { %4125 = vset.pattern.permute.xlu1 %v5025_v30 }
0x1f27   :  { %2984 = vperm.xlu1 %4125, %v2906_v15   ;;  %v3035_v15 = vld [vmem:[%s4987_s6] sm:$0xff] }
0x1f74   :  { %v2910_v20 = vpop.permute.xlu1 %2909  ;;  %v2915_v16 = vpop.permute.xlu0 %2914 }
0x1f75   :  { %v2917_v5 = vmul.f32 %v2915_v16, %v4369_v34  ;;  %v2912_v4 = vmul.f32 %v2910_v20, %v4367_v33  ;;  %v3036_v20 = vld [vmem:[%s4987_s6 + $0x8] sm:$0xff]  ;;  %v4254_v16 = vmov 0.0|0.0   ;;  %s4257_s6 = smov 80  }
0x1f76   :  { %3815 = vmatprep.subr.bf16.mxu1 %v4254_v16 }
0x1f79   :  { %v2920_v2 = vpop.permute.xlu1 %2919  ;;  %v2930_v12 = vpop.permute.xlu0 %2929 }
0x1f7a   :  { %v2932_v28 = vmul.f32 %v2930_v12, %v4378_v40  ;;  %v2922_v22 = vmul.f32 %v2920_v2, %v4374_v38  ;;  %v2988_v38 = vadd.f32 %v2917_v5, %v2912_v4  ;;  %v3052_v2 = vand.u32 4294901760, %v3035_v15 }
0x1f7e   :  { %v2925_v26 = vpop.permute.xlu1 %2924  ;;  %v2945_v56 = vpop.permute.xlu0 %2944 }
0x1f7f   :  { %v2927_v7 = vmul.f32 %v2925_v26, %v4376_v39  ;;  %v2947_v6 = vmul.f32 %v2945_v56, %v4389_v46  ;;  %v3055_v26 = vand.u32 4294901760, %v3036_v20 }
0x1f81   :  { %v2989_v59 = vadd.f32 %v2927_v7, %v2922_v22  ;;  %v3137_v18 = vsub.f32 %v3036_v20, %v3055_v26 }
0x1f83   :  { %v2935_v27 = vpop.permute.xlu1 %2934  ;;  %v2960_v42 = vpop.permute.xlu0 %2959 }
0x1f84   :  { %v2937_v30 = vmul.f32 %v2935_v27, %v4380_v41  ;;  %v3816_v27 = vpack.c.bf16 %v3055_v26, %v3052_v2 }
0x1f86   :  { %v2990_v46 = vadd.f32 %v2937_v30, %v2932_v28  ;;  %3817 = vmatpush3.bf16.msra.mxu1 %v3816_v27 }
0x1f87   :  { %3818 = vmatprep.subr.bf16.mxu1 %v4254_v16 }
0x1f88   :  { %v2940_v58 = vpop.permute.xlu1 %2939  ;;  %v2975_v9 = vpop.permute.xlu0 %2974 }
0x1f89   :  { %v2942_v23 = vmul.f32 %v2940_v58, %v4387_v45  ;;  %v2962_v45 = vmul.f32 %v2960_v42, %v4395_v49  ;;  %v2977_v29 = vmul.f32 %v2975_v9, %v4401_v53  ;;  %v3130_v58 = vsub.f32 %v3035_v15, %v3052_v2 }
0x1f8b   :  { %v2991_v35 = vadd.f32 %v2947_v6, %v2942_v23  ;;  %v3131_v12 = vand.u32 4294901760, %v3130_v58  ;;  %v3822_v6 = vpack.c.bf16 %v3137_v18, %v3130_v58 }
0x1f8d   :  { %v2950_v21 = vpop.permute.xlu1 %2949  ;;  %v2997_v37 = vadd.f32 %v2991_v35, %v2990_v46 }
0x1f8e   :  { %v2952_v34 = vmul.f32 %v2950_v21, %v4391_v47 }
0x1f92   :  { %v2955_v43 = vpop.permute.xlu1 %2954 }
0x1f93   :  { %v2957_v39 = vmul.f32 %v2955_v43, %v4393_v48  ;;  %v2996_v48 = vadd.f32 %v2989_v59, %v2988_v38  ;;  %v3138_v43 = vand.u32 4294901760, %v3137_v18 }
0x1f95   :  { %v2992_v49 = vadd.f32 %v2957_v39, %v2952_v34  ;;  %v3000_v36 = vadd.f32 %v2997_v37, %v2996_v48  ;;  %v3139_v42 = vsub.f32 %v3137_v18, %v3138_v43  ;;  %v3828_v9 = vpack.c.bf16 %v3138_v43, %v3131_v12  ;;  %v3556_v39 = vld [vmem:[%s4988_s7] ss:$0 sm:$0xff] }
0x1f97   :  { %v2965_v57 = vpop.permute.xlu1 %2964  ;;  %v3140_v7 = vand.u32 4294901760, %v3139_v42 }
0x1f98   :  { %v2967_v17 = vmul.f32 %v2965_v57, %v4397_v50  ;;  %v4256_v57 = vmov 0.0  }
0x1f99   :  { %3753 = vmatprep.mubr.msk.f32.mxu1 %vm4255_vm3, %v4256_v57 }
0x1f9a   :  { %v2993_v14 = vadd.f32 %v2967_v17, %v2962_v45 }
0x1f9c   :  { %v2970_v60 = vpop.permute.xlu1 %2969  ;;  %v2998_v3 = vadd.f32 %v2993_v14, %v2992_v49 }
0x1f9d   :  { %v2972_v41 = vmul.f32 %v2970_v60, %v4399_v52  ;;  %v3132_v60 = vsub.f32 %v3130_v58, %v3131_v12 }
0x1f9f   :  { %v2994_v61 = vadd.f32 %v2977_v29, %v2972_v41 }
0x1fa1   :  { %v2980_v0 = vpop.permute.xlu1 %2979 }
0x1fa2   :  { %v2982_v33 = vmul.f32 %v2980_v0, %v4403_v54  ;;  %v3133_v0 = vand.u32 4294901760, %v3132_v60 }
0x1fa4   :  { %v3819_v30 = vpack.c.bf16 %v3140_v7, %v3133_v0 }
0x1fa6   :  { %v2985_v50 = vpop.permute.xlu1 %2984 }
0x1fa7   :  { %v2987_v40 = vmul.f32 %v2985_v50, %v4405_v55 }
0x1fa9   :  { %v2995_v24 = vadd.f32 %v2987_v40, %v2982_v33 }
0x1fab   :  { %v2999_v52 = vadd.f32 %v2995_v24, %v2994_v61 }
0x1fad   :  { %v3001_v31 = vadd.f32 %v2999_v52, %v2998_v3 }
0x1faf   :  { %v3002_v25 = vadd.f32 %v3001_v31, %v3000_v36 }
0x1fb1   :  { %v3004_v53 = vrot.slane %v3002_v25, 6 }
0x1fb3   :  { %v3006_v11 = vadd.f32 %v5040_v32, %v3004_v53 }
0x1fb5   :  { %v3554_v47 = vmul.f32 -1.442695, %v3006_v11 }
0x1fb7   :  { %4205 = vpow2.f32 %v3554_v47 }
0x1fc1   :  { %v4206_v51 = vpop.eup %4205 }
0x1fc2   :  { %v3010_v54 = vadd.f32 1.0, %v4206_v51 }
0x1fc4   :  { %4207 = vrcp.f32 %v3010_v54 }
0x1fce   :  { %v4208_v55 = vpop.eup %4207 }
0x1fcf   :  { %v3013_v13 = vmul.f32 2.0, %v4208_v55  ;;  %v3018_v62 = vmul.f32 %v4208_v55, %v3016_v8 }
0x1fd1   :  { %v3555_v19 = vadd.f32 -1.0, %v3013_v13 }
0x1fd3   :  { %3020 = vrot.lane.b32.xlu0 %v3555_v19, %s4235_s4 }
0x2045   :  { %v3021_v1 = vpop.permute.xlu0 %3020 }
0x2046   :  { %v3023_v10 = vmul.f32 %v4208_v55, %v3021_v1 }
0x2048   :  { %3025 = vrot.lane.b32.xlu1 %v3023_v10, %s4236_s5 }
0x20ba   :  { %v3026_v63 = vpop.permute.xlu1 %3025 }
0x20bb   :  { %v3028_v44 = vadd.f32 %v3026_v63, %v3018_v62 }
0x20bd   :  { %4209 = vtanh.f32 %v3028_v44 }
0x20c7   :  { %v4210_v32 = vpop.eup %4209 }
0x20c8   :  { %3031 = vrot.lane.b32.xlu0 %v4210_v32, %s4239_s23 }
0x213a   :  { %v3032_v21 = vpop.permute.xlu0 %3031 }
0x213b   :  { %v3034_v56 = vmul.f32 %v4208_v55, %v3032_v21 }
0x213d   :  { %v3045_v23 = vrot.slane %v3034_v56, 2 }
0x213f   :  { %3046 = vrot.lane.b32.xlu1 %v3045_v23, %s4257_s6 }
0x21b1   :  { %v3047_v17 = vpop.permute.xlu1 %3046 }
0x21b2   :  { %v3049_v5 = vsel %vm3048_vm4, %v3047_v17, 0 }
0x21b3   :  { %v3118_v4 = vand.u32 4294901760, %v3049_v5 }
0x21b5   :  { %v3119_v28 = vsub.f32 %v3049_v5, %v3118_v4 }
0x21b7   :  { %v3120_v22 = vand.u32 4294901760, %v3119_v28 }
0x21b9   :  { %v3121_v45 = vsub.f32 %v3119_v28, %v3120_v22 }
0x21bb   :  { %v3122_v35 = vand.u32 4294901760, %v3121_v45 }
0x21bd   :  { %3754 = vmatmul.mubr.f32.vlgmr.msra.gmra.mrb[4].mxu1 %v3122_v35 }
0x21be   :  { %3820 = vmatpush3.bf16.msra.mxu1 %v3819_v30  ;;  %3760 = vmatprep.mubr.msk.f32.mxu1 %vm4255_vm3, %v4256_v57 }
0x21bf   :  { %3821 = vmatprep.subr.bf16.mxu1 %v4254_v16 }
0x21c5   :  { %3761 = vmatmul.mubr.f32.vlgmr.msra.gmra.mrb[4].mxu1 %v3118_v4 }
0x21c6   :  { %3823 = vmatpush3.bf16.msra.mxu1 %v3822_v6  ;;  %3767 = vmatprep.mubr.msk.f32.mxu1 %vm4255_vm3, %v4256_v57 }
0x21c7   :  { %3824 = vmatprep.subr.bf16.mxu1 %v4254_v16 }
0x21cd   :  { %3768 = vmatmul.mubr.f32.vlgmr.msra.gmra.mrb[4].mxu1 %v3119_v28 }
0x21ce   :  { %3826 = vmatpush3.bf16.msra.mxu1 %v3816_v27  ;;  %3774 = vmatprep.mubr.msk.f32.mxu1 %vm4255_vm3, %v4256_v57 }
0x21cf   :  { %3827 = vmatprep.subr.bf16.mxu1 %v4254_v16 }
0x21d5   :  { %3775 = vmatmul.mubr.f32.vlgmr.msra.gmra.mrb[4].mxu1 %v3120_v22 }
0x21d6   :  { %3829 = vmatpush3.bf16.msra.mxu1 %v3828_v9  ;;  %3781 = vmatprep.mubr.msk.f32.mxu1 %vm4255_vm3, %v4256_v57 }
0x21d7   :  { %3830 = vmatprep.subr.bf16.mxu1 %v4254_v16 }
0x21dd   :  { %3782 = vmatmul.mubr.f32.vlgmr.msra.gmra.mrb[4].mxu1 %v3118_v4 }
0x21de   :  { %3832 = vmatpush3.bf16.msra.mxu1 %v3816_v27  ;;  %3788 = vmatprep.mubr.msk.f32.mxu1 %vm4255_vm3, %v4256_v57 }
0x21e5   :  { %3789 = vmatmul.mubr.f32.vlgmr.msra.gmra.mrb[4].mxu1 %v3118_v4 }
0x22b8   :  { %v3506_v41 = vpop.f32.mrb[4].mxu1 }
0x22b9   :  { %v3847_v59 = vadd.f32 %v3556_v39, %v3506_v41  ;;  %v3790_v46 = vpop.f32.mrb[5].mxu1 }
0x22bb   :  { %3511 = vst.msk [vmem:[#allocation2] sm:$0x3] %vm3510_vm5, %v3847_v59 }
0x22bc   :  { %4222 = shalt.err (!%p4219_p4)
}
0x22bd   :  { %s4223_s13 = scalar_lea.hbm %s4989_s8, 32 }
0x22be   :  { %p4224_p5 = scmp.ne.s32.totalorder %s4989_s8, %s4223_s13  ;;  %p4227_p6 = scmp.lt.u32.totalorder %s4223_s13, %s4989_s8 }
0x22c0   :  { %p4229_p7 = pnand %p4227_p6, %p4224_p5 }
0x22c2   :  { %4232 = shalt.err (!%p4229_p7)
}
0x22c3   :  { %3521 = dma.vmem_to_hbm [thread:$0]  %s3519_s9, 32, %s4989_s8, [#allocation3]  }
0x22c4   :  { %4233 = dma.done.wait [#allocation3], 32  }
0x22c5   :  { %4234 = vsyncadd [#allocation3], 4294967264 }
0x22c6   :  { %3525 = vsyncpa [#allocation3], 1 }

</bundles_post_ra>
